<compile_context>
chip_gen: v7x
topology: tpu7x:2x2x1
jax: 0.10.0
libtpu: 0.0.40
codegen_flags: <defaults>
</compile_context>

<pallas_src>
import math

import jax
import jax.numpy as jnp
from jax.experimental import pallas as pl
from jax.experimental.pallas import tpu as pltpu


# ---------------------------------------------------------------------------
# helpers
# ---------------------------------------------------------------------------
def _round_up(x: int, m: int) -> int:
    return (x + m - 1) // m * m


def _pick_inner_tile(n: int) -> int:
    for t in (512, 256, 128):
        if n % t == 0:
            return t
    return n


# ---------------------------------------------------------------------------
# fused FeedForward kernel
# ---------------------------------------------------------------------------
def _ff_fused_kernel(x_ref, wh_ref, wg_ref, bh_ref, bg_ref, w2_ref, b2_ref,
                     o_ref, acc_ref):
    """Per grid step (i, j):
         h = x_tile @ w1[:, j-th value chunk] + b_h[j]   (f32 accum on MXU)
         g = x_tile @ w1[:, j-th gate  chunk] + b_g[j]
         p = h * gelu(g)                                  (exact erf GELU, f32)
         acc += p @ w2[j-th row chunk, :]                 (f32 accum on MXU)
       at j == last:  out = acc + b2
    """
    j = pl.program_id(1)

    @pl.when(j == 0)
    def _init():
        acc_ref[...] = jnp.zeros_like(acc_ref)

    # x tile stays resident across all j (index_map only depends on i);
    # cast to bf16 in-kernel to feed the MXU.
    x = x_ref[...].astype(jnp.bfloat16)                       # (tm, K)

    h = jnp.dot(x, wh_ref[...], preferred_element_type=jnp.float32) + bh_ref[...]
    g = jnp.dot(x, wg_ref[...], preferred_element_type=jnp.float32) + bg_ref[...]

    # exact GELU (matches torch.nn.functional.gelu default), kept in f32
    gelu = 0.5 * g * (1.0 + jax.lax.erf(g * 0.7071067811865476))
    p = (h * gelu).astype(w2_ref.dtype)                       # bf16 for the MXU

    acc_ref[...] += jnp.dot(p, w2_ref[...], preferred_element_type=jnp.float32)

    @pl.when(j == pl.num_programs(1) - 1)
    def _finalize():
        o_ref[...] = (acc_ref[...] + b2_ref[...]).astype(o_ref.dtype)


def feed_forward(x, params, *, tile_m: int = 256):
    """FeedForward forward pass.

    x:       (..., dim) float32
    params:  w1 (dim, 2*inner), b1 (2*inner,), w2 (inner, dim_out), b2 (dim_out,)
             weights stored as (in_features, out_features), i.e. transposed
             relative to torch.nn.Linear.weight.
    """
    *lead, dim = x.shape
    M = math.prod(lead) if lead else 1

    w1, b1 = params["w1"], params["b1"]
    w2, b2 = params["w2"], params["b2"]
    inner = w1.shape[1] // 2
    dim_out = w2.shape[1]

    # weights cast once; the value/gate halves of w1 are addressed via
    # index_map block offsets (no physical split).
    w1_bf = w1.astype(jnp.bfloat16)                 # (dim, 2*inner)
    b1_r = b1.reshape(1, 2 * inner).astype(jnp.float32)
    w2_bf = w2.astype(jnp.bfloat16)                 # (inner, dim_out)
    b2_r = b2.reshape(1, dim_out).astype(jnp.float32)

    # row tiling: pad M up to the tile instead of shrinking the tile
    x2d = x.reshape(M, dim)
    tm = min(tile_m, _round_up(M, 8))
    m_pad = _round_up(M, tm)
    if m_pad != M:
        x2d = jnp.pad(x2d, ((0, m_pad - M), (0, 0)))

    tj = _pick_inner_tile(inner)
    num_j = inner // tj
    grid = (m_pad // tm, num_j)

    out = pl.pallas_call(
        _ff_fused_kernel,
        out_shape=jax.ShapeDtypeStruct((m_pad, dim_out), x.dtype),
        grid=grid,
        in_specs=[
            pl.BlockSpec((tm, dim), lambda i, j: (i, 0)),            # x rows (f32)
            pl.BlockSpec((dim, tj), lambda i, j: (0, j)),            # w1 value chunk
            pl.BlockSpec((dim, tj), lambda i, j: (0, num_j + j)),    # w1 gate  chunk
            pl.BlockSpec((1, tj), lambda i, j: (0, j)),              # b1 value chunk
            pl.BlockSpec((1, tj), lambda i, j: (0, num_j + j)),      # b1 gate  chunk
            pl.BlockSpec((tj, dim_out), lambda i, j: (j, 0)),        # w2 row chunk
            pl.BlockSpec((1, dim_out), lambda i, j: (0, 0)),         # b2
        ],
        out_specs=pl.BlockSpec((tm, dim_out), lambda i, j: (i, 0)),
        scratch_shapes=[pltpu.VMEM((tm, dim_out), jnp.float32)],
        compiler_params=pltpu.CompilerParams(
            dimension_semantics=("parallel", "arbitrary"),
            vmem_limit_bytes=48 * 1024 * 1024),
    )(x2d, w1_bf, w1_bf, b1_r, b1_r, w2_bf, b2_r)

    if m_pad != M:
        out = out[:M]
    # TODO(synk): nn.Dropout(p=0.0) is an eval-time no-op; intentionally omitted.
    return out.reshape(*lead, dim_out)


# ---------------------------------------------------------------------------
# pure-JAX reference (f32) for a loose correctness check
# ---------------------------------------------------------------------------
def feed_forward_ref(x, params):
    h = x @ params["w1"] + params["b1"]
    d = h.shape[-1] // 2
    hs, gate = h[..., :d], h[..., d:]
    gelu = 0.5 * gate * (1.0 + jax.lax.erf(gate * (1.0 / math.sqrt(2.0))))
    return (hs * gelu) @ params["w2"] + params["b2"]


# ---------------------------------------------------------------------------
# deterministic parameters
# ---------------------------------------------------------------------------
def init_params(key, *, dim, dim_out=None, mult=4):
    inner = dim * mult
    dim_out = dim if dim_out is None else dim_out
    k1, k2, k3, k4 = jax.random.split(key, 4)
    scale = 0.05
    return dict(
        w1=scale * jax.random.normal(k1, (dim, 2 * inner), jnp.float32),
        b1=0.01 * jax.random.normal(k2, (2 * inner,), jnp.float32),
        w2=scale * jax.random.normal(k3, (inner, dim_out), jnp.float32),
        b2=0.01 * jax.random.normal(k4, (dim_out,), jnp.float32),
    )


# ---------------------------------------------------------------------------
# main
# ---------------------------------------------------------------------------
if __name__ == "__main__":
    key = jax.random.PRNGKey(0)
    kp, kx = jax.random.split(key, 2)

    # small but representative: batch=2, seq=128, dim=128 -> inner=512
    batch, seq, dim = 2, 128, 128
    params = init_params(kp, dim=dim)
    hidden_states = jax.random.normal(kx, (batch, seq, dim), jnp.float32)

    out = feed_forward(hidden_states, params)
    out = jax.block_until_ready(out)

    assert out.shape == (batch, seq, dim), out.shape
    assert bool(jnp.all(jnp.isfinite(out)))

    # loose check vs f32 reference (kernel uses bf16 MXU operands, f32 accum)
    ref = feed_forward_ref(hidden_states, params)
    rel_err = float(jnp.max(jnp.abs(out - ref)) / (jnp.max(jnp.abs(ref)) + 1e-6))
    assert rel_err < 5e-2, rel_err

    print("KERNEL_OK")
</pallas_src>

<mosaic_0001>
module attributes {stable_mosaic.version = 11 : i64} {
  func.func @_ff_fused_kernel(%arg0: i32, %arg1: i32, %arg2: memref<256x128xf32, #tpu.memory_space<vmem>>, %arg3: memref<128x512xbf16, #tpu.memory_space<vmem>>, %arg4: memref<128x512xbf16, #tpu.memory_space<vmem>>, %arg5: memref<1x512xf32, #tpu.memory_space<vmem>>, %arg6: memref<1x512xf32, #tpu.memory_space<vmem>>, %arg7: memref<512x128xbf16, #tpu.memory_space<vmem>>, %arg8: memref<1x128xf32, #tpu.memory_space<vmem>>, %arg9: memref<256x128xf32, #tpu.memory_space<vmem>>, %arg10: memref<256x128xf32, #tpu.memory_space<vmem>>) attributes {dimension_semantics = [#tpu.dimension_semantics<parallel>, #tpu.dimension_semantics<arbitrary>], iteration_bounds = array<i64: 1, 1>, scalar_prefetch = 0 : i64, scratch_operands = 1 : i64, tpu.core_type = #tpu.core_type<tc>, window_params = [{transform_indices = @transform_0, window_bounds = array<i64: 256, 128>}, {transform_indices = @transform_1, window_bounds = array<i64: 128, 512>}, {transform_indices = @transform_2, window_bounds = array<i64: 128, 512>}, {transform_indices = @transform_3, window_bounds = array<i64: 1, 512>}, {transform_indices = @transform_4, window_bounds = array<i64: 1, 512>}, {transform_indices = @transform_5, window_bounds = array<i64: 512, 128>}, {pipeline_mode = #tpu.pipeline_mode<synchronous>, transform_indices = @transform_6, window_bounds = array<i64: 1, 128>}, {transform_indices = @transform_7, window_bounds = array<i64: 256, 128>}]} {
    %c0_i32 = arith.constant 0 : i32
    %0 = arith.cmpi eq, %arg1, %c0_i32 : i32
    %1 = arith.extui %0 : i1 to i32
    %c0_i32_0 = arith.constant 0 : i32
    %2 = arith.cmpi ne, %1, %c0_i32_0 : i32
    scf.if %2 {
      %cst_23 = arith.constant 0.000000e+00 : f32
      %33 = vector.broadcast %cst_23 : f32 to vector<256x128xf32>
      %c0_24 = arith.constant 0 : index
      %c0_25 = arith.constant 0 : index
      %34 = vector.load %arg10[%c0_24, %c0_25] : memref<256x128xf32, #tpu.memory_space<vmem>>, vector<256x128xf32>
      tpu.vector_store %arg10[%c0_24, %c0_25], %33 {strides = array<i32>} : memref<256x128xf32, #tpu.memory_space<vmem>>, vector<256x128xf32>,
    } else {
    }
    %c0 = arith.constant 0 : index
    %c0_1 = arith.constant 0 : index
    %3 = vector.load %arg2[%c0, %c0_1] : memref<256x128xf32, #tpu.memory_space<vmem>>, vector<256x128xf32>
    %4 = arith.truncf %3 : vector<256x128xf32> to vector<256x128xbf16>
    %c0_2 = arith.constant 0 : index
    %c0_3 = arith.constant 0 : index
    %5 = vector.load %arg3[%c0_2, %c0_3] : memref<128x512xbf16, #tpu.memory_space<vmem>>, vector<128x512xbf16>
    %cst = arith.constant dense<0.000000e+00> : vector<256x512xf32>
    %6 = tpu.matmul %4, %5, %cst {dimension_numbers = #tpu.dot_dimension_numbers<[1], [0], [0], [1], [0, 0, 1, 1], [], []>} : vector<256x128xbf16>, vector<128x512xbf16>, vector<256x512xf32> -> vector<256x512xf32>
    %c0_4 = arith.constant 0 : index
    %c0_5 = arith.constant 0 : index
    %7 = vector.load %arg5[%c0_4, %c0_5] : memref<1x512xf32, #tpu.memory_space<vmem>>, vector<1x512xf32>
    %8 = vector.broadcast %7 : vector<1x512xf32> to vector<256x512xf32>
    %9 = arith.addf %6, %8 : vector<256x512xf32>
    %c0_6 = arith.constant 0 : index
    %c0_7 = arith.constant 0 : index
    %10 = vector.load %arg4[%c0_6, %c0_7] : memref<128x512xbf16, #tpu.memory_space<vmem>>, vector<128x512xbf16>
    %cst_8 = arith.constant dense<0.000000e+00> : vector<256x512xf32>
    %11 = tpu.matmul %4, %10, %cst_8 {dimension_numbers = #tpu.dot_dimension_numbers<[1], [0], [0], [1], [0, 0, 1, 1], [], []>} : vector<256x128xbf16>, vector<128x512xbf16>, vector<256x512xf32> -> vector<256x512xf32>
    %c0_9 = arith.constant 0 : index
    %c0_10 = arith.constant 0 : index
    %12 = vector.load %arg6[%c0_9, %c0_10] : memref<1x512xf32, #tpu.memory_space<vmem>>, vector<1x512xf32>
    %13 = vector.broadcast %12 : vector<1x512xf32> to vector<256x512xf32>
    %14 = arith.addf %11, %13 : vector<256x512xf32>
    %cst_11 = arith.constant 5.000000e-01 : f32
    %15 = vector.broadcast %cst_11 : f32 to vector<256x512xf32>
    %16 = arith.mulf %15, %14 : vector<256x512xf32>
    %cst_12 = arith.constant 0.707106769 : f32
    %17 = vector.broadcast %cst_12 : f32 to vector<256x512xf32>
    %18 = arith.mulf %14, %17 : vector<256x512xf32>
    %19 = math.erf %18 : vector<256x512xf32>
    %cst_13 = arith.constant 1.000000e+00 : f32
    %20 = vector.broadcast %cst_13 : f32 to vector<256x512xf32>
    %21 = arith.addf %20, %19 : vector<256x512xf32>
    %22 = arith.mulf %16, %21 : vector<256x512xf32>
    %23 = arith.mulf %9, %22 : vector<256x512xf32>
    %24 = arith.truncf %23 : vector<256x512xf32> to vector<256x512xbf16>
    %c0_14 = arith.constant 0 : index
    %c0_15 = arith.constant 0 : index
    %25 = vector.load %arg10[%c0_14, %c0_15] : memref<256x128xf32, #tpu.memory_space<vmem>>, vector<256x128xf32>
    %c0_16 = arith.constant 0 : index
    %c0_17 = arith.constant 0 : index
    %26 = vector.load %arg7[%c0_16, %c0_17] : memref<512x128xbf16, #tpu.memory_space<vmem>>, vector<512x128xbf16>
    %cst_18 = arith.constant dense<0.000000e+00> : vector<256x128xf32>
    %27 = tpu.matmul %24, %26, %cst_18 {dimension_numbers = #tpu.dot_dimension_numbers<[1], [0], [0], [1], [0, 0, 1, 1], [], []>} : vector<256x512xbf16>, vector<512x128xbf16>, vector<256x128xf32> -> vector<256x128xf32>
    %28 = arith.addf %25, %27 : vector<256x128xf32>
    %c0_19 = arith.constant 0 : index
    %c0_20 = arith.constant 0 : index
    %29 = vector.load %arg10[%c0_19, %c0_20] : memref<256x128xf32, #tpu.memory_space<vmem>>, vector<256x128xf32>
    tpu.vector_store %arg10[%c0_19, %c0_20], %28 {strides = array<i32>} : memref<256x128xf32, #tpu.memory_space<vmem>>, vector<256x128xf32>,
    %c0_i32_21 = arith.constant 0 : i32
    %30 = arith.cmpi eq, %arg1, %c0_i32_21 : i32
    %31 = arith.extui %30 : i1 to i32
    %c0_i32_22 = arith.constant 0 : i32
    %32 = arith.cmpi ne, %31, %c0_i32_22 : i32
    scf.if %32 {
      %c0_23 = arith.constant 0 : index
      %c0_24 = arith.constant 0 : index
      %33 = vector.load %arg10[%c0_23, %c0_24] : memref<256x128xf32, #tpu.memory_space<vmem>>, vector<256x128xf32>
      %c0_25 = arith.constant 0 : index
      %c0_26 = arith.constant 0 : index
      %34 = vector.load %arg8[%c0_25, %c0_26] : memref<1x128xf32, #tpu.memory_space<vmem>>, vector<1x128xf32>
      %35 = vector.broadcast %34 : vector<1x128xf32> to vector<256x128xf32>
      %36 = arith.addf %33, %35 : vector<256x128xf32>
      %c0_27 = arith.constant 0 : index
      %c0_28 = arith.constant 0 : index
      %37 = vector.load %arg9[%c0_27, %c0_28] : memref<256x128xf32, #tpu.memory_space<vmem>>, vector<256x128xf32>
      tpu.vector_store %arg9[%c0_27, %c0_28], %36 {strides = array<i32>} : memref<256x128xf32, #tpu.memory_space<vmem>>, vector<256x128xf32>,
    } else {
    }
    return
  }
  func.func @transform_0(%arg0: i32, %arg1: i32) -> (i32, i32) {
    %c0_i32 = arith.constant 0 : i32
    %c0_i32_0 = arith.constant 0 : i32
    return %arg0, %c0_i32 : i32, i32
  }
  func.func @transform_1(%arg0: i32, %arg1: i32) -> (i32, i32) {
    %c0_i32 = arith.constant 0 : i32
    %c0_i32_0 = arith.constant 0 : i32
    return %c0_i32, %arg1 : i32, i32
  }
  func.func @transform_2(%arg0: i32, %arg1: i32) -> (i32, i32) {
    %c1_i32 = arith.constant 1 : i32
    %0 = arith.addi %c1_i32, %arg1 : i32
    %c0_i32 = arith.constant 0 : i32
    %c0_i32_0 = arith.constant 0 : i32
    return %c0_i32, %0 : i32, i32
  }
  func.func @transform_3(%arg0: i32, %arg1: i32) -> (i32, i32) {
    %c0_i32 = arith.constant 0 : i32
    %c0_i32_0 = arith.constant 0 : i32
    return %c0_i32, %arg1 : i32, i32
  }
  func.func @transform_4(%arg0: i32, %arg1: i32) -> (i32, i32) {
    %c1_i32 = arith.constant 1 : i32
    %0 = arith.addi %c1_i32, %arg1 : i32
    %c0_i32 = arith.constant 0 : i32
    %c0_i32_0 = arith.constant 0 : i32
    return %c0_i32, %0 : i32, i32
  }
  func.func @transform_5(%arg0: i32, %arg1: i32) -> (i32, i32) {
    %c0_i32 = arith.constant 0 : i32
    %c0_i32_0 = arith.constant 0 : i32
    return %arg1, %c0_i32 : i32, i32
  }
  func.func @transform_6(%arg0: i32, %arg1: i32) -> (i32, i32) {
    %c0_i32 = arith.constant 0 : i32
    %c0_i32_0 = arith.constant 0 : i32
    %c0_i32_1 = arith.constant 0 : i32
    return %c0_i32, %c0_i32_0 : i32, i32
  }
  func.func @transform_7(%arg0: i32, %arg1: i32) -> (i32, i32) {
    %c0_i32 = arith.constant 0 : i32
    %c0_i32_0 = arith.constant 0 : i32
    return %arg0, %c0_i32 : i32, i32
  }
}

</mosaic_0001>

<bundles_post_ra>
// kernel: tpu_custom_call.1
= control target key start
LH: loop header
LB: loop body
LE: loop exit
PB: predicated region body
PF: predicated region fallthrough
CT: control target
= control target key end

     0   :  { %12 = vsyncpa [#allocation4], 0  ;;  %s6314_s0 = inlined_call_operand.hbm [shape: f32[256,128], index: 0, kind: input, shape index: {}]   ;;  %s6315_s1 = inlined_call_operand.hbm [shape: bf16[128,1024], index: 1, kind: input, shape index: {}]   ;;  %s6316_s2 = inlined_call_operand.hbm [shape: bf16[128,1024], index: 2, kind: input, shape index: {}]   ;;  %s6317_s3 = inlined_call_operand.vmem [shape: f32[1,1024], index: 3, kind: input, shape index: {}]   ;;  %s6318_s4 = inlined_call_operand.hbm [shape: f32[1,1024], index: 4, kind: input, shape index: {}]   ;;  %s6319_s5 = inlined_call_operand.hbm [shape: bf16[512,128], index: 5, kind: input, shape index: {}]   ;;  %s6320_s6 = inlined_call_operand.vmem [shape: f32[1,128], index: 6, kind: input, shape index: {}]   ;;  %s6321_s7 = inlined_call_operand.hbm [shape: f32[256,128], index: 7, kind: output, shape index: {}]  }
   0x1   :  { %13 = vsyncpa [#allocation7], 0 }
   0x2   :  { %14 = vsyncpa [#allocation10], 0 }
   0x3   :  { %15 = vsyncpa [#allocation5], 0  ;;  %s3888_s24 = smov [#allocation6]   ;;  %s3742_s28 = scalar_lea.hbm %s6315_s1, 4096 }
   0x4   :  { %s33_s25 = sshll.u32 %s3888_s24, 4  ;;  %p3743_p0 = scmp.ne.s32.totalorder %s6315_s1, %s3742_s28  ;;  %s34_s25 = int_to_ptr.vmem [resolvable:$true] %s33_s25 }
   0x5   :  { %s3744_s10 = scalar_lea.hbm %s6315_s1, 8192  ;;  %p3746_p2 = scmp.lt.u32.totalorder %s3742_s28, %s6315_s1 }
   0x6   :  { %p3745_p1 = scmp.lt.u32.totalorder %s3744_s10, %s3742_s28 }
   0x8   :  { %p3747_p3 = por %p3746_p2, %p3745_p1 }
   0xa   :  { %p3748_p4 = pnand %p3747_p3, %p3743_p0 }
   0xc   :  { %3751 = shalt.err (!%p3748_p4)
}
   0xd   :  { %s3752_s13 = scalar_lea.vmem %s34_s25, 4096  ;;  %p3757_p6 = scmp.lt.s32.totalorder %s34_s25, %s34_s25 }
   0xe   :  { %p3753_p5 = scmp.ne.s32.totalorder %s34_s25, %s3752_s13  ;;  %p3758_p7 = scmp.lt.s32.totalorder %s3752_s13, %s3752_s13 }
  0x10   :  { %p3759_p8 = por %p3758_p7, %p3757_p6 }
  0x12   :  { %p3760_p9 = pnand %p3759_p8, %p3753_p5 }
  0x14   :  { %3763 = shalt.err (!%p3760_p9)
}
  0x15   :  { %s3889_s14 = smov 512   ;;  %s3890_s15 = smov 256  }
  0x16   :  { %s3891_s16 = smov 16   ;;  %s3022_s21 = scalar_lea.hbm %s6318_s4, 64 }
  0x17   :  { %39 = dma.hbm_to_vmem [thread:$0]  %s6315_s1, 4096, %s34_s25, [#allocation7], %s3889_s14, %s3890_s15, %s3891_s16  }
  0x18   :  { %s3892_s22 = smov [#allocation9]   ;;  %s3893_s24 = smov [#allocation3]  }
  0x19   :  { %s68_s23 = sshll.u32 %s3892_s22, 4  ;;  %s21_s26 = sshll.u32 %s3893_s24, 4  ;;  %s69_s23 = int_to_ptr.vmem [resolvable:$true] %s68_s23  ;;  %s22_s26 = int_to_ptr.vmem [resolvable:$true] %s21_s26 }
  0x1a   :  { %s3788_s29 = scalar_lea.hbm %s6318_s4, 128  ;;  %p3767_p11 = scmp.lt.u32.totalorder %s3022_s21, %s6318_s4 }
  0x1b   :  { %p3765_p10 = scmp.ne.s32.totalorder %s3022_s21, %s3788_s29  ;;  %p3768_p12 = scmp.lt.u32.totalorder %s3788_s29, %s3788_s29 }
  0x1c   :  { %p3770_p0 = scmp.lt.u32.totalorder %s3788_s29, %s3022_s21 }
  0x1d   :  { %p3769_p13 = por %p3768_p12, %p3767_p11 }
  0x1f   :  { %p3771_p1 = por %p3770_p0, %p3769_p13 }
  0x21   :  { %p3772_p2 = pnand %p3771_p1, %p3765_p10 }
  0x23   :  { %3775 = shalt.err (!%p3772_p2)
}
  0x24   :  { %s3776_s1 = scalar_lea.vmem %s69_s23, 64  ;;  %p3781_p4 = scmp.lt.s32.totalorder %s69_s23, %s69_s23 }
  0x25   :  { %p3777_p3 = scmp.ne.s32.totalorder %s69_s23, %s3776_s1  ;;  %p3782_p5 = scmp.lt.s32.totalorder %s3776_s1, %s3776_s1 }
  0x27   :  { %p3783_p6 = por %p3782_p5, %p3781_p4 }
  0x29   :  { %p3784_p7 = pnand %p3783_p6, %p3777_p3 }
  0x2b   :  { %3787 = shalt.err (!%p3784_p7)
}
  0x2c   :  { %71 = dma.hbm_to_vmem [thread:$0]  %s3022_s21, 64, %s69_s23, [#allocation10]  }
  0x2d   :  { %s3972_s10 = scalar_lea.hbm %s6316_s2, 256  ;;  %s3789_s12 = scalar_lea.hbm %s6314_s0, 4096 }
  0x2e   :  { %p3790_p8 = scmp.ne.s32.totalorder %s6314_s0, %s3789_s12  ;;  %p3793_p9 = scmp.lt.u32.totalorder %s3789_s12, %s6314_s0 }
  0x30   :  { %p3795_p10 = pnand %p3793_p9, %p3790_p8 }
  0x32   :  { %3798 = shalt.err (!%p3795_p10)
}
  0x33   :  { %s3799_s20 = scalar_lea.vmem %s22_s26, 4096  ;;  %p3804_p12 = scmp.lt.s32.totalorder %s22_s26, %s22_s26 }
  0x34   :  { %p3800_p11 = scmp.ne.s32.totalorder %s22_s26, %s3799_s20  ;;  %p3805_p13 = scmp.lt.s32.totalorder %s3799_s20, %s3799_s20 }
  0x36   :  { %p3806_p0 = por %p3805_p13, %p3804_p12 }
  0x38   :  { %p3807_p1 = pnand %p3806_p0, %p3800_p11 }
  0x3a   :  { %3810 = shalt.err (!%p3807_p1)
}
  0x3b   :  { %s3894_s21 = smov 128   ;;  %s3895_s22 = smov 8  }
  0x3c   :  { %27 = dma.hbm_to_vmem [thread:$0]  %s6314_s0, 4096, %s22_s26, [#allocation4], %s3894_s21, %s3894_s21, %s3895_s22  }
  0x3d   :  { %s3896_s27 = smov [#allocation8]   ;;  %s3897_s29 = smov [#allocation11]  }
  0x3e   :  { %s49_s28 = sshll.u32 %s3896_s27, 4  ;;  %s77_s30 = sshll.u32 %s3897_s29, 4  ;;  %s50_s28 = int_to_ptr.vmem [resolvable:$true] %s49_s28  ;;  %s3989_s30 = int_to_ptr.vmem [resolvable:$true] %s77_s30 }
  0x3f   :  { %s3835_s25 = scalar_lea.hbm %s6316_s2, 4352  ;;  %s3813_s11 = scalar_lea.hbm %s6316_s2, 8192 }
  0x40   :  { %p3812_p2 = scmp.ne.s32.totalorder %s3972_s10, %s3835_s25  ;;  %p3814_p3 = scmp.lt.u32.totalorder %s3972_s10, %s6316_s2 }
  0x41   :  { %p3815_p4 = scmp.lt.u32.totalorder %s3813_s11, %s3835_s25  ;;  %p3817_p6 = scmp.lt.u32.totalorder %s3835_s25, %s3972_s10 }
  0x43   :  { %p3816_p5 = por %p3815_p4, %p3814_p3 }
  0x45   :  { %p3818_p7 = por %p3817_p6, %p3816_p5 }
  0x47   :  { %p3819_p8 = pnand %p3818_p7, %p3812_p2 }
  0x49   :  { %3822 = shalt.err (!%p3819_p8)
}
  0x4a   :  { %s3823_s0 = scalar_lea.vmem %s50_s28, 4096  ;;  %p3828_p10 = scmp.lt.s32.totalorder %s50_s28, %s50_s28 }
  0x4b   :  { %p3824_p9 = scmp.ne.s32.totalorder %s50_s28, %s3823_s0  ;;  %p3829_p11 = scmp.lt.s32.totalorder %s3823_s0, %s3823_s0 }
  0x4d   :  { %p3830_p12 = por %p3829_p11, %p3828_p10 }
  0x4f   :  { %p3831_p13 = pnand %p3830_p12, %p3824_p9 }
  0x51   :  { %3834 = shalt.err (!%p3831_p13)
}
  0x52   :  { %55 = dma.hbm_to_vmem [thread:$0]  %s3972_s10, 4096, %s50_s28, [#allocation7], %s3889_s14, %s3890_s15, %s3891_s16  }
  0x53   :  { %s3836_s17 = scalar_lea.hbm %s6319_s5, 4096 }
  0x54   :  { %p3837_p0 = scmp.ne.s32.totalorder %s6319_s5, %s3836_s17  ;;  %p3840_p1 = scmp.lt.u32.totalorder %s3836_s17, %s6319_s5 }
  0x56   :  { %p3842_p2 = pnand %p3840_p1, %p3837_p0 }
  0x58   :  { %3845 = shalt.err (!%p3842_p2)
}
  0x59   :  { %s3846_s24 = scalar_lea.vmem %s3989_s30, 4096  ;;  %p3851_p4 = scmp.lt.s32.totalorder %s3989_s30, %s3989_s30 }
  0x5a   :  { %p3847_p3 = scmp.ne.s32.totalorder %s3989_s30, %s3846_s24  ;;  %p3852_p5 = scmp.lt.s32.totalorder %s3846_s24, %s3846_s24 }
  0x5c   :  { %p3853_p6 = por %p3852_p5, %p3851_p4 }
  0x5e   :  { %p3854_p7 = pnand %p3853_p6, %p3847_p3 }
  0x60   :  { %3857 = shalt.err (!%p3854_p7)
}
  0x61   :  { %s3898_s14 = smov 64   ;;  %s3899_s15 = smov 4  }
  0x62   :  { %83 = dma.hbm_to_vmem [thread:$0]  %s6319_s5, 4096, %s3989_s30, [#allocation10], %s3898_s14, %s3898_s14, %s3899_s15  }
  0x63   :  { %3880 = dma.done.wait [#allocation4], 4096  }
  0x64   :  { %3881 = vsyncadd [#allocation4], 4294963200 }
  0x65   :  { %3882 = dma.done.wait [#allocation7], 8192  }
  0x66   :  { %3883 = vsyncadd [#allocation7], 4294959104 }
  0x67   :  { %3884 = dma.done.wait [#allocation10], 4160  }
  0x68   :  { %3885 = vsyncadd [#allocation10], 4294963136  ;;  %v3900_v0 = vmov 0   ;;  %v3358_v1 = vld [vmem:[#allocation6 + $0x4] ss:$16 sps:$4 sm:$0xff]   ;;  %v143_v34 = vld [vmem:[#allocation3 + $0x8] sm:$0xff] }
  0x69   :  { %436 = vmatprep.mubr.bf16.mxu0 %v3900_v0  ;;  %629 = vmatprep.mubr.bf16.mxu1 %v3900_v0  ;;  %v3360_v2 = vld [vmem:[#allocation6 + $0xc] ss:$16 sps:$4 sm:$0xff]   ;;  %v3362_v3 = vld [vmem:[#allocation6] ss:$16 sps:$4 sm:$0xff]   ;;  %v3363_v4 = vld [vmem:[#allocation6 + $0x8] ss:$16 sps:$4 sm:$0xff]  }
  0x6a   :  { %404 = vmatprep.subr.bf16.mxu0 %v3358_v1  ;;  %597 = vmatprep.subr.bf16.mxu1 %v3360_v2  ;;  %v3364_v5 = vld [vmem:[#allocation6 + $0x24] ss:$16 sps:$4 sm:$0xff]   ;;  %v3366_v6 = vld [vmem:[#allocation6 + $0x2c] ss:$16 sps:$4 sm:$0xff]   ;;  %v3368_v7 = vld [vmem:[#allocation6 + $0x20] ss:$16 sps:$4 sm:$0xff]  }
  0x6b   :  { %405 = vmatpush1.bf16.msra.mxu0 %v3362_v3  ;;  %598 = vmatpush1.bf16.msra.mxu1 %v3363_v4  ;;  %v3369_v8 = vld [vmem:[#allocation6 + $0x28] ss:$16 sps:$4 sm:$0xff]   ;;  %v3370_v9 = vld [vmem:[#allocation6 + $0x44] ss:$16 sps:$4 sm:$0xff]   ;;  %v3372_v10 = vld [vmem:[#allocation6 + $0x4c] ss:$16 sps:$4 sm:$0xff]  }
  0x6c   :  { %406 = vmatprep.subr.bf16.mxu0 %v3364_v5  ;;  %599 = vmatprep.subr.bf16.mxu1 %v3366_v6  ;;  %v3374_v11 = vld [vmem:[#allocation6 + $0x40] ss:$16 sps:$4 sm:$0xff]   ;;  %v3375_v12 = vld [vmem:[#allocation6 + $0x48] ss:$16 sps:$4 sm:$0xff]   ;;  %v3376_v13 = vld [vmem:[#allocation6 + $0x64] ss:$16 sps:$4 sm:$0xff]  }
  0x6d   :  { %v3378_v14 = vld [vmem:[#allocation6 + $0x6c] ss:$16 sps:$4 sm:$0xff]   ;;  %v3380_v15 = vld [vmem:[#allocation6 + $0x60] ss:$16 sps:$4 sm:$0xff]   ;;  %v3381_v16 = vld [vmem:[#allocation6 + $0x68] ss:$16 sps:$4 sm:$0xff]  }
  0x6e   :  { %v3382_v17 = vld [vmem:[#allocation6 + $0x84] ss:$16 sps:$4 sm:$0xff]   ;;  %v3384_v18 = vld [vmem:[#allocation6 + $0x8c] ss:$16 sps:$4 sm:$0xff]   ;;  %v3386_v19 = vld [vmem:[#allocation6 + $0x80] ss:$16 sps:$4 sm:$0xff]  }
  0x6f   :  { %407 = vmatpush1.bf16.msra.mxu0 %v3368_v7  ;;  %600 = vmatpush1.bf16.msra.mxu1 %v3369_v8  ;;  %v3387_v20 = vld [vmem:[#allocation6 + $0x88] ss:$16 sps:$4 sm:$0xff]   ;;  %v3388_v21 = vld [vmem:[#allocation6 + $0xa4] ss:$16 sps:$4 sm:$0xff]   ;;  %v3390_v22 = vld [vmem:[#allocation6 + $0xac] ss:$16 sps:$4 sm:$0xff]  }
  0x70   :  { %408 = vmatprep.subr.bf16.mxu0 %v3370_v9  ;;  %601 = vmatprep.subr.bf16.mxu1 %v3372_v10  ;;  %v3392_v23 = vld [vmem:[#allocation6 + $0xa0] ss:$16 sps:$4 sm:$0xff]   ;;  %v3393_v24 = vld [vmem:[#allocation6 + $0xa8] ss:$16 sps:$4 sm:$0xff]   ;;  %v3394_v25 = vld [vmem:[#allocation6 + $0xc4] ss:$16 sps:$4 sm:$0xff]  }
  0x71   :  { %v3396_v26 = vld [vmem:[#allocation6 + $0xcc] ss:$16 sps:$4 sm:$0xff]   ;;  %v3398_v27 = vld [vmem:[#allocation6 + $0xc0] ss:$16 sps:$4 sm:$0xff]   ;;  %v3399_v28 = vld [vmem:[#allocation6 + $0xc8] ss:$16 sps:$4 sm:$0xff]  }
  0x72   :  { %v3400_v29 = vld [vmem:[#allocation6 + $0xe4] ss:$16 sps:$4 sm:$0xff]   ;;  %v3402_v30 = vld [vmem:[#allocation6 + $0xec] ss:$16 sps:$4 sm:$0xff]   ;;  %v3404_v31 = vld [vmem:[#allocation6 + $0xe0] ss:$16 sps:$4 sm:$0xff]  }
  0x73   :  { %409 = vmatpush1.bf16.msra.mxu0 %v3374_v11  ;;  %602 = vmatpush1.bf16.msra.mxu1 %v3375_v12  ;;  %v3405_v32 = vld [vmem:[#allocation6 + $0xe8] ss:$16 sps:$4 sm:$0xff]   ;;  %v142_v33 = vld [vmem:[#allocation3] sm:$0xff]  ;;  %v3411_v36 = vld [vmem:[#allocation8 + $0xc] ss:$16 sps:$4 sm:$0xff]  }
  0x74   :  { %410 = vmatprep.subr.bf16.mxu0 %v3376_v13  ;;  %603 = vmatprep.subr.bf16.mxu1 %v3378_v14  ;;  %v3408_v35 = vld [vmem:[#allocation8 + $0x4] ss:$16 sps:$4 sm:$0xff]   ;;  %v4026_v37 = vpack.c.bf16 %v143_v34, %v142_v33  ;;  %v3406_v38 = vld [vmem:[#allocation8] ss:$16 sps:$4 sm:$0xff]   ;;  %v3409_v39 = vld [vmem:[#allocation8 + $0x8] ss:$16 sps:$4 sm:$0xff]  }
  0x75   :  { %v3414_v40 = vld [vmem:[#allocation8 + $0x24] ss:$16 sps:$4 sm:$0xff]   ;;  %v3417_v41 = vld [vmem:[#allocation8 + $0x2c] ss:$16 sps:$4 sm:$0xff]   ;;  %v3412_v44 = vld [vmem:[#allocation8 + $0x20] ss:$16 sps:$4 sm:$0xff]  }
  0x76   :  { %v144_v42 = vld [vmem:[#allocation3 + $0x10] sm:$0xff]  ;;  %v145_v43 = vld [vmem:[#allocation3 + $0x18] sm:$0xff]  ;;  %v146_v53 = vld [vmem:[#allocation3 + $0x20] sm:$0xff] }
  0x77   :  { %411 = vmatpush1.bf16.msra.mxu0 %v3380_v15  ;;  %604 = vmatpush1.bf16.msra.mxu1 %v3381_v16  ;;  %v3415_v45 = vld [vmem:[#allocation8 + $0x28] ss:$16 sps:$4 sm:$0xff]   ;;  %v3420_v46 = vld [vmem:[#allocation8 + $0x44] ss:$16 sps:$4 sm:$0xff]   ;;  %v3423_v47 = vld [vmem:[#allocation8 + $0x4c] ss:$16 sps:$4 sm:$0xff]   ;;  %v4032_v48 = vpack.c.bf16 %v145_v43, %v144_v42 }
  0x78   :  { %412 = vmatprep.subr.bf16.mxu0 %v3382_v17  ;;  %605 = vmatprep.subr.bf16.mxu1 %v3384_v18  ;;  %v3418_v49 = vld [vmem:[#allocation8 + $0x40] ss:$16 sps:$4 sm:$0xff]   ;;  %v3421_v50 = vld [vmem:[#allocation8 + $0x48] ss:$16 sps:$4 sm:$0xff]   ;;  %v3426_v51 = vld [vmem:[#allocation8 + $0x64] ss:$16 sps:$4 sm:$0xff]  }
  0x79   :  { %v3429_v52 = vld [vmem:[#allocation8 + $0x6c] ss:$16 sps:$4 sm:$0xff]   ;;  %v3424_v55 = vld [vmem:[#allocation8 + $0x60] ss:$16 sps:$4 sm:$0xff]   ;;  %v3427_v56 = vld [vmem:[#allocation8 + $0x68] ss:$16 sps:$4 sm:$0xff]  }
  0x7a   :  { %v147_v54 = vld [vmem:[#allocation3 + $0x28] sm:$0xff]  ;;  %v3432_v57 = vld [vmem:[#allocation8 + $0x84] ss:$16 sps:$4 sm:$0xff]   ;;  %v3430_v60 = vld [vmem:[#allocation8 + $0x80] ss:$16 sps:$4 sm:$0xff]  }
  0x7b   :  { %413 = vmatpush1.bf16.msra.mxu0 %v3386_v19  ;;  %606 = vmatpush1.bf16.msra.mxu1 %v3387_v20  ;;  %v3435_v58 = vld [vmem:[#allocation8 + $0x8c] ss:$16 sps:$4 sm:$0xff]   ;;  %v4038_v59 = vpack.c.bf16 %v147_v54, %v146_v53  ;;  %v3433_v61 = vld [vmem:[#allocation8 + $0x88] ss:$16 sps:$4 sm:$0xff]   ;;  %v3438_v62 = vld [vmem:[#allocation8 + $0xa4] ss:$16 sps:$4 sm:$0xff]  }
  0x7c   :  { %414 = vmatprep.subr.bf16.mxu0 %v3388_v21  ;;  %607 = vmatprep.subr.bf16.mxu1 %v3390_v22  ;;  %v148_v63 = vld [vmem:[#allocation3 + $0x30] sm:$0xff]  ;;  %v3441_v1 = vld [vmem:[#allocation8 + $0xac] ss:$16 sps:$4 sm:$0xff]   ;;  %v3439_v4 = vld [vmem:[#allocation8 + $0xa8] ss:$16 sps:$4 sm:$0xff]  }
  0x7d   :  { %v149_v2 = vld [vmem:[#allocation3 + $0x38] sm:$0xff]  ;;  %v3436_v3 = vld [vmem:[#allocation8 + $0xa0] ss:$16 sps:$4 sm:$0xff]   ;;  %v3444_v5 = vld [vmem:[#allocation8 + $0xc4] ss:$16 sps:$4 sm:$0xff]  }
  0x7e   :  { %v3447_v6 = vld [vmem:[#allocation8 + $0xcc] ss:$16 sps:$4 sm:$0xff]   ;;  %v4044_v7 = vpack.c.bf16 %v149_v2, %v148_v63  ;;  %v3442_v8 = vld [vmem:[#allocation8 + $0xc0] ss:$16 sps:$4 sm:$0xff]   ;;  %v3445_v9 = vld [vmem:[#allocation8 + $0xc8] ss:$16 sps:$4 sm:$0xff]  }
  0x7f   :  { %415 = vmatpush1.bf16.msra.mxu0 %v3392_v23  ;;  %608 = vmatpush1.bf16.msra.mxu1 %v3393_v24  ;;  %v3450_v10 = vld [vmem:[#allocation8 + $0xe4] ss:$16 sps:$4 sm:$0xff]   ;;  %v3453_v11 = vld [vmem:[#allocation8 + $0xec] ss:$16 sps:$4 sm:$0xff]   ;;  %v3448_v14 = vld [vmem:[#allocation8 + $0xe0] ss:$16 sps:$4 sm:$0xff]  }
  0x80   :  { %416 = vmatprep.subr.bf16.mxu0 %v3394_v25  ;;  %609 = vmatprep.subr.bf16.mxu1 %v3396_v26  ;;  %v150_v12 = vld [vmem:[#allocation3 + $0x40] sm:$0xff]  ;;  %v151_v13 = vld [vmem:[#allocation3 + $0x48] sm:$0xff]  ;;  %v152_v17 = vld [vmem:[#allocation3 + $0x50] sm:$0xff] }
  0x81   :  { %v3451_v15 = vld [vmem:[#allocation8 + $0xe8] ss:$16 sps:$4 sm:$0xff]   ;;  %v4050_v16 = vpack.c.bf16 %v151_v13, %v150_v12  ;;  %v154_v20 = vld [vmem:[#allocation3 + $0x60] sm:$0xff]  ;;  %v156_v23 = vld [vmem:[#allocation3 + $0x70] sm:$0xff] }
  0x82   :  { %v153_v18 = vld [vmem:[#allocation3 + $0x58] sm:$0xff]  ;;  %v155_v21 = vld [vmem:[#allocation3 + $0x68] sm:$0xff]  ;;  %v158_v26 = vld [vmem:[#allocation3 + $0x80] sm:$0xff] }
  0x83   :  { %417 = vmatpush1.bf16.msra.mxu0 %v3398_v27  ;;  %610 = vmatpush1.bf16.msra.mxu1 %v3399_v28  ;;  %v4056_v19 = vpack.c.bf16 %v153_v18, %v152_v17  ;;  %v4062_v22 = vpack.c.bf16 %v155_v21, %v154_v20  ;;  %v157_v24 = vld [vmem:[#allocation3 + $0x78] sm:$0xff]  ;;  %v159_v27 = vld [vmem:[#allocation3 + $0x88] sm:$0xff]  ;;  %v168_v42 = vld [vmem:[#allocation3 + $0xd0] sm:$0xff] }
  0x84   :  { %418 = vmatprep.subr.bf16.mxu0 %v3400_v29  ;;  %611 = vmatprep.subr.bf16.mxu1 %v3402_v30  ;;  %v4068_v25 = vpack.c.bf16 %v157_v24, %v156_v23  ;;  %v4074_v28 = vpack.c.bf16 %v159_v27, %v158_v26  ;;  %v160_v29 = vld [vmem:[#allocation3 + $0x90] sm:$0xff]  ;;  %v161_v30 = vld [vmem:[#allocation3 + $0x98] sm:$0xff]  ;;  %v163_v33 = vld [vmem:[#allocation3 + $0xa8] sm:$0xff] }
  0x85   :  { %v169_v43 = vld [vmem:[#allocation3 + $0xd8] sm:$0xff]  ;;  %v3456_v54 = vld [vmem:[#allocation11] sm:$0xff]  }
  0x86   :  { %v3465_v63 = vld [vmem:[#allocation11 + $0x90] sm:$0xff]   ;;  %v3469_v2 = vld [vmem:[#allocation11 + $0x98] sm:$0xff]  }
  0x87   :  { %419 = vmatpush1.bf16.msra.mxu0 %v3404_v31  ;;  %612 = vmatpush1.bf16.msra.mxu1 %v3405_v32  ;;  %v4080_v31 = vpack.c.bf16 %v161_v30, %v160_v29  ;;  %v162_v32 = vld [vmem:[#allocation3 + $0xa0] sm:$0xff]  ;;  %v3479_v12 = vld [vmem:[#allocation11 + $0xf0] sm:$0xff]  }
  0x88   :  { %1004 = vmatprep.subr.bf16.mxu0 %v3408_v35  ;;  %1197 = vmatprep.subr.bf16.mxu1 %v3411_v36  ;;  %v4086_v34 = vpack.c.bf16 %v163_v33, %v162_v32  ;;  %v164_v35 = vld [vmem:[#allocation3 + $0xb0] sm:$0xff]  ;;  %v165_v36 = vld [vmem:[#allocation3 + $0xb8] sm:$0xff] }
  0x89   :  { %v3480_v13 = vld [vmem:[#allocation11 + $0x30] sm:$0xff]  }
  0x8a   :  { %437 = vmatmul.mubr.bf16.vlgmr.msra.gmra.mrb[0].mxu0 %v4026_v37  ;;  %630 = vmatmul.mubr.bf16.vlgmr.msra.gmra.mrb[0].mxu1 %v4026_v37 }
  0x8b   :  { %1005 = vmatpush1.bf16.msra.mxu0 %v3406_v38  ;;  %1198 = vmatpush1.bf16.msra.mxu1 %v3409_v39  ;;  %v4092_v38 = vpack.c.bf16 %v165_v36, %v164_v35  ;;  %v166_v39 = vld [vmem:[#allocation3 + $0xc0] sm:$0xff] }
  0x8c   :  { %446 = vmatprep.mubr.bf16.mxu0 %v3900_v0  ;;  %639 = vmatprep.mubr.bf16.mxu1 %v3900_v0 }
  0x8d   :  { %1006 = vmatprep.subr.bf16.mxu0 %v3414_v40  ;;  %1199 = vmatprep.subr.bf16.mxu1 %v3417_v41  ;;  %v167_v40 = vld [vmem:[#allocation3 + $0xc8] sm:$0xff] }
  0x8e   :  { %v4098_v41 = vpack.c.bf16 %v167_v40, %v166_v39 }
  0x8f   :  { %1007 = vmatpush1.bf16.msra.mxu0 %v3412_v44  ;;  %1200 = vmatpush1.bf16.msra.mxu1 %v3415_v45  ;;  %v4104_v44 = vpack.c.bf16 %v169_v43, %v168_v42  ;;  %v170_v45 = vld [vmem:[#allocation3 + $0xe0] sm:$0xff] }
  0x90   :  { %1008 = vmatprep.subr.bf16.mxu0 %v3420_v46  ;;  %1201 = vmatprep.subr.bf16.mxu1 %v3423_v47  ;;  %v171_v46 = vld [vmem:[#allocation3 + $0xe8] sm:$0xff] }
  0x91   :  { %v4110_v47 = vpack.c.bf16 %v171_v46, %v170_v45 }
  0x92   :  { %447 = vmatmul.mubr.bf16.gmra.mrb[4].mxu0 %v4032_v48  ;;  %640 = vmatmul.mubr.bf16.gmra.mrb[4].mxu1 %v4032_v48 }
  0x93   :  { %456 = vmatprep.mubr.bf16.mxu0 %v3900_v0  ;;  %649 = vmatprep.mubr.bf16.mxu1 %v3900_v0 }
  0x94   :  { %1009 = vmatpush1.bf16.msra.mxu0 %v3418_v49  ;;  %1202 = vmatpush1.bf16.msra.mxu1 %v3421_v50  ;;  %v3454_v49 = vld [vmem:[#allocation11 + $0x40] sm:$0xff]  }
  0x95   :  { %1010 = vmatprep.subr.bf16.mxu0 %v3426_v51  ;;  %1203 = vmatprep.subr.bf16.mxu1 %v3429_v52  ;;  %v3455_v50 = vld [vmem:[#allocation11 + $0xc0] sm:$0xff]   ;;  %v172_v51 = vld [vmem:[#allocation3 + $0xf0] sm:$0xff]  ;;  %v173_v52 = vld [vmem:[#allocation3 + $0xf8] sm:$0xff] }
  0x96   :  { %v4116_v53 = vpack.c.bf16 %v173_v52, %v172_v51  ;;  %v3483_v51 = vld [vmem:[#allocation11 + $0xf8] sm:$0xff]  }
  0x97   :  { %v3484_v52 = vld [vmem:[#allocation11 + $0x38] sm:$0xff]  }
  0x98   :  { %1011 = vmatpush1.bf16.msra.mxu0 %v3424_v55  ;;  %1204 = vmatpush1.bf16.msra.mxu1 %v3427_v56  ;;  %v3457_v55 = vld [vmem:[#allocation11 + $0x80] sm:$0xff]   ;;  %v3458_v56 = vld [vmem:[#allocation11 + $0x48] sm:$0xff]  }
  0x99   :  { %1012 = vmatprep.subr.bf16.mxu0 %v3432_v57  ;;  %1205 = vmatprep.subr.bf16.mxu1 %v3435_v58  ;;  %v3459_v57 = vld [vmem:[#allocation11 + $0xc8] sm:$0xff]  }
  0x9a   :  { %457 = vmatmul.mubr.bf16.gmra.mrb[8].mxu0 %v4038_v59  ;;  %650 = vmatmul.mubr.bf16.gmra.mrb[8].mxu1 %v4038_v59  ;;  %v3460_v58 = vld [vmem:[#allocation11 + $0x8] sm:$0xff]  }
  0x9b   :  { %466 = vmatprep.mubr.bf16.mxu0 %v3900_v0  ;;  %659 = vmatprep.mubr.bf16.mxu1 %v3900_v0 }
  0x9c   :  { %1013 = vmatpush1.bf16.msra.mxu0 %v3430_v60  ;;  %1206 = vmatpush1.bf16.msra.mxu1 %v3433_v61  ;;  %v3461_v60 = vld [vmem:[#allocation11 + $0x88] sm:$0xff]   ;;  %v3463_v61 = vld [vmem:[#allocation11 + $0xd0] sm:$0xff]  }
  0x9d   :  { %1014 = vmatprep.subr.bf16.mxu0 %v3438_v62  ;;  %1207 = vmatprep.subr.bf16.mxu1 %v3441_v1  ;;  %v3464_v62 = vld [vmem:[#allocation11 + $0x10] sm:$0xff]   ;;  %v3467_v1 = vld [vmem:[#allocation11 + $0xd8] sm:$0xff]  }
  0xa0   :  { %1015 = vmatpush1.bf16.msra.mxu0 %v3436_v3  ;;  %1208 = vmatpush1.bf16.msra.mxu1 %v3439_v4  ;;  %v3470_v3 = vld [vmem:[#allocation11 + $0x60] sm:$0xff]  }
  0xa1   :  { %1016 = vmatprep.subr.bf16.mxu0 %v3444_v5  ;;  %1209 = vmatprep.subr.bf16.mxu1 %v3447_v6  ;;  %v3471_v4 = vld [vmem:[#allocation11 + $0xe0] sm:$0xff]  }
  0xa2   :  { %467 = vmatmul.mubr.bf16.gmra.mrb[12].mxu0 %v4044_v7  ;;  %660 = vmatmul.mubr.bf16.gmra.mrb[12].mxu1 %v4044_v7  ;;  %v3472_v5 = vld [vmem:[#allocation11 + $0x20] sm:$0xff]  }
  0xa3   :  { %476 = vmatprep.mubr.bf16.mxu0 %v3900_v0  ;;  %669 = vmatprep.mubr.bf16.mxu1 %v3900_v0  ;;  %v3473_v6 = vld [vmem:[#allocation11 + $0xa0] sm:$0xff]  }
  0xa4   :  { %1017 = vmatpush1.bf16.msra.mxu0 %v3442_v8  ;;  %1210 = vmatpush1.bf16.msra.mxu1 %v3445_v9  ;;  %v3475_v8 = vld [vmem:[#allocation11 + $0xe8] sm:$0xff]  }
  0xa5   :  { %1018 = vmatprep.subr.bf16.mxu0 %v3450_v10  ;;  %1211 = vmatprep.subr.bf16.mxu1 %v3453_v11  ;;  %v3476_v9 = vld [vmem:[#allocation11 + $0x28] sm:$0xff]   ;;  %v3478_v11 = vld [vmem:[#allocation11 + $0x70] sm:$0xff]  }
  0xa6   :  { %v3477_v10 = vld [vmem:[#allocation11 + $0xa8] sm:$0xff]  }
  0xa8   :  { %1019 = vmatpush1.bf16.msra.mxu0 %v3448_v14  ;;  %1212 = vmatpush1.bf16.msra.mxu1 %v3451_v15  ;;  %v3481_v14 = vld [vmem:[#allocation11 + $0xb0] sm:$0xff]  }
  0xa9   :  { %3120 = vmatprep.subr.bf16.mxu0 %v3454_v49  ;;  %3232 = vmatprep.subr.bf16.mxu1 %v3455_v50 }
  0xaa   :  { %477 = vmatmul.mubr.bf16.gmra.mrb[16].mxu0 %v4050_v16  ;;  %670 = vmatmul.mubr.bf16.gmra.mrb[16].mxu1 %v4050_v16 }
  0xab   :  { %486 = vmatprep.mubr.bf16.mxu0 %v3900_v0  ;;  %679 = vmatprep.mubr.bf16.mxu1 %v3900_v0 }
  0xb2   :  { %487 = vmatmul.mubr.bf16.gmra.mrb[20].mxu0 %v4056_v19  ;;  %680 = vmatmul.mubr.bf16.gmra.mrb[20].mxu1 %v4056_v19 }
  0xb3   :  { %496 = vmatprep.mubr.bf16.mxu0 %v3900_v0  ;;  %689 = vmatprep.mubr.bf16.mxu1 %v3900_v0 }
  0xba   :  { %497 = vmatmul.mubr.bf16.gmra.mrb[24].mxu0 %v4062_v22  ;;  %690 = vmatmul.mubr.bf16.gmra.mrb[24].mxu1 %v4062_v22 }
  0xbb   :  { %506 = vmatprep.mubr.bf16.mxu0 %v3900_v0  ;;  %699 = vmatprep.mubr.bf16.mxu1 %v3900_v0 }
  0xc2   :  { %507 = vmatmul.mubr.bf16.gmra.mrb[28].mxu0 %v4068_v25  ;;  %700 = vmatmul.mubr.bf16.gmra.mrb[28].mxu1 %v4068_v25 }
  0xc3   :  { %516 = vmatprep.mubr.bf16.mxu0 %v3900_v0  ;;  %709 = vmatprep.mubr.bf16.mxu1 %v3900_v0 }
  0xca   :  { %517 = vmatmul.mubr.bf16.gmra.mrb[32].mxu0 %v4074_v28  ;;  %710 = vmatmul.mubr.bf16.gmra.mrb[32].mxu1 %v4074_v28 }
  0xcb   :  { %526 = vmatprep.mubr.bf16.mxu0 %v3900_v0  ;;  %719 = vmatprep.mubr.bf16.mxu1 %v3900_v0 }
  0xd2   :  { %527 = vmatmul.mubr.bf16.gmra.mrb[36].mxu0 %v4080_v31  ;;  %720 = vmatmul.mubr.bf16.gmra.mrb[36].mxu1 %v4080_v31 }
  0xd3   :  { %536 = vmatprep.mubr.bf16.mxu0 %v3900_v0  ;;  %729 = vmatprep.mubr.bf16.mxu1 %v3900_v0 }
  0xda   :  { %537 = vmatmul.mubr.bf16.gmra.mrb[40].mxu0 %v4086_v34  ;;  %730 = vmatmul.mubr.bf16.gmra.mrb[40].mxu1 %v4086_v34 }
  0xdb   :  { %546 = vmatprep.mubr.bf16.mxu0 %v3900_v0  ;;  %739 = vmatprep.mubr.bf16.mxu1 %v3900_v0 }
  0xe2   :  { %547 = vmatmul.mubr.bf16.gmra.mrb[44].mxu0 %v4092_v38  ;;  %740 = vmatmul.mubr.bf16.gmra.mrb[44].mxu1 %v4092_v38 }
  0xe3   :  { %556 = vmatprep.mubr.bf16.mxu0 %v3900_v0  ;;  %749 = vmatprep.mubr.bf16.mxu1 %v3900_v0 }
  0xea   :  { %557 = vmatmul.mubr.bf16.gmra.mrb[48].mxu0 %v4098_v41  ;;  %750 = vmatmul.mubr.bf16.gmra.mrb[48].mxu1 %v4098_v41 }
  0xeb   :  { %566 = vmatprep.mubr.bf16.mxu0 %v3900_v0  ;;  %759 = vmatprep.mubr.bf16.mxu1 %v3900_v0 }
  0xf2   :  { %567 = vmatmul.mubr.bf16.gmra.mrb[52].mxu0 %v4104_v44  ;;  %760 = vmatmul.mubr.bf16.gmra.mrb[52].mxu1 %v4104_v44 }
  0xf3   :  { %576 = vmatprep.mubr.bf16.mxu0 %v3900_v0  ;;  %769 = vmatprep.mubr.bf16.mxu1 %v3900_v0 }
  0xfa   :  { %577 = vmatmul.mubr.bf16.gmra.mrb[56].mxu0 %v4110_v47  ;;  %770 = vmatmul.mubr.bf16.gmra.mrb[56].mxu1 %v4110_v47 }
  0xfb   :  { %586 = vmatprep.mubr.bf16.mxu0 %v3900_v0  ;;  %779 = vmatprep.mubr.bf16.mxu1 %v3900_v0 }
 0x102   :  { %587 = vmatmul.mubr.bf16.gmra.mrb[60].mxu0 %v4116_v53  ;;  %780 = vmatmul.mubr.bf16.gmra.mrb[60].mxu1 %v4116_v53 }
 0x103   :  { %1036 = vmatprep.mubr.bf16.mxu0 %v3900_v0  ;;  %1229 = vmatprep.mubr.bf16.mxu1 %v3900_v0 }
 0x10a   :  { %1037 = vmatmul.mubr.bf16.vlgmr.msra.gmra.mrb[64].mxu0 %v4026_v37  ;;  %1230 = vmatmul.mubr.bf16.vlgmr.msra.gmra.mrb[64].mxu1 %v4026_v37  ;;  %v3462_v37 = vld [vmem:[#allocation11 + $0x50] sm:$0xff]  }
 0x10b   :  { %1046 = vmatprep.mubr.bf16.mxu0 %v3900_v0  ;;  %1239 = vmatprep.mubr.bf16.mxu1 %v3900_v0 }
 0x10c   :  { %3121 = vmatpush3.bf16.msra.mxu0 %v3456_v54  ;;  %3233 = vmatpush3.bf16.msra.mxu1 %v3457_v55  ;;  %v3485_v54 = vld [vmem:[#allocation11 + $0xb8] sm:$0xff]  }
 0x10d   :  { %3122 = vmatprep.subr.bf16.mxu0 %v3458_v56  ;;  %3234 = vmatprep.subr.bf16.mxu1 %v3459_v57 }
 0x110   :  { %3123 = vmatpush3.bf16.msra.mxu0 %v3460_v58  ;;  %3235 = vmatpush3.bf16.msra.mxu1 %v3461_v60 }
 0x111   :  { %3124 = vmatprep.subr.bf16.mxu0 %v3462_v37  ;;  %3236 = vmatprep.subr.bf16.mxu1 %v3463_v61 }
 0x112   :  { %1047 = vmatmul.mubr.bf16.gmra.mrb[68].mxu0 %v4032_v48  ;;  %1240 = vmatmul.mubr.bf16.gmra.mrb[68].mxu1 %v4032_v48  ;;  %v3466_v48 = vld [vmem:[#allocation11 + $0x58] sm:$0xff]  }
 0x113   :  { %1056 = vmatprep.mubr.bf16.mxu0 %v3900_v0  ;;  %1249 = vmatprep.mubr.bf16.mxu1 %v3900_v0 }
 0x114   :  { %3125 = vmatpush3.bf16.msra.mxu0 %v3464_v62  ;;  %3237 = vmatpush3.bf16.msra.mxu1 %v3465_v63 }
 0x115   :  { %3126 = vmatprep.subr.bf16.mxu0 %v3466_v48  ;;  %3238 = vmatprep.subr.bf16.mxu1 %v3467_v1 }
 0x118   :  { %3239 = vmatpush3.bf16.msra.mxu1 %v3469_v2 }
 0x119   :  { %3240 = vmatprep.subr.bf16.mxu1 %v3471_v4 }
 0x11a   :  { %1057 = vmatmul.mubr.bf16.gmra.mrb[72].mxu0 %v4038_v59  ;;  %1250 = vmatmul.mubr.bf16.gmra.mrb[72].mxu1 %v4038_v59  ;;  %v3468_v59 = vld [vmem:[#allocation11 + $0x18] sm:$0xff]  }
 0x11b   :  { %1066 = vmatprep.mubr.bf16.mxu0 %v3900_v0  ;;  %1259 = vmatprep.mubr.bf16.mxu1 %v3900_v0 }
 0x11c   :  { %3127 = vmatpush3.bf16.msra.mxu0 %v3468_v59  ;;  %3241 = vmatpush3.bf16.msra.mxu1 %v3473_v6 }
 0x11d   :  { %3128 = vmatprep.subr.bf16.mxu0 %v3470_v3  ;;  %3242 = vmatprep.subr.bf16.mxu1 %v3475_v8 }
 0x120   :  { %3129 = vmatpush3.bf16.msra.mxu0 %v3472_v5  ;;  %3243 = vmatpush3.bf16.msra.mxu1 %v3477_v10 }
 0x121   :  { %3244 = vmatprep.subr.bf16.mxu1 %v3479_v12 }
 0x122   :  { %1067 = vmatmul.mubr.bf16.gmra.mrb[76].mxu0 %v4044_v7  ;;  %1260 = vmatmul.mubr.bf16.gmra.mrb[76].mxu1 %v4044_v7  ;;  %v3474_v7 = vld [vmem:[#allocation11 + $0x68] sm:$0xff]  }
 0x123   :  { %1076 = vmatprep.mubr.bf16.mxu0 %v3900_v0  ;;  %1269 = vmatprep.mubr.bf16.mxu1 %v3900_v0 }
 0x124   :  { %3130 = vmatprep.subr.bf16.mxu0 %v3474_v7  ;;  %3245 = vmatpush3.bf16.msra.mxu1 %v3481_v14 }
 0x125   :  { %3131 = vmatpush3.bf16.msra.mxu0 %v3476_v9  ;;  %3246 = vmatprep.subr.bf16.mxu1 %v3483_v51 }
 0x126   :  { %3132 = vmatprep.subr.bf16.mxu0 %v3478_v11 }
 0x128   :  { %3247 = vmatpush3.bf16.msra.mxu1 %v3485_v54 }
 0x129   :  { %3133 = vmatpush3.bf16.msra.mxu0 %v3480_v13 }
 0x12a   :  { %1077 = vmatmul.mubr.bf16.gmra.mrb[80].mxu0 %v4050_v16  ;;  %1270 = vmatmul.mubr.bf16.gmra.mrb[80].mxu1 %v4050_v16 }
 0x12b   :  { %1086 = vmatprep.mubr.bf16.mxu0 %v3900_v0  ;;  %1279 = vmatprep.mubr.bf16.mxu1 %v3900_v0 }
 0x132   :  { %1087 = vmatmul.mubr.bf16.gmra.mrb[84].mxu0 %v4056_v19  ;;  %1280 = vmatmul.mubr.bf16.gmra.mrb[84].mxu1 %v4056_v19 }
 0x133   :  { %1096 = vmatprep.mubr.bf16.mxu0 %v3900_v0  ;;  %1289 = vmatprep.mubr.bf16.mxu1 %v3900_v0 }
 0x13a   :  { %1097 = vmatmul.mubr.bf16.gmra.mrb[88].mxu0 %v4062_v22  ;;  %1290 = vmatmul.mubr.bf16.gmra.mrb[88].mxu1 %v4062_v22 }
 0x13b   :  { %1106 = vmatprep.mubr.bf16.mxu0 %v3900_v0  ;;  %1299 = vmatprep.mubr.bf16.mxu1 %v3900_v0 }
 0x142   :  { %1107 = vmatmul.mubr.bf16.gmra.mrb[92].mxu0 %v4068_v25  ;;  %1300 = vmatmul.mubr.bf16.gmra.mrb[92].mxu1 %v4068_v25 }
 0x143   :  { %1116 = vmatprep.mubr.bf16.mxu0 %v3900_v0  ;;  %1309 = vmatprep.mubr.bf16.mxu1 %v3900_v0 }
 0x14a   :  { %1117 = vmatmul.mubr.bf16.gmra.mrb[96].mxu0 %v4074_v28  ;;  %1310 = vmatmul.mubr.bf16.gmra.mrb[96].mxu1 %v4074_v28 }
 0x14b   :  { %1126 = vmatprep.mubr.bf16.mxu0 %v3900_v0  ;;  %1319 = vmatprep.mubr.bf16.mxu1 %v3900_v0 }
 0x152   :  { %1127 = vmatmul.mubr.bf16.gmra.mrb[100].mxu0 %v4080_v31  ;;  %1320 = vmatmul.mubr.bf16.gmra.mrb[100].mxu1 %v4080_v31 }
 0x153   :  { %1136 = vmatprep.mubr.bf16.mxu0 %v3900_v0  ;;  %1329 = vmatprep.mubr.bf16.mxu1 %v3900_v0 }
 0x15a   :  { %1137 = vmatmul.mubr.bf16.gmra.mrb[104].mxu0 %v4086_v34  ;;  %1330 = vmatmul.mubr.bf16.gmra.mrb[104].mxu1 %v4086_v34 }
 0x15b   :  { %1146 = vmatprep.mubr.bf16.mxu0 %v3900_v0  ;;  %1339 = vmatprep.mubr.bf16.mxu1 %v3900_v0 }
 0x15d   :  { %v4166_v15 = vpop.f32.mrb[0].mxu0  ;;  %v4168_v16 = vpop.f32.mrb[0].mxu1 }
 0x15e   :  { %v4170_v17 = vpop.f32.mrb[1].mxu0  ;;  %v4172_v18 = vpop.f32.mrb[1].mxu1 }
 0x15f   :  { %v4174_v19 = vpop.f32.mrb[2].mxu0  ;;  %v4176_v20 = vpop.f32.mrb[2].mxu1 }
 0x160   :  { %v4178_v21 = vpop.f32.mrb[3].mxu0  ;;  %v4180_v22 = vpop.f32.mrb[3].mxu1 }
 0x162   :  { %1147 = vmatmul.mubr.bf16.gmra.mrb[108].mxu0 %v4092_v38  ;;  %1340 = vmatmul.mubr.bf16.gmra.mrb[108].mxu1 %v4092_v38 }
 0x163   :  { %1156 = vmatprep.mubr.bf16.mxu0 %v3900_v0  ;;  %1349 = vmatprep.mubr.bf16.mxu1 %v3900_v0 }
 0x165   :  { %v4186_v23 = vpop.f32.mrb[4].mxu0  ;;  %v4188_v24 = vpop.f32.mrb[4].mxu1 }
 0x166   :  { %v4190_v25 = vpop.f32.mrb[5].mxu0  ;;  %v4192_v26 = vpop.f32.mrb[5].mxu1 }
 0x167   :  { %v4194_v27 = vpop.f32.mrb[6].mxu0  ;;  %v4196_v28 = vpop.f32.mrb[6].mxu1 }
 0x168   :  { %v4198_v29 = vpop.f32.mrb[7].mxu0  ;;  %v4200_v30 = vpop.f32.mrb[7].mxu1 }
 0x16a   :  { %1157 = vmatmul.mubr.bf16.gmra.mrb[112].mxu0 %v4098_v41  ;;  %1350 = vmatmul.mubr.bf16.gmra.mrb[112].mxu1 %v4098_v41 }
 0x16b   :  { %1166 = vmatprep.mubr.bf16.mxu0 %v3900_v0  ;;  %1359 = vmatprep.mubr.bf16.mxu1 %v3900_v0 }
 0x16d   :  { %v4206_v31 = vpop.f32.mrb[8].mxu0  ;;  %v4208_v32 = vpop.f32.mrb[8].mxu1 }
 0x16e   :  { %v4210_v33 = vpop.f32.mrb[9].mxu0  ;;  %v4212_v34 = vpop.f32.mrb[9].mxu1 }
 0x16f   :  { %v4214_v35 = vpop.f32.mrb[10].mxu0  ;;  %v4216_v36 = vpop.f32.mrb[10].mxu1 }
 0x170   :  { %v4218_v38 = vpop.f32.mrb[11].mxu0  ;;  %v4220_v39 = vpop.f32.mrb[11].mxu1 }
 0x172   :  { %1167 = vmatmul.mubr.bf16.gmra.mrb[116].mxu0 %v4104_v44  ;;  %1360 = vmatmul.mubr.bf16.gmra.mrb[116].mxu1 %v4104_v44  ;;  %v3482_v44 = vld [vmem:[#allocation11 + $0x78] sm:$0xff]  }
 0x173   :  { %1176 = vmatprep.mubr.bf16.mxu0 %v3900_v0  ;;  %1369 = vmatprep.mubr.bf16.mxu1 %v3900_v0 }
 0x174   :  { %3134 = vmatprep.subr.bf16.mxu0 %v3482_v44 }
 0x175   :  { %v4226_v40 = vpop.f32.mrb[12].mxu0  ;;  %v4228_v41 = vpop.f32.mrb[12].mxu1  ;;  %3135 = vmatpush3.bf16.msra.mxu0 %v3484_v52 }
 0x176   :  { %v4230_v42 = vpop.f32.mrb[13].mxu0  ;;  %v4232_v43 = vpop.f32.mrb[13].mxu1 }
 0x177   :  { %v4234_v45 = vpop.f32.mrb[14].mxu0  ;;  %v4236_v46 = vpop.f32.mrb[14].mxu1 }
 0x178   :  { %v4238_v49 = vpop.f32.mrb[15].mxu0  ;;  %v4240_v50 = vpop.f32.mrb[15].mxu1 }
 0x17a   :  { %1177 = vmatmul.mubr.bf16.gmra.mrb[120].mxu0 %v4110_v47  ;;  %1370 = vmatmul.mubr.bf16.gmra.mrb[120].mxu1 %v4110_v47 }
 0x17b   :  { %1186 = vmatprep.mubr.bf16.mxu0 %v3900_v0  ;;  %1379 = vmatprep.mubr.bf16.mxu1 %v3900_v0 }
 0x17d   :  { %v4246_v55 = vpop.f32.mrb[16].mxu0  ;;  %v4248_v56 = vpop.f32.mrb[16].mxu1 }
 0x17e   :  { %v4250_v57 = vpop.f32.mrb[17].mxu0  ;;  %v4252_v58 = vpop.f32.mrb[17].mxu1 }
 0x17f   :  { %v4254_v47 = vpop.f32.mrb[18].mxu0  ;;  %v4256_v60 = vpop.f32.mrb[18].mxu1 }
 0x180   :  { %v4258_v37 = vpop.f32.mrb[19].mxu0  ;;  %v4260_v0 = vpop.f32.mrb[19].mxu1 }
 0x182   :  { %1187 = vmatmul.mubr.bf16.gmra.mrb[124].mxu0 %v4116_v53  ;;  %1380 = vmatmul.mubr.bf16.gmra.mrb[124].mxu1 %v4116_v53 }
 0x185   :  { %v4264_v61 = vpop.f32.mrb[20].mxu0  ;;  %v4266_v62 = vpop.f32.mrb[20].mxu1 }
 0x186   :  { %v4268_v63 = vpop.f32.mrb[21].mxu0  ;;  %v4270_v48 = vpop.f32.mrb[21].mxu1 }
 0x187   :  { %v4272_v1 = vpop.f32.mrb[22].mxu0  ;;  %v4274_v59 = vpop.f32.mrb[22].mxu1 }
 0x188   :  { %v4276_v2 = vpop.f32.mrb[23].mxu0  ;;  %v4278_v3 = vpop.f32.mrb[23].mxu1 }
 0x189   :  { %6322 = vst [vmem:[#allocation17_spill] sm:$0xff] %v4276_v2  ;;  %6323 = vst [vmem:[#allocation18_spill] sm:$0xff] %v4278_v3 }
 0x18d   :  { %v4280_v4 = vpop.f32.mrb[24].mxu0  ;;  %v4282_v5 = vpop.f32.mrb[24].mxu1 }
 0x18e   :  { %6324 = vst [vmem:[#allocation19_spill] sm:$0xff] %v4280_v4  ;;  %6325 = vst [vmem:[#allocation20_spill] sm:$0xff] %v4282_v5  ;;  %v4284_v53 = vpop.f32.mrb[25].mxu0  ;;  %v4286_v6 = vpop.f32.mrb[25].mxu1 }
 0x18f   :  { %6326 = vst [vmem:[#allocation21_spill] sm:$0xff] %v4284_v53  ;;  %6327 = vst [vmem:[#allocation22_spill] sm:$0xff] %v4286_v6  ;;  %v4288_v7 = vpop.f32.mrb[26].mxu0  ;;  %v4290_v8 = vpop.f32.mrb[26].mxu1 }
 0x190   :  { %6328 = vst [vmem:[#allocation23_spill] sm:$0xff] %v4288_v7  ;;  %6329 = vst [vmem:[#allocation24_spill] sm:$0xff] %v4290_v8  ;;  %v4292_v9 = vpop.f32.mrb[27].mxu0  ;;  %v4294_v10 = vpop.f32.mrb[27].mxu1 }
 0x191   :  { %6330 = vst [vmem:[#allocation25_spill] sm:$0xff] %v4292_v9  ;;  %6331 = vst [vmem:[#allocation26_spill] sm:$0xff] %v4294_v10 }
 0x195   :  { %v4296_v11 = vpop.f32.mrb[28].mxu0  ;;  %v4298_v12 = vpop.f32.mrb[28].mxu1 }
 0x196   :  { %6332 = vst [vmem:[#allocation27_spill] sm:$0xff] %v4296_v11  ;;  %6333 = vst [vmem:[#allocation28_spill] sm:$0xff] %v4298_v12  ;;  %v4300_v13 = vpop.f32.mrb[29].mxu0  ;;  %v4302_v14 = vpop.f32.mrb[29].mxu1 }
 0x197   :  { %6334 = vst [vmem:[#allocation29_spill] sm:$0xff] %v4300_v13  ;;  %6335 = vst [vmem:[#allocation30_spill] sm:$0xff] %v4302_v14  ;;  %v4304_v44 = vpop.f32.mrb[30].mxu0  ;;  %v4306_v51 = vpop.f32.mrb[30].mxu1 }
 0x198   :  { %6336 = vst [vmem:[#allocation31_spill] sm:$0xff] %v4304_v44  ;;  %6337 = vst [vmem:[#allocation32_spill] sm:$0xff] %v4306_v51  ;;  %v4308_v52 = vpop.f32.mrb[31].mxu0  ;;  %v4310_v54 = vpop.f32.mrb[31].mxu1 }
 0x199   :  { %6338 = vst [vmem:[#allocation33_spill] sm:$0xff] %v4308_v52  ;;  %6339 = vst [vmem:[#allocation34_spill] sm:$0xff] %v4310_v54 }
 0x19d   :  { %v4312_v8 = vpop.f32.mrb[32].mxu0  ;;  %v4314_v9 = vpop.f32.mrb[32].mxu1 }
 0x19e   :  { %6340 = vst [vmem:[#allocation35_spill] sm:$0xff] %v4312_v8  ;;  %6341 = vst [vmem:[#allocation36_spill] sm:$0xff] %v4314_v9  ;;  %v4316_v10 = vpop.f32.mrb[33].mxu0  ;;  %v4318_v11 = vpop.f32.mrb[33].mxu1 }
 0x19f   :  { %6342 = vst [vmem:[#allocation37_spill] sm:$0xff] %v4316_v10  ;;  %6343 = vst [vmem:[#allocation38_spill] sm:$0xff] %v4318_v11  ;;  %v4320_v12 = vpop.f32.mrb[34].mxu0  ;;  %v4322_v13 = vpop.f32.mrb[34].mxu1 }
 0x1a0   :  { %6344 = vst [vmem:[#allocation39_spill] sm:$0xff] %v4320_v12  ;;  %6345 = vst [vmem:[#allocation40_spill] sm:$0xff] %v4322_v13  ;;  %v4324_v14 = vpop.f32.mrb[35].mxu0  ;;  %v4326_v44 = vpop.f32.mrb[35].mxu1 }
 0x1a1   :  { %6346 = vst [vmem:[#allocation41_spill] sm:$0xff] %v4324_v14  ;;  %6347 = vst [vmem:[#allocation42_spill] sm:$0xff] %v4326_v44 }
 0x1a5   :  { %v4328_v51 = vpop.f32.mrb[36].mxu0  ;;  %v4330_v52 = vpop.f32.mrb[36].mxu1 }
 0x1a6   :  { %6348 = vst [vmem:[#allocation43_spill] sm:$0xff] %v4328_v51  ;;  %6349 = vst [vmem:[#allocation44_spill] sm:$0xff] %v4330_v52  ;;  %v4332_v54 = vpop.f32.mrb[37].mxu0  ;;  %v4334_v8 = vpop.f32.mrb[37].mxu1  ;;  %v224_v52 = vlaneseq }
 0x1a7   :  { %6350 = vst [vmem:[#allocation45_spill] sm:$0xff] %v4332_v54  ;;  %6351 = vst [vmem:[#allocation46_spill] sm:$0xff] %v4334_v8  ;;  %v4336_v9 = vpop.f32.mrb[38].mxu0  ;;  %v4338_v10 = vpop.f32.mrb[38].mxu1 }
 0x1a8   :  { %6352 = vst [vmem:[#allocation47_spill] sm:$0xff] %v4336_v9  ;;  %6353 = vst [vmem:[#allocation48_spill] sm:$0xff] %v4338_v10  ;;  %v4340_v11 = vpop.f32.mrb[39].mxu0  ;;  %v4342_v12 = vpop.f32.mrb[39].mxu1 }
 0x1a9   :  { %6354 = vst [vmem:[#allocation49_spill] sm:$0xff] %v4340_v11  ;;  %6355 = vst [vmem:[#allocation50_spill] sm:$0xff] %v4342_v12  ;;  %v225_v11 = vshrl.u32 %v224_v52, 7 }
 0x1ad   :  { %v4344_v13 = vpop.f32.mrb[40].mxu0  ;;  %v4346_v14 = vpop.f32.mrb[40].mxu1 }
 0x1ae   :  { %6356 = vst [vmem:[#allocation51_spill] sm:$0xff] %v4344_v13  ;;  %6357 = vst [vmem:[#allocation52_spill] sm:$0xff] %v4346_v14  ;;  %v4348_v44 = vpop.f32.mrb[41].mxu0  ;;  %v4350_v51 = vpop.f32.mrb[41].mxu1 }
 0x1af   :  { %6358 = vst [vmem:[#allocation53_spill] sm:$0xff] %v4348_v44  ;;  %6359 = vst [vmem:[#allocation54_spill] sm:$0xff] %v4350_v51  ;;  %v4352_v54 = vpop.f32.mrb[42].mxu0  ;;  %v4354_v8 = vpop.f32.mrb[42].mxu1  ;;  %v226_v44 = vsub.s32 0, %v225_v11 }
 0x1b0   :  { %6360 = vst [vmem:[#allocation55_spill] sm:$0xff] %v4352_v54  ;;  %6361 = vst [vmem:[#allocation56_spill] sm:$0xff] %v4354_v8  ;;  %v4356_v9 = vpop.f32.mrb[43].mxu0  ;;  %v4358_v10 = vpop.f32.mrb[43].mxu1  ;;  %v234_v8 = vsub.s32 2, %v225_v11 }
 0x1b1   :  { %6362 = vst [vmem:[#allocation57_spill] sm:$0xff] %v4356_v9  ;;  %6363 = vst [vmem:[#allocation58_spill] sm:$0xff] %v4358_v10  ;;  %v222_v9 = vld [vmem:[%s6317_s3] sm:$0xf]  ;;  %v230_v10 = vsub.s32 1, %v225_v11 }
 0x1b2   :  { %v4379_v54 = vrot.slane %v222_v9, %v226_v44 }
 0x1b5   :  { %v4360_v7 = vpop.f32.mrb[44].mxu0  ;;  %v4362_v12 = vpop.f32.mrb[44].mxu1 }
 0x1b6   :  { %6364 = vst [vmem:[#allocation59_spill] sm:$0xff] %v4360_v7  ;;  %6365 = vst [vmem:[#allocation60_spill] sm:$0xff] %v4362_v12  ;;  %v4364_v13 = vpop.f32.mrb[45].mxu0  ;;  %v4366_v14 = vpop.f32.mrb[45].mxu1  ;;  %v238_v12 = vsub.s32 3, %v225_v11  ;;  %v4397_v11 = vadd.f32 %v4166_v15, %v4379_v54 }
 0x1b7   :  { %6366 = vst [vmem:[#allocation61_spill] sm:$0xff] %v4364_v13  ;;  %6367 = vst [vmem:[#allocation62_spill] sm:$0xff] %v4366_v14  ;;  %v4368_v51 = vpop.f32.mrb[46].mxu0  ;;  %v4370_v6 = vpop.f32.mrb[46].mxu1  ;;  %v4381_v13 = vrot.slane %v222_v9, %v234_v8  ;;  %v4383_v14 = vrot.slane %v222_v9, %v230_v10 }
 0x1b8   :  { %6368 = vst [vmem:[#allocation63_spill] sm:$0xff] %v4368_v51  ;;  %6369 = vst [vmem:[#allocation64_spill] sm:$0xff] %v4370_v6  ;;  %v4375_v52 = vpop.f32.mrb[47].mxu0  ;;  %v4377_v7 = vpop.f32.mrb[47].mxu1  ;;  %v822_v51 = vld [vmem:[#allocation9] sm:$0xf]  ;;  %v4385_v53 = vrot.slane %v222_v9, %v238_v12 }
 0x1b9   :  { %6370 = vst [vmem:[#allocation65_spill] sm:$0xff] %v4375_v52  ;;  %6371 = vst [vmem:[#allocation66_spill] sm:$0xff] %v4377_v7  ;;  %v4403_v2 = vrot.slane %v822_v51, %v226_v44  ;;  %v4405_v9 = vrot.slane %v822_v51, %v234_v8  ;;  %v4437_v44 = vadd.f32 %v4178_v21, %v4383_v14 }
 0x1ba   :  { %6375 = vst [vmem:[#allocation70_spill] sm:$0xff] %v4397_v11  ;;  %v4419_v11 = vrot.slane %v822_v51, %v230_v10  ;;  %v4425_v8 = vadd.f32 %v4172_v18, %v4385_v53  ;;  %v4441_v10 = vadd.f32 %v4180_v22, %v4385_v53  ;;  %v4445_v18 = vadd.f32 %v4186_v23, %v4379_v54 }
 0x1bb   :  { %v4457_v21 = vadd.f32 %v4192_v26, %v4385_v53  ;;  %v4461_v22 = vadd.f32 %v4194_v27, %v4379_v54  ;;  %v4465_v23 = vadd.f32 %v4196_v28, %v4381_v13  ;;  %v4477_v26 = vadd.f32 %v4206_v31, %v4379_v54 }
 0x1bc   :  { %v4481_v27 = vadd.f32 %v4208_v32, %v4381_v13  ;;  %v4485_v28 = vadd.f32 %v4210_v33, %v4383_v14  ;;  %v4497_v31 = vadd.f32 %v4216_v36, %v4381_v13  ;;  %v4501_v32 = vadd.f32 %v4218_v38, %v4383_v14 }
 0x1bd   :  { %v4387_v6 = vpop.f32.mrb[48].mxu0  ;;  %v4389_v5 = vpop.f32.mrb[48].mxu1  ;;  %6378 = vst [vmem:[#allocation73_spill] sm:$0xff] %v4461_v22  ;;  %6379 = vst [vmem:[#allocation74_spill] sm:$0xff] %v4465_v23  ;;  %v4517_v36 = vadd.f32 %v4228_v41, %v4381_v13  ;;  %v4521_v38 = vadd.f32 %v4230_v42, %v4383_v14  ;;  %v4537_v41 = vadd.f32 %v4236_v46, %v4381_v13 }
 0x1be   :  { %6372 = vst [vmem:[#allocation67_spill] sm:$0xff] %v4387_v6  ;;  %v4391_v4 = vpop.f32.mrb[49].mxu0  ;;  %v4393_v3 = vpop.f32.mrb[49].mxu1  ;;  %v4409_v6 = vadd.f32 %v4168_v16, %v4381_v13  ;;  %v4429_v16 = vadd.f32 %v4174_v19, %v4379_v54  ;;  %v4449_v19 = vadd.f32 %v4188_v24, %v4381_v13  ;;  %v4469_v24 = vadd.f32 %v4198_v29, %v4383_v14 }
 0x1bf   :  { %6373 = vst [vmem:[#allocation68_spill] sm:$0xff] %v4391_v4  ;;  %6374 = vst [vmem:[#allocation69_spill] sm:$0xff] %v4393_v3  ;;  %v4399_v7 = vpop.f32.mrb[50].mxu0  ;;  %v4401_v52 = vpop.f32.mrb[50].mxu1  ;;  %v4413_v4 = vadd.f32 %v4170_v17, %v4383_v14  ;;  %v4433_v17 = vadd.f32 %v4176_v20, %v4381_v13  ;;  %v4453_v20 = vadd.f32 %v4190_v25, %v4383_v14 }
 0x1c0   :  { %6376 = vst [vmem:[#allocation71_spill] sm:$0xff] %v4399_v7  ;;  %v4415_v3 = vpop.f32.mrb[51].mxu0  ;;  %v4417_v15 = vpop.f32.mrb[51].mxu1  ;;  %v4421_v7 = vrot.slane %v822_v51, %v238_v12  ;;  %6377 = vst [vmem:[#allocation72_spill] sm:$0xff] %v4449_v19  ;;  %v4473_v25 = vadd.f32 %v4200_v30, %v4385_v53  ;;  %v4489_v29 = vadd.f32 %v4212_v34, %v4385_v53 }
 0x1c1   :  { %6380 = vst [vmem:[#allocation75_spill] sm:$0xff] %v4477_v26  ;;  %6381 = vst [vmem:[#allocation76_spill] sm:$0xff] %v4481_v27  ;;  %v4493_v30 = vadd.f32 %v4214_v35, %v4379_v54  ;;  %v4509_v34 = vadd.f32 %v4220_v39, %v4385_v53  ;;  %v4513_v35 = vadd.f32 %v4226_v40, %v4379_v54  ;;  %v6508_v27 = vld [vmem:[#allocation66_spill] sm:$0xff] }
 0x1c2   :  { %6382 = vst [vmem:[#allocation77_spill] sm:$0xff] %v4485_v28  ;;  %6383 = vst [vmem:[#allocation78_spill] sm:$0xff] %v4489_v29  ;;  %v4529_v39 = vadd.f32 %v4232_v43, %v4385_v53  ;;  %v4533_v40 = vadd.f32 %v4234_v45, %v4379_v54  ;;  %v4541_v42 = vadd.f32 %v4238_v49, %v4383_v14 }
 0x1c3   :  { %6384 = vst [vmem:[#allocation79_spill] sm:$0xff] %v4493_v30  ;;  %6385 = vst [vmem:[#allocation80_spill] sm:$0xff] %v4497_v31  ;;  %v4549_v43 = vadd.f32 %v4240_v50, %v4385_v53  ;;  %v4553_v45 = vadd.f32 %v4246_v55, %v4379_v54  ;;  %v4557_v46 = vadd.f32 %v4248_v56, %v4381_v13 }
 0x1c4   :  { %6386 = vst [vmem:[#allocation81_spill] sm:$0xff] %v4501_v32  ;;  %6387 = vst [vmem:[#allocation82_spill] sm:$0xff] %v4509_v34  ;;  %v4561_v49 = vadd.f32 %v4250_v57, %v4383_v14  ;;  %v4569_v50 = vadd.f32 %v4252_v58, %v4385_v53  ;;  %v4573_v55 = vadd.f32 %v4254_v47, %v4379_v54 }
 0x1c5   :  { %v4503_v12 = vpop.f32.mrb[52].mxu0  ;;  %v4505_v33 = vpop.f32.mrb[52].mxu1  ;;  %6388 = vst [vmem:[#allocation83_spill] sm:$0xff] %v4513_v35  ;;  %6389 = vst [vmem:[#allocation84_spill] sm:$0xff] %v4517_v36  ;;  %v4577_v56 = vadd.f32 %v4256_v60, %v4381_v13  ;;  %v4581_v57 = vadd.f32 %v4258_v37, %v4383_v14  ;;  %v4589_v58 = vadd.f32 %v4264_v61, %v4379_v54 }
 0x1c6   :  { %6390 = vst [vmem:[#allocation85_spill] sm:$0xff] %v4521_v38  ;;  %v4523_v51 = vpop.f32.mrb[53].mxu0  ;;  %v4525_v31 = vpop.f32.mrb[53].mxu1  ;;  %6391 = vst [vmem:[#allocation86_spill] sm:$0xff] %v4529_v39  ;;  %v4593_v47 = vadd.f32 %v4266_v62, %v4381_v13  ;;  %v4597_v60 = vadd.f32 %v4268_v63, %v4383_v14  ;;  %v4601_v37 = vadd.f32 %v4270_v48, %v4385_v53 }
 0x1c7   :  { %6392 = vst [vmem:[#allocation87_spill] sm:$0xff] %v4533_v40  ;;  %6393 = vst [vmem:[#allocation88_spill] sm:$0xff] %v4537_v41  ;;  %v4543_v36 = vpop.f32.mrb[54].mxu0  ;;  %v4545_v35 = vpop.f32.mrb[54].mxu1  ;;  %v4609_v61 = vadd.f32 %v4274_v59, %v4381_v13  ;;  %v4823_v30 = vadd.f32 %v6508_v27, %v4385_v53  ;;  %v6517_v27 = vld [vmem:[#allocation71_spill] sm:$0xff] }
 0x1c8   :  { %6394 = vst [vmem:[#allocation89_spill] sm:$0xff] %v4541_v42  ;;  %6395 = vst [vmem:[#allocation90_spill] sm:$0xff] %v4549_v43  ;;  %v4563_v41 = vpop.f32.mrb[55].mxu0  ;;  %v4565_v40 = vpop.f32.mrb[55].mxu1  ;;  %v6462_v43 = vld [vmem:[#allocation43_spill] sm:$0xff]  ;;  %v6500_v42 = vld [vmem:[#allocation62_spill] sm:$0xff] }
 0x1c9   :  { %6396 = vst [vmem:[#allocation91_spill] sm:$0xff] %v4553_v45  ;;  %6397 = vst [vmem:[#allocation92_spill] sm:$0xff] %v4557_v46  ;;  %v4585_v46 = vadd.f32 %v4260_v0, %v4385_v53  ;;  %v4605_v0 = vadd.f32 %v4272_v1, %v4379_v54  ;;  %v4807_v38 = vadd.f32 %v6500_v42, %v4385_v53  ;;  %v6510_v42 = vld [vmem:[#allocation67_spill] sm:$0xff] }
 0x1ca   :  { %6398 = vst [vmem:[#allocation93_spill] sm:$0xff] %v4561_v49  ;;  %6399 = vst [vmem:[#allocation94_spill] sm:$0xff] %v4569_v50 }
 0x1cb   :  { %6400 = vst [vmem:[#allocation95_spill] sm:$0xff] %v4573_v55  ;;  %6401 = vst [vmem:[#allocation96_spill] sm:$0xff] %v4577_v56  ;;  %v6436_v55 = vld [vmem:[#allocation30_spill] sm:$0xff] }
 0x1cc   :  { %6402 = vst [vmem:[#allocation97_spill] sm:$0xff] %v4581_v57  ;;  %6403 = vst [vmem:[#allocation98_spill] sm:$0xff] %v4585_v46  ;;  %v6444_v46 = vld [vmem:[#allocation34_spill] sm:$0xff] }
 0x1cd   :  { %6404 = vst [vmem:[#allocation99_spill] sm:$0xff] %v4589_v58  ;;  %6405 = vst [vmem:[#allocation100_spill] sm:$0xff] %v4593_v47  ;;  %v6410_v58 = vld [vmem:[#allocation17_spill] sm:$0xff]  ;;  %v6412_v47 = vld [vmem:[#allocation18_spill] sm:$0xff] }
 0x1ce   :  { %6406 = vst [vmem:[#allocation101_spill] sm:$0xff] %v4597_v60  ;;  %6407 = vst [vmem:[#allocation102_spill] sm:$0xff] %v4601_v37  ;;  %v4613_v62 = vadd.f32 %v6410_v58, %v4383_v14  ;;  %v4617_v63 = vadd.f32 %v6412_v47, %v4385_v53  ;;  %v6414_v60 = vld [vmem:[#allocation19_spill] sm:$0xff]  ;;  %v6416_v37 = vld [vmem:[#allocation20_spill] sm:$0xff] }
 0x1cf   :  { %6408 = vst [vmem:[#allocation103_spill] sm:$0xff] %v4605_v0  ;;  %6409 = vst [vmem:[#allocation104_spill] sm:$0xff] %v4609_v61  ;;  %v4621_v48 = vadd.f32 %v6414_v60, %v4379_v54  ;;  %v4625_v1 = vadd.f32 %v6416_v37, %v4381_v13  ;;  %v6418_v0 = vld [vmem:[#allocation21_spill] sm:$0xff]  ;;  %v6420_v61 = vld [vmem:[#allocation22_spill] sm:$0xff] }
 0x1d0   :  { %6411 = vst [vmem:[#allocation17_spill] sm:$0xff] %v4613_v62  ;;  %6413 = vst [vmem:[#allocation18_spill] sm:$0xff] %v4617_v63  ;;  %v4629_v59 = vadd.f32 %v6418_v0, %v4383_v14  ;;  %v4633_v58 = vadd.f32 %v6420_v61, %v4385_v53  ;;  %v6422_v62 = vld [vmem:[#allocation23_spill] sm:$0xff]  ;;  %v6424_v63 = vld [vmem:[#allocation24_spill] sm:$0xff]  ;;  %v4649_v0 = vpop.f32.mrb[56].mxu1 }
 0x1d1   :  { %6415 = vst [vmem:[#allocation19_spill] sm:$0xff] %v4621_v48  ;;  %6417 = vst [vmem:[#allocation20_spill] sm:$0xff] %v4625_v1  ;;  %v4637_v47 = vadd.f32 %v6422_v62, %v4379_v54  ;;  %v4641_v60 = vadd.f32 %v6424_v63, %v4381_v13  ;;  %v6426_v48 = vld [vmem:[#allocation25_spill] sm:$0xff]  ;;  %v4647_v1 = vpop.f32.mrb[56].mxu0  ;;  %v4669_v56 = vpop.f32.mrb[57].mxu1  ;;  %v6452_v57 = vld [vmem:[#allocation38_spill] sm:$0xff] }
 0x1d2   :  { %6419 = vst [vmem:[#allocation21_spill] sm:$0xff] %v4629_v59  ;;  %6421 = vst [vmem:[#allocation22_spill] sm:$0xff] %v4633_v58  ;;  %v4645_v37 = vadd.f32 %v6426_v48, %v4383_v14  ;;  %v6428_v59 = vld [vmem:[#allocation26_spill] sm:$0xff]  ;;  %v6430_v58 = vld [vmem:[#allocation27_spill] sm:$0xff]  ;;  %v4689_v45 = vpop.f32.mrb[58].mxu1  ;;  %v4711_v49 = vadd.f32 %v6452_v57, %v4385_v53  ;;  %v4731_v57 = vadd.f32 %v6462_v43, %v4379_v54 }
 0x1d3   :  { %6423 = vst [vmem:[#allocation23_spill] sm:$0xff] %v4637_v47  ;;  %6425 = vst [vmem:[#allocation24_spill] sm:$0xff] %v4641_v60  ;;  %v4653_v61 = vadd.f32 %v6428_v59, %v4385_v53  ;;  %v4657_v62 = vadd.f32 %v6430_v58, %v4379_v54  ;;  %v6432_v47 = vld [vmem:[#allocation28_spill] sm:$0xff]  ;;  %v6434_v60 = vld [vmem:[#allocation29_spill] sm:$0xff]  ;;  %v4673_v59 = vadd.f32 %v6436_v55, %v4385_v53  ;;  %v4707_v50 = vpop.f32.mrb[59].mxu1 }
 0x1d4   :  { %6427 = vst [vmem:[#allocation25_spill] sm:$0xff] %v4645_v37  ;;  %v4661_v63 = vadd.f32 %v6432_v47, %v4381_v13  ;;  %v4665_v48 = vadd.f32 %v6434_v60, %v4383_v14  ;;  %v4667_v37 = vpop.f32.mrb[57].mxu0  ;;  %v4693_v55 = vadd.f32 %v6444_v46, %v4385_v53  ;;  %6453 = vst [vmem:[#allocation38_spill] sm:$0xff] %v4711_v49  ;;  %v6454_v46 = vld [vmem:[#allocation39_spill] sm:$0xff]  ;;  %v6464_v49 = vld [vmem:[#allocation44_spill] sm:$0xff] }
 0x1d5   :  { %6429 = vst [vmem:[#allocation26_spill] sm:$0xff] %v4653_v61  ;;  %6431 = vst [vmem:[#allocation27_spill] sm:$0xff] %v4657_v62  ;;  %v6438_v61 = vld [vmem:[#allocation31_spill] sm:$0xff]  ;;  %v6440_v62 = vld [vmem:[#allocation32_spill] sm:$0xff]  ;;  %v781_v39 = vpop.f32.mrb[60].mxu1 }
 0x1d6   :  { %6433 = vst [vmem:[#allocation28_spill] sm:$0xff] %v4661_v63  ;;  %6435 = vst [vmem:[#allocation29_spill] sm:$0xff] %v4665_v48  ;;  %v4677_v58 = vadd.f32 %v6438_v61, %v4379_v54  ;;  %v4681_v47 = vadd.f32 %v6440_v62, %v4381_v13  ;;  %v6442_v63 = vld [vmem:[#allocation33_spill] sm:$0xff]  ;;  %v4687_v48 = vpop.f32.mrb[58].mxu0 }
 0x1d7   :  { %6437 = vst [vmem:[#allocation30_spill] sm:$0xff] %v4673_v59  ;;  %v4685_v60 = vadd.f32 %v6442_v63, %v4383_v14  ;;  %6445 = vst [vmem:[#allocation34_spill] sm:$0xff] %v4693_v55  ;;  %v6446_v59 = vld [vmem:[#allocation35_spill] sm:$0xff]  ;;  %v4715_v55 = vadd.f32 %v6454_v46, %v4379_v54  ;;  %v4735_v46 = vadd.f32 %v6464_v49, %v4381_v13 }
 0x1d8   :  { %6439 = vst [vmem:[#allocation31_spill] sm:$0xff] %v4677_v58  ;;  %6441 = vst [vmem:[#allocation32_spill] sm:$0xff] %v4681_v47  ;;  %v4697_v61 = vadd.f32 %v6446_v59, %v4379_v54  ;;  %v6448_v58 = vld [vmem:[#allocation36_spill] sm:$0xff]  ;;  %v6450_v47 = vld [vmem:[#allocation37_spill] sm:$0xff] }
 0x1d9   :  { %6443 = vst [vmem:[#allocation33_spill] sm:$0xff] %v4685_v60  ;;  %v4701_v62 = vadd.f32 %v6448_v58, %v4381_v13  ;;  %v4705_v63 = vadd.f32 %v6450_v47, %v4383_v14  ;;  %v584_v60 = vpop.f32.mrb[59].mxu0  ;;  %6455 = vst [vmem:[#allocation39_spill] sm:$0xff] %v4715_v55  ;;  %v6456_v59 = vld [vmem:[#allocation40_spill] sm:$0xff]  ;;  %v6458_v58 = vld [vmem:[#allocation41_spill] sm:$0xff] }
 0x1da   :  { %6447 = vst [vmem:[#allocation35_spill] sm:$0xff] %v4697_v61  ;;  %v4719_v61 = vadd.f32 %v6456_v59, %v4381_v13  ;;  %v6460_v47 = vld [vmem:[#allocation42_spill] sm:$0xff]  ;;  %6463 = vst [vmem:[#allocation43_spill] sm:$0xff] %v4731_v57  ;;  %v6466_v55 = vld [vmem:[#allocation45_spill] sm:$0xff] }
 0x1db   :  { %6449 = vst [vmem:[#allocation36_spill] sm:$0xff] %v4701_v62  ;;  %6451 = vst [vmem:[#allocation37_spill] sm:$0xff] %v4705_v63  ;;  %v4723_v62 = vadd.f32 %v6458_v58, %v4383_v14  ;;  %v4727_v63 = vadd.f32 %v6460_v47, %v4385_v53  ;;  %v4739_v59 = vadd.f32 %v6466_v55, %v4383_v14  ;;  %v6474_v57 = vld [vmem:[#allocation49_spill] sm:$0xff] }
 0x1dc   :  { %6457 = vst [vmem:[#allocation40_spill] sm:$0xff] %v4719_v61  ;;  %6465 = vst [vmem:[#allocation44_spill] sm:$0xff] %v4735_v46  ;;  %v6468_v61 = vld [vmem:[#allocation46_spill] sm:$0xff]  ;;  %v4755_v49 = vadd.f32 %v6474_v57, %v4383_v14 }
 0x1dd   :  { %6459 = vst [vmem:[#allocation41_spill] sm:$0xff] %v4723_v62  ;;  %6461 = vst [vmem:[#allocation42_spill] sm:$0xff] %v4727_v63  ;;  %v4743_v58 = vadd.f32 %v6468_v61, %v4385_v53  ;;  %v6470_v62 = vld [vmem:[#allocation47_spill] sm:$0xff]  ;;  %v6472_v63 = vld [vmem:[#allocation48_spill] sm:$0xff] }
 0x1de   :  { %6467 = vst [vmem:[#allocation45_spill] sm:$0xff] %v4739_v59  ;;  %v4747_v47 = vadd.f32 %v6470_v62, %v4379_v54  ;;  %v4751_v43 = vadd.f32 %v6472_v63, %v4381_v13  ;;  %6475 = vst [vmem:[#allocation49_spill] sm:$0xff] %v4755_v49  ;;  %v6476_v46 = vld [vmem:[#allocation50_spill] sm:$0xff]  ;;  %v6478_v59 = vld [vmem:[#allocation51_spill] sm:$0xff] }
 0x1df   :  { %6469 = vst [vmem:[#allocation46_spill] sm:$0xff] %v4743_v58  ;;  %v4759_v55 = vadd.f32 %v6476_v46, %v4385_v53  ;;  %v4763_v61 = vadd.f32 %v6478_v59, %v4379_v54  ;;  %v6480_v58 = vld [vmem:[#allocation52_spill] sm:$0xff]  ;;  %v6486_v49 = vld [vmem:[#allocation55_spill] sm:$0xff]  ;;  %6501 = vst [vmem:[#allocation62_spill] sm:$0xff] %v4807_v38  ;;  %v4827_v38 = vadd.f32 %v6510_v42, %v4379_v54 }
 0x1e0   :  { %6471 = vst [vmem:[#allocation47_spill] sm:$0xff] %v4747_v47  ;;  %6473 = vst [vmem:[#allocation48_spill] sm:$0xff] %v4751_v43  ;;  %v4767_v62 = vadd.f32 %v6480_v58, %v4381_v13  ;;  %v6482_v47 = vld [vmem:[#allocation53_spill] sm:$0xff]  ;;  %v6484_v43 = vld [vmem:[#allocation54_spill] sm:$0xff]  ;;  %v4779_v46 = vadd.f32 %v6486_v49, %v4379_v54  ;;  %v4847_v42 = vadd.f32 %v4401_v52, %v4381_v13 }
 0x1e1   :  { %6477 = vst [vmem:[#allocation50_spill] sm:$0xff] %v4759_v55  ;;  %6479 = vst [vmem:[#allocation51_spill] sm:$0xff] %v4763_v61  ;;  %v4771_v63 = vadd.f32 %v6482_v47, %v4383_v14  ;;  %v4775_v57 = vadd.f32 %v6484_v43, %v4385_v53  ;;  %v6488_v55 = vld [vmem:[#allocation56_spill] sm:$0xff]  ;;  %v6490_v61 = vld [vmem:[#allocation57_spill] sm:$0xff]  ;;  %v4867_v52 = vadd.f32 %v4523_v51, %v4383_v14 }
 0x1e2   :  { %6481 = vst [vmem:[#allocation52_spill] sm:$0xff] %v4767_v62  ;;  %6487 = vst [vmem:[#allocation55_spill] sm:$0xff] %v4779_v46  ;;  %v4783_v59 = vadd.f32 %v6488_v55, %v4381_v13  ;;  %v4787_v58 = vadd.f32 %v6490_v61, %v4383_v14  ;;  %v588_v62 = vpop.f32.mrb[60].mxu0  ;;  %v6492_v47 = vld [vmem:[#allocation58_spill] sm:$0xff]  ;;  %v6494_v43 = vld [vmem:[#allocation59_spill] sm:$0xff]  ;;  %v4887_v51 = vadd.f32 %v4565_v40, %v4385_v53 }
 0x1e3   :  { %6483 = vst [vmem:[#allocation53_spill] sm:$0xff] %v4771_v63  ;;  %6485 = vst [vmem:[#allocation54_spill] sm:$0xff] %v4775_v57  ;;  %v4791_v63 = vadd.f32 %v6492_v47, %v4385_v53  ;;  %v4795_v57 = vadd.f32 %v6494_v43, %v4379_v54  ;;  %v6496_v49 = vld [vmem:[#allocation60_spill] sm:$0xff]  ;;  %v6498_v55 = vld [vmem:[#allocation61_spill] sm:$0xff]  ;;  %v590_v61 = vpop.f32.mrb[61].mxu0  ;;  %v4907_v40 = vadd.f32 %v4687_v48, %v4379_v54 }
 0x1e4   :  { %6489 = vst [vmem:[#allocation56_spill] sm:$0xff] %v4783_v59  ;;  %6491 = vst [vmem:[#allocation57_spill] sm:$0xff] %v4787_v58  ;;  %v4799_v46 = vadd.f32 %v6496_v49, %v4381_v13  ;;  %v4803_v59 = vadd.f32 %v6498_v55, %v4383_v14  ;;  %v783_v58 = vpop.f32.mrb[61].mxu1  ;;  %v6502_v47 = vld [vmem:[#allocation63_spill] sm:$0xff]  ;;  %v6504_v43 = vld [vmem:[#allocation64_spill] sm:$0xff]  ;;  %v592_v55 = vpop.f32.mrb[62].mxu0 }
 0x1e5   :  { %6493 = vst [vmem:[#allocation58_spill] sm:$0xff] %v4791_v63  ;;  %6495 = vst [vmem:[#allocation59_spill] sm:$0xff] %v4795_v57  ;;  %v4811_v63 = vadd.f32 %v6502_v47, %v4379_v54  ;;  %v4815_v57 = vadd.f32 %v6504_v43, %v4381_v13  ;;  %v6506_v49 = vld [vmem:[#allocation65_spill] sm:$0xff]  ;;  %v4831_v47 = vadd.f32 %v4389_v5, %v4381_v13  ;;  %v6513_v43 = vld [vmem:[#allocation68_spill] sm:$0xff] }
 0x1e6   :  { %6497 = vst [vmem:[#allocation60_spill] sm:$0xff] %v4799_v46  ;;  %6499 = vst [vmem:[#allocation61_spill] sm:$0xff] %v4803_v59  ;;  %v4819_v46 = vadd.f32 %v6506_v49, %v4383_v14  ;;  %v785_v59 = vpop.f32.mrb[62].mxu1  ;;  %v594_v49 = vpop.f32.mrb[63].mxu0  ;;  %v4851_v5 = vadd.f32 %v4415_v3, %v4383_v14  ;;  %v4871_v3 = vadd.f32 %v4525_v31, %v4385_v53 }
 0x1e7   :  { %6503 = vst [vmem:[#allocation63_spill] sm:$0xff] %v4811_v63  ;;  %6505 = vst [vmem:[#allocation64_spill] sm:$0xff] %v4815_v57  ;;  %v4835_v57 = vadd.f32 %v6513_v43, %v4383_v14  ;;  %v787_v63 = vpop.f32.mrb[63].mxu1  ;;  %v4855_v43 = vadd.f32 %v4417_v15, %v4385_v53  ;;  %v4875_v15 = vadd.f32 %v4543_v36, %v4379_v54 }
 0x1e8   :  { %6507 = vst [vmem:[#allocation65_spill] sm:$0xff] %v4819_v46  ;;  %6509 = vst [vmem:[#allocation66_spill] sm:$0xff] %v4823_v30  ;;  %v6515_v46 = vld [vmem:[#allocation69_spill] sm:$0xff]  ;;  %v4843_v30 = vadd.f32 %v6517_v27, %v4379_v54  ;;  %v4863_v27 = vadd.f32 %v4505_v33, %v4381_v13  ;;  %v4883_v33 = vadd.f32 %v4563_v41, %v4383_v14 }
 0x1e9   :  { %6511 = vst [vmem:[#allocation67_spill] sm:$0xff] %v4827_v38  ;;  %6512 = vst [vmem:[#allocation105_spill] sm:$0xff] %v4831_v47  ;;  %v4839_v26 = vadd.f32 %v6515_v46, %v4385_v53  ;;  %v4859_v46 = vadd.f32 %v4503_v12, %v4379_v54  ;;  %v4879_v12 = vadd.f32 %v4545_v35, %v4381_v13 }
 0x1ea   :  { %6514 = vst [vmem:[#allocation68_spill] sm:$0xff] %v4835_v57  ;;  %6518 = vst [vmem:[#allocation71_spill] sm:$0xff] %v4843_v30  ;;  %v4891_v31 = vadd.f32 %v4647_v1, %v4379_v54  ;;  %v4895_v36 = vadd.f32 %v4649_v0, %v4381_v13  ;;  %v4899_v35 = vadd.f32 %v4667_v37, %v4383_v14  ;;  %v1038_v0 = vpop.f32.mrb[64].mxu0 }
 0x1eb   :  { %6516 = vst [vmem:[#allocation69_spill] sm:$0xff] %v4839_v26  ;;  %6519 = vst [vmem:[#allocation106_spill] sm:$0xff] %v4847_v42  ;;  %v4903_v41 = vadd.f32 %v4669_v56, %v4385_v53  ;;  %v4911_v1 = vadd.f32 %v4689_v45, %v4381_v13  ;;  %v4918_v37 = vadd.f32 %v4707_v50, %v4385_v53 }
 0x1ec   :  { %6520 = vst [vmem:[#allocation107_spill] sm:$0xff] %v4851_v5  ;;  %6521 = vst [vmem:[#allocation108_spill] sm:$0xff] %v4855_v43  ;;  %v4921_v56 = vadd.f32 %v588_v62, %v4379_v54  ;;  %v4926_v45 = vadd.f32 %v781_v39, %v4381_v13  ;;  %v4934_v62 = vadd.f32 %v783_v58, %v4385_v53 }
 0x1ed   :  { %6522 = vst [vmem:[#allocation109_spill] sm:$0xff] %v4859_v46  ;;  %6523 = vst [vmem:[#allocation110_spill] sm:$0xff] %v4863_v27  ;;  %v4940_v39 = vadd.f32 %v785_v59, %v4381_v13 }
 0x1ee   :  { %6524 = vst [vmem:[#allocation111_spill] sm:$0xff] %v4867_v52  ;;  %6525 = vst [vmem:[#allocation112_spill] sm:$0xff] %v4871_v3 }
 0x1ef   :  { %6526 = vst [vmem:[#allocation113_spill] sm:$0xff] %v4875_v15  ;;  %6527 = vst [vmem:[#allocation114_spill] sm:$0xff] %v4879_v12 }
 0x1f0   :  { %6528 = vst [vmem:[#allocation115_spill] sm:$0xff] %v4883_v33  ;;  %6529 = vst [vmem:[#allocation116_spill] sm:$0xff] %v4887_v51 }
 0x1f1   :  { %6530 = vst [vmem:[#allocation117_spill] sm:$0xff] %v4891_v31  ;;  %6531 = vst [vmem:[#allocation118_spill] sm:$0xff] %v4895_v36  ;;  %v4914_v31 = vadd.f32 %v584_v60, %v4383_v14  ;;  %v1231_v36 = vpop.f32.mrb[64].mxu1  ;;  %v4929_v60 = vadd.f32 %v590_v61, %v4383_v14  ;;  %v4943_v61 = vadd.f32 %v594_v49, %v4383_v14 }
 0x1f2   :  { %6532 = vst [vmem:[#allocation119_spill] sm:$0xff] %v4899_v35  ;;  %6533 = vst [vmem:[#allocation120_spill] sm:$0xff] %v4903_v41  ;;  %v1039_v41 = vadd.f32 %v1038_v0, %v4403_v2  ;;  %v1232_v48 = vadd.f32 %v1231_v36, %v4405_v9  ;;  %v1233_v35 = vpop.f32.mrb[65].mxu1  ;;  %v4937_v0 = vadd.f32 %v592_v55, %v4379_v54 }
 0x1f3   :  { %6534 = vst [vmem:[#allocation121_spill] sm:$0xff] %v4907_v40  ;;  %6535 = vst [vmem:[#allocation122_spill] sm:$0xff] %v4911_v1  ;;  %v1040_v40 = vpop.f32.mrb[65].mxu0  ;;  %v1234_v50 = vadd.f32 %v1233_v35, %v4421_v7  ;;  %v4946_v35 = vadd.f32 %v787_v63, %v4385_v53 }
 0x1f4   :  { %6536 = vst [vmem:[#allocation123_spill] sm:$0xff] %v4914_v31  ;;  %6537 = vst [vmem:[#allocation124_spill] sm:$0xff] %v4918_v37  ;;  %v1041_v1 = vadd.f32 %v1040_v40, %v4419_v11  ;;  %v1042_v37 = vpop.f32.mrb[66].mxu0  ;;  %v1235_v31 = vpop.f32.mrb[66].mxu1  ;;  %v1518_v36 = vmul.f32 0.70710677, %v1039_v41 }
 0x1f5   :  { %6538 = vst [vmem:[#allocation125_spill] sm:$0xff] %v4921_v56  ;;  %6539 = vst [vmem:[#allocation126_spill] sm:$0xff] %v4926_v45  ;;  %v1520_v56 = vmul.f32 0.70710677, %v1232_v48  ;;  %v1521_v40 = vmul.f32 0.70710677, %v1234_v50  ;;  %v1043_v58 = vadd.f32 %v1042_v37, %v4403_v2 }
 0x1f6   :  { %6540 = vst [vmem:[#allocation127_spill] sm:$0xff] %v4929_v60  ;;  %6541 = vst [vmem:[#allocation128_spill] sm:$0xff] %v4934_v62  ;;  %v1519_v45 = vmul.f32 0.70710677, %v1041_v1  ;;  %3486 = verf.f32 %v1518_v36  ;;  %v1236_v62 = vadd.f32 %v1235_v31, %v4405_v9  ;;  %v1044_v54 = vpop.f32.mrb[67].mxu0  ;;  %v1237_v55 = vpop.f32.mrb[67].mxu1 }
 0x1f7   :  { %6542 = vst [vmem:[#allocation129_spill] sm:$0xff] %v4937_v0  ;;  %6543 = vst [vmem:[#allocation130_spill] sm:$0xff] %v4940_v39  ;;  %v4950_v0 = vmul.f32 0.5, %v1039_v41  ;;  %3488 = verf.f32 %v1520_v56  ;;  %v1045_v13 = vadd.f32 %v1044_v54, %v4419_v11  ;;  %v1238_v14 = vadd.f32 %v1237_v55, %v4421_v7  ;;  %v1048_v36 = vpop.f32.mrb[68].mxu0  ;;  %v1241_v54 = vpop.f32.mrb[68].mxu1 }
 0x1f8   :  { %6544 = vst [vmem:[#allocation131_spill] sm:$0xff] %v4943_v61  ;;  %6545 = vst [vmem:[#allocation132_spill] sm:$0xff] %v4946_v35  ;;  %v4954_v59 = vmul.f32 0.5, %v1232_v48  ;;  %v4956_v49 = vmul.f32 0.5, %v1041_v1  ;;  %3490 = verf.f32 %v1519_v45  ;;  %v1522_v53 = vmul.f32 0.70710677, %v1043_v58 }
 0x1f9   :  { %v4958_v63 = vmul.f32 0.5, %v1234_v50  ;;  %3492 = verf.f32 %v1521_v40  ;;  %v1524_v37 = vmul.f32 0.70710677, %v1236_v62  ;;  %v1523_v31 = vmul.f32 0.70710677, %v1045_v13  ;;  %v1050_v55 = vpop.f32.mrb[69].mxu0 }
 0x1fa   :  { %v4960_v35 = vmul.f32 0.5, %v1043_v58  ;;  %3494 = verf.f32 %v1522_v53  ;;  %v1525_v41 = vmul.f32 0.70710677, %v1238_v14  ;;  %v1049_v56 = vadd.f32 %v1048_v36, %v4403_v2  ;;  %v1243_v50 = vpop.f32.mrb[69].mxu1  ;;  %v1052_v40 = vpop.f32.mrb[70].mxu0 }
 0x1fb   :  { %v4963_v48 = vmul.f32 0.5, %v1236_v62  ;;  %3496 = verf.f32 %v1524_v37  ;;  %v1242_v1 = vadd.f32 %v1241_v54, %v4405_v9  ;;  %v1051_v45 = vadd.f32 %v1050_v55, %v4419_v11  ;;  %v1245_v39 = vpop.f32.mrb[70].mxu1  ;;  %v1054_v60 = vpop.f32.mrb[71].mxu0 }
 0x1fc   :  { %v4967_v61 = vmul.f32 0.5, %v1045_v13  ;;  %3498 = verf.f32 %v1523_v31  ;;  %v1526_v58 = vmul.f32 0.70710677, %v1049_v56  ;;  %v1244_v53 = vadd.f32 %v1243_v50, %v4421_v7  ;;  %v1247_v12 = vpop.f32.mrb[71].mxu1  ;;  %v1058_v51 = vpop.f32.mrb[72].mxu0 }
 0x1fd   :  { %v4970_v36 = vmul.f32 0.5, %v1238_v14  ;;  %3500 = verf.f32 %v1525_v41  ;;  %v4972_v62 = vmul.f32 0.5, %v1049_v56  ;;  %v1528_v37 = vmul.f32 0.70710677, %v1242_v1 }
 0x1fe   :  { %3502 = verf.f32 %v1526_v58  ;;  %v4974_v54 = vmul.f32 0.5, %v1242_v1  ;;  %v1527_v55 = vmul.f32 0.70710677, %v1051_v45  ;;  %v1529_v27 = vmul.f32 0.70710677, %v1244_v53 }
 0x1ff   :  { %3504 = verf.f32 %v1528_v37  ;;  %v1053_v13 = vadd.f32 %v1052_v40, %v4403_v2  ;;  %v1246_v31 = vadd.f32 %v1245_v39, %v4405_v9  ;;  %v1055_v50 = vadd.f32 %v1054_v60, %v4419_v11  ;;  %v1251_v40 = vpop.f32.mrb[72].mxu1 }
 0x200   :  { %v3487_v15 = vpop.eup %3486  ;;  %v4979_v14 = vmul.f32 0.5, %v1051_v45  ;;  %3506 = verf.f32 %v1527_v55  ;;  %v4981_v41 = vmul.f32 0.5, %v1244_v53  ;;  %v1248_v56 = vadd.f32 %v1247_v12, %v4421_v7  ;;  %v1060_v55 = vpop.f32.mrb[73].mxu0 }
 0x201   :  { %v3489_v58 = vpop.eup %3488  ;;  %v1774_v1 = vadd.f32 1.0, %v3487_v15  ;;  %3508 = verf.f32 %v1529_v27  ;;  %v4984_v46 = vmul.f32 0.5, %v1053_v13  ;;  %v1530_v37 = vmul.f32 0.70710677, %v1053_v13  ;;  %v4991_v27 = vpop.f32.mrb[73].mxu1 }
 0x202   :  { %v3491_v3 = vpop.eup %3490  ;;  %v1776_v39 = vadd.f32 1.0, %v3489_v58  ;;  %v4986_v33 = vmul.f32 0.5, %v1246_v31  ;;  %v1532_v60 = vmul.f32 0.70710677, %v1246_v31  ;;  %v4988_v45 = vmul.f32 0.5, %v1055_v50  ;;  %v4993_v42 = vpop.f32.mrb[74].mxu0 }
 0x203   :  { %v3493_v53 = vpop.eup %3492  ;;  %v1902_v52 = vmul.f32 %v1774_v1, %v4950_v0  ;;  %v1775_v12 = vadd.f32 1.0, %v3491_v3  ;;  %3510 = verf.f32 %v1530_v37  ;;  %v1531_v15 = vmul.f32 0.70710677, %v1055_v50  ;;  %v4998_v31 = vpop.f32.mrb[74].mxu1  ;;  %v6546_v0 = vld [vmem:[#allocation70_spill] sm:$0xff] }
 0x204   :  { %v3495_v13 = vpop.eup %3494  ;;  %v1904_v47 = vmul.f32 %v1776_v39, %v4954_v59  ;;  %v1777_v58 = vadd.f32 1.0, %v3493_v53  ;;  %3512 = verf.f32 %v1532_v60  ;;  %v4996_v30 = vmul.f32 0.5, %v1248_v56  ;;  %v5000_v38 = vpop.f32.mrb[75].mxu0 }
 0x205   :  { %v3497_v43 = vpop.eup %3496  ;;  %v5003_v3 = vmul.f32 %v1902_v52, %v6546_v0  ;;  %v5006_v50 = vmul.f32 %v1775_v12, %v4956_v49  ;;  %v1778_v1 = vadd.f32 1.0, %v3495_v13  ;;  %3514 = verf.f32 %v1531_v15  ;;  %v5008_v37 = vpop.f32.mrb[75].mxu1 }
 0x206   :  { %v3499_v59 = vpop.eup %3498  ;;  %v5011_v39 = vmul.f32 %v1904_v47, %v4409_v6  ;;  %v5014_v60 = vmul.f32 %v1777_v58, %v4958_v63  ;;  %v1780_v53 = vadd.f32 1.0, %v3497_v43  ;;  %v1533_v26 = vmul.f32 0.70710677, %v1248_v56  ;;  %v1261_v58 = vpop.f32.mrb[76].mxu1 }
 0x207   :  { %v3501_v5 = vpop.eup %3500  ;;  %v1906_v52 = vmul.f32 %v1778_v1, %v4960_v35  ;;  %v1779_v0 = vadd.f32 1.0, %v3499_v59  ;;  %v1059_v49 = vadd.f32 %v1058_v51, %v4403_v2  ;;  %v1252_v12 = vadd.f32 %v1251_v40, %v4405_v9  ;;  %v1068_v51 = vpop.f32.mrb[76].mxu0 }
 0x208   :  { %v3503_v15 = vpop.eup %3502  ;;  %v1908_v13 = vmul.f32 %v1780_v53, %v4963_v48  ;;  %v1781_v57 = vadd.f32 1.0, %v3501_v5  ;;  %3516 = verf.f32 %v1533_v26  ;;  %v1061_v6 = vadd.f32 %v1060_v55, %v4419_v11  ;;  %v1070_v55 = vpop.f32.mrb[77].mxu0 }
 0x209   :  { %v3505_v47 = vpop.eup %3504  ;;  %v5022_v63 = vmul.f32 %v1906_v52, %v4429_v16  ;;  %v5025_v43 = vmul.f32 %v1779_v0, %v4967_v61  ;;  %v1782_v35 = vadd.f32 1.0, %v3503_v15  ;;  %v5027_v56 = vmul.f32 0.5, %v1059_v49  ;;  %v5035_v16 = vpop.f32.mrb[77].mxu1 }
 0x20a   :  { %v3507_v40 = vpop.eup %3506  ;;  %v5030_v1 = vmul.f32 %v1908_v13, %v4433_v17  ;;  %v5033_v26 = vmul.f32 %v1781_v57, %v4970_v36  ;;  %v1784_v5 = vadd.f32 1.0, %v3505_v47  ;;  %v1534_v48 = vmul.f32 0.70710677, %v1059_v49  ;;  %v5044_v17 = vpop.f32.mrb[78].mxu0 }
 0x20b   :  { %v3509_v59 = vpop.eup %3508  ;;  %v5040_v53 = vmul.f32 %v1782_v35, %v4972_v62  ;;  %v1783_v52 = vadd.f32 1.0, %v3507_v40  ;;  %v5042_v0 = vmul.f32 0.5, %v1252_v12  ;;  %v5046_v15 = vpop.f32.mrb[78].mxu1  ;;  %v1536_v40 = vmul.f32 0.70710677, %v1252_v12 }
 0x20c   :  { %v5051_v36 = vmul.f32 %v1784_v5, %v4974_v54  ;;  %v1785_v49 = vadd.f32 1.0, %v3509_v59  ;;  %3518 = verf.f32 %v1534_v48  ;;  %v5053_v13 = vpop.f32.mrb[79].mxu0  ;;  %v5055_v47 = vpop.f32.mrb[79].mxu1  ;;  %v5060_v61 = vmul.f32 0.5, %v1061_v6 }
 0x20d   :  { %v3511_v62 = vpop.eup %3510  ;;  %v5058_v35 = vmul.f32 %v1783_v52, %v4979_v14  ;;  %v1535_v34 = vmul.f32 0.70710677, %v1061_v6  ;;  %v1254_v5 = vadd.f32 %v4991_v27, %v4421_v7  ;;  %v1063_v48 = vadd.f32 %v4993_v42, %v4403_v2 }
 0x20e   :  { %6547 = vst [vmem:[#allocation70_spill] sm:$0xff] %v5051_v36  ;;  %v3513_v29 = vpop.eup %3512  ;;  %v5063_v57 = vmul.f32 %v1785_v49, %v4981_v41  ;;  %v1786_v54 = vadd.f32 1.0, %v3511_v62  ;;  %3520 = verf.f32 %v1536_v40  ;;  %v1256_v14 = vadd.f32 %v4998_v31, %v4405_v9  ;;  %v5083_v62 = vpop.f32.mrb[80].mxu0 }
 0x20f   :  { %v3515_v59 = vpop.eup %3514  ;;  %v1788_v32 = vadd.f32 1.0, %v3513_v29  ;;  %v1065_v12 = vadd.f32 %v5000_v38, %v4419_v11  ;;  %3522 = verf.f32 %v1535_v34  ;;  %v5076_v52 = vmul.f32 0.5, %v1254_v5  ;;  %v5092_v34 = vpop.f32.mrb[80].mxu1 }
 0x210   :  { %v5074_v6 = vmul.f32 %v1786_v54, %v4984_v46  ;;  %v1787_v41 = vadd.f32 1.0, %v3515_v59  ;;  %v1537_v42 = vmul.f32 0.70710677, %v1254_v5  ;;  %v5081_v49 = vmul.f32 0.5, %v1063_v48  ;;  %v5094_v59 = vpop.f32.mrb[81].mxu0 }
 0x211   :  { %v5079_v27 = vmul.f32 %v1788_v32, %v4986_v33  ;;  %v1538_v29 = vmul.f32 0.70710677, %v1063_v48  ;;  %v5088_v38 = vmul.f32 0.5, %v1256_v14  ;;  %v1540_v46 = vmul.f32 0.70710677, %v1256_v14  ;;  %v5098_v48 = vpop.f32.mrb[81].mxu1 }
 0x212   :  { %6548 = vst [vmem:[#allocation133_spill] sm:$0xff] %v5074_v6  ;;  %v3517_v31 = vpop.eup %3516  ;;  %v5086_v40 = vmul.f32 %v1787_v41, %v4988_v45  ;;  %v5090_v54 = vmul.f32 0.5, %v1065_v12  ;;  %3524 = verf.f32 %v1537_v42  ;;  %v1539_v33 = vmul.f32 0.70710677, %v1065_v12  ;;  %v5100_v28 = vpop.f32.mrb[82].mxu0 }
 0x213   :  { %6549 = vst [vmem:[#allocation134_spill] sm:$0xff] %v5079_v27  ;;  %v1789_v32 = vadd.f32 1.0, %v3517_v31  ;;  %v1258_v5 = vadd.f32 %v5008_v37, %v4421_v7  ;;  %3526 = verf.f32 %v1538_v29  ;;  %v1069_v45 = vadd.f32 %v1068_v51, %v4403_v2  ;;  %v5105_v27 = vpop.f32.mrb[82].mxu1  ;;  %v5107_v23 = vpop.f32.mrb[83].mxu0 }
 0x214   :  { %v1262_v14 = vadd.f32 %v1261_v58, %v4405_v9  ;;  %v1071_v41 = vadd.f32 %v1070_v55, %v4419_v11  ;;  %3528 = verf.f32 %v1540_v46  ;;  %v5114_v31 = vpop.f32.mrb[83].mxu1  ;;  %v1264_v46 = vadd.f32 %v5035_v16, %v4421_v7 }
 0x215   :  { %v5110_v12 = vmul.f32 %v1789_v32, %v4996_v30  ;;  %v5112_v37 = vmul.f32 0.5, %v1258_v5  ;;  %v1541_v42 = vmul.f32 0.70710677, %v1258_v5  ;;  %3530 = verf.f32 %v1539_v33 }
 0x216   :  { %v3519_v29 = vpop.eup %3518  ;;  %v5116_v51 = vmul.f32 0.5, %v1069_v45  ;;  %v1542_v58 = vmul.f32 0.70710677, %v1069_v45  ;;  %v5118_v36 = vmul.f32 0.5, %v1262_v14  ;;  %v1544_v19 = vmul.f32 0.70710677, %v1262_v14 }
 0x217   :  { %v1790_v55 = vadd.f32 1.0, %v3519_v29  ;;  %3532 = verf.f32 %v1541_v42  ;;  %v5120_v6 = vmul.f32 0.5, %v1071_v41  ;;  %v1543_v30 = vmul.f32 0.70710677, %v1071_v41  ;;  %v5133_v42 = vpop.f32.mrb[84].mxu0  ;;  %v5135_v41 = vpop.f32.mrb[84].mxu1 }
 0x218   :  { %3534 = verf.f32 %v1542_v58  ;;  %v1073_v32 = vadd.f32 %v5044_v17, %v4403_v2  ;;  %v3521_v5 = vpop.eup %3520  ;;  %v1266_v45 = vadd.f32 %v5046_v15, %v4405_v9  ;;  %v1075_v14 = vadd.f32 %v5053_v13, %v4419_v11  ;;  %6551 = vst [vmem:[#allocation136_spill] sm:$0xff] %v5133_v42  ;;  %6552 = vst [vmem:[#allocation137_spill] sm:$0xff] %v5135_v41  ;;  %v5139_v22 = vpop.f32.mrb[85].mxu0 }
 0x219   :  { %v5127_v33 = vmul.f32 %v1790_v55, %v5027_v56  ;;  %3536 = verf.f32 %v1544_v19  ;;  %v3523_v29 = vpop.eup %3522  ;;  %v1792_v16 = vadd.f32 1.0, %v3521_v5  ;;  %v5137_v58 = vmul.f32 0.5, %v1264_v46  ;;  %6553 = vst [vmem:[#allocation138_spill] sm:$0xff] %v5139_v22  ;;  %v5141_v56 = vpop.f32.mrb[85].mxu1 }
 0x21a   :  { %3538 = verf.f32 %v1543_v30  ;;  %v1545_v17 = vmul.f32 0.70710677, %v1264_v46  ;;  %6554 = vst [vmem:[#allocation139_spill] sm:$0xff] %v5141_v56  ;;  %v1791_v19 = vadd.f32 1.0, %v3523_v29  ;;  %v5143_v55 = vmul.f32 0.5, %v1073_v32  ;;  %v5147_v13 = vpop.f32.mrb[86].mxu0 }
 0x21b   :  { %6550 = vst [vmem:[#allocation135_spill] sm:$0xff] %v5127_v33  ;;  %v1546_v15 = vmul.f32 0.70710677, %v1073_v32  ;;  %v5145_v33 = vmul.f32 0.5, %v1266_v45  ;;  %6555 = vst [vmem:[#allocation140_spill] sm:$0xff] %v5147_v13  ;;  %v5150_v41 = vmul.f32 %v1792_v16, %v5042_v0  ;;  %v5152_v5 = vmul.f32 0.5, %v1075_v14 }
 0x21c   :  { %3540 = verf.f32 %v1545_v17  ;;  %v1548_v30 = vmul.f32 0.70710677, %v1266_v45  ;;  %v5154_v46 = vpop.f32.mrb[86].mxu1  ;;  %v5156_v22 = vpop.f32.mrb[87].mxu0  ;;  %v5159_v29 = vmul.f32 %v1791_v19, %v5060_v61  ;;  %v1547_v32 = vmul.f32 0.70710677, %v1075_v14 }
 0x21d   :  { %6556 = vst [vmem:[#allocation141_spill] sm:$0xff] %v5150_v41  ;;  %6557 = vst [vmem:[#allocation142_spill] sm:$0xff] %v5156_v22  ;;  %v3525_v56 = vpop.eup %3524  ;;  %3542 = verf.f32 %v1546_v15  ;;  %v1268_v13 = vadd.f32 %v5055_v47, %v4421_v7  ;;  %v5163_v42 = vpop.f32.mrb[87].mxu1  ;;  %v2031_v45 = vmul.f32 %v5006_v50, %v4413_v4  ;;  %v2035_v17 = vmul.f32 %v5025_v43, %v4437_v44 }
 0x21e   :  { %6558 = vst [vmem:[#allocation143_spill] sm:$0xff] %v5159_v29  ;;  %v3527_v0 = vpop.eup %3526  ;;  %v1793_v16 = vadd.f32 1.0, %v3525_v56  ;;  %3544 = verf.f32 %v1548_v30  ;;  %v2033_v56 = vmul.f32 %v5014_v60, %v4425_v8  ;;  %v2037_v50 = vmul.f32 %v5033_v26, %v4441_v10  ;;  %v5181_v43 = vpop.f32.mrb[88].mxu0 }
 0x21f   :  { %v3529_v41 = vpop.eup %3528  ;;  %v1794_v22 = vadd.f32 1.0, %v3527_v0  ;;  %3546 = verf.f32 %v1547_v32  ;;  %v5169_v61 = vmul.f32 0.5, %v1268_v13  ;;  %v1549_v14 = vmul.f32 0.70710677, %v1268_v13  ;;  %v5183_v13 = vpop.f32.mrb[88].mxu1 }
 0x220   :  { %v3531_v19 = vpop.eup %3530  ;;  %v5172_v47 = vmul.f32 %v1793_v16, %v5076_v52  ;;  %v1796_v15 = vadd.f32 1.0, %v3529_v41  ;;  %v2159_v29 = vpack.c.bf16 %v2035_v17, %v2031_v45  ;;  %v1079_v8 = vadd.f32 %v5083_v62, %v4403_v2  ;;  %v5192_v60 = vpop.f32.mrb[89].mxu0 }
 0x221   :  { %v3533_v30 = vpop.eup %3532  ;;  %v5177_v4 = vmul.f32 %v1794_v22, %v5081_v49  ;;  %v1795_v44 = vadd.f32 1.0, %v3531_v19  ;;  %3548 = verf.f32 %v1549_v14  ;;  %v1272_v22 = vadd.f32 %v5092_v34, %v4405_v9  ;;  %v5194_v49 = vpop.f32.mrb[89].mxu1 }
 0x222   :  { %v3535_v52 = vpop.eup %3534  ;;  %v5186_v41 = vmul.f32 %v1796_v15, %v5088_v38  ;;  %v1797_v32 = vadd.f32 1.0, %v3533_v30  ;;  %2542 = vmatprep.mubr.bf16.mxu0 %v2159_v29  ;;  %v2161_v16 = vpack.c.bf16 %v2037_v50, %v2033_v56  ;;  %v6559_v38 = vpack.c.bf16 %v5022_v63, %v5003_v3  ;;  %v5204_v29 = vpop.f32.mrb[90].mxu0 }
 0x223   :  { %v3537_v10 = vpop.eup %3536  ;;  %v5197_v26 = vmul.f32 %v1795_v44, %v5090_v54  ;;  %v1798_v0 = vadd.f32 1.0, %v3535_v52  ;;  %v1081_v62 = vadd.f32 %v5094_v59, %v4419_v11  ;;  %v5206_v34 = vpop.f32.mrb[90].mxu1  ;;  %v5211_v54 = vmul.f32 0.5, %v1079_v8 }
 0x224   :  { %2543 = vmatmul.mubr.bf16.vlgmr.msra.gmra.mrb[128].mxu0 %v6559_v38  ;;  %v3539_v45 = vpop.eup %3538  ;;  %v5209_v17 = vmul.f32 %v1797_v32, %v5112_v37  ;;  %v1800_v14 = vadd.f32 1.0, %v3537_v10  ;;  %v1550_v19 = vmul.f32 0.70710677, %v1079_v8  ;;  %v5213_v15 = vpop.f32.mrb[91].mxu0  ;;  %2703 = vmatprep.mubr.bf16.mxu1 %v2161_v16  ;;  %v5220_v59 = vmul.f32 0.5, %v1272_v22 }
 0x225   :  { %v5215_v56 = vpop.f32.mrb[91].mxu1  ;;  %v5218_v3 = vmul.f32 %v1798_v0, %v5116_v51  ;;  %v1799_v63 = vadd.f32 1.0, %v3539_v45  ;;  %v1552_v30 = vmul.f32 0.70710677, %v1272_v22  ;;  %v6560_v50 = vpack.c.bf16 %v5030_v1, %v5011_v39 }
 0x226   :  { %v3541_v44 = vpop.eup %3540  ;;  %v5223_v37 = vmul.f32 %v1800_v14, %v5118_v36  ;;  %3550 = verf.f32 %v1550_v19  ;;  %v5228_v52 = vmul.f32 0.5, %v1081_v62  ;;  %v1551_v32 = vmul.f32 0.70710677, %v1081_v62  ;;  %v5244_v14 = vpop.f32.mrb[92].mxu0 }
 0x227   :  { %2704 = vmatmul.mubr.bf16.vlgmr.msra.gmra.mrb[128].mxu1 %v6560_v50  ;;  %v3543_v8 = vpop.eup %3542  ;;  %v5231_v51 = vmul.f32 %v1799_v63, %v5120_v6  ;;  %v1801_v10 = vadd.f32 1.0, %v3541_v44  ;;  %3552 = verf.f32 %v1552_v30  ;;  %v1274_v22 = vadd.f32 %v5098_v48, %v4421_v7  ;;  %v5246_v48 = vpop.f32.mrb[92].mxu1 }
 0x228   :  { %v3545_v0 = vpop.eup %3544  ;;  %v1802_v36 = vadd.f32 1.0, %v3543_v8  ;;  %3554 = verf.f32 %v1551_v32  ;;  %v1083_v39 = vadd.f32 %v5100_v28, %v4403_v2  ;;  %v1276_v1 = vadd.f32 %v5105_v27, %v4405_v9  ;;  %v5253_v27 = vpop.f32.mrb[93].mxu0 }
 0x229   :  { %v3547_v16 = vpop.eup %3546  ;;  %v5240_v38 = vmul.f32 %v1801_v10, %v5137_v58  ;;  %v1804_v6 = vadd.f32 1.0, %v3545_v0  ;;  %v5242_v62 = vmul.f32 0.5, %v1274_v22  ;;  %v1553_v45 = vmul.f32 0.70710677, %v1274_v22  ;;  %v5255_v44 = vpop.f32.mrb[93].mxu1 }
 0x22a   :  { %v5249_v19 = vmul.f32 %v1802_v36, %v5143_v55  ;;  %v1803_v63 = vadd.f32 1.0, %v3547_v16  ;;  %v5251_v28 = vmul.f32 0.5, %v1083_v39  ;;  %v1554_v30 = vmul.f32 0.70710677, %v1083_v39  ;;  %v5262_v10 = vpop.f32.mrb[94].mxu0  ;;  %v5264_v55 = vpop.f32.mrb[94].mxu1 }
 0x22b   :  { %v3549_v58 = vpop.eup %3548  ;;  %v5258_v50 = vmul.f32 %v1804_v6, %v5145_v33  ;;  %3556 = verf.f32 %v1553_v45  ;;  %v5260_v32 = vmul.f32 0.5, %v1276_v1  ;;  %v1556_v8 = vmul.f32 0.70710677, %v1276_v1  ;;  %v5271_v39 = vpop.f32.mrb[95].mxu0 }
 0x22c   :  { %v5267_v22 = vmul.f32 %v1803_v63, %v5152_v5  ;;  %v1805_v0 = vadd.f32 1.0, %v3549_v58  ;;  %3558 = verf.f32 %v1554_v30  ;;  %v1085_v36 = vadd.f32 %v5107_v23, %v4419_v11  ;;  %6561 = vst [vmem:[#allocation144_spill] sm:$0xff] %v5271_v39  ;;  %v5273_v33 = vpop.f32.mrb[95].mxu1 }
 0x22d   :  { %6562 = vst [vmem:[#allocation145_spill] sm:$0xff] %v5273_v33  ;;  %3560 = verf.f32 %v1556_v8  ;;  %v1278_v1 = vadd.f32 %v5114_v31, %v4421_v7  ;;  %v2039_v16 = vmul.f32 %v5058_v35, %v4453_v20  ;;  %v2043_v5 = vmul.f32 %v5086_v40, %v4469_v24  ;;  %v6563_v35 = vld [vmem:[#allocation73_spill] sm:$0xff] }
 0x22e   :  { %v5282_v6 = vmul.f32 %v1805_v0, %v5169_v61  ;;  %v5284_v45 = vmul.f32 0.5, %v1085_v36  ;;  %v1555_v23 = vmul.f32 0.70710677, %v1085_v36  ;;  %v2041_v63 = vmul.f32 %v5063_v57, %v4457_v21  ;;  %v6564_v40 = vld [vmem:[#allocation133_spill] sm:$0xff]  ;;  %v6565_v0 = vld [vmem:[#allocation72_spill] sm:$0xff]  ;;  %v6566_v36 = vld [vmem:[#allocation70_spill] sm:$0xff] }
 0x22f   :  { %v5288_v30 = vmul.f32 0.5, %v1278_v1  ;;  %v1557_v58 = vmul.f32 0.70710677, %v1278_v1  ;;  %v2163_v8 = vpack.c.bf16 %v2043_v5, %v2039_v16  ;;  %v2045_v31 = vmul.f32 %v5110_v12, %v4473_v25  ;;  %v6567_v1 = vld [vmem:[#allocation74_spill] sm:$0xff]  ;;  %v5300_v25 = vpop.f32.mrb[96].mxu0  ;;  %v5302_v12 = vpop.f32.mrb[96].mxu1 }
 0x230   :  { %v3551_v20 = vpop.eup %3550  ;;  %3562 = verf.f32 %v1555_v23  ;;  %v2038_v24 = vmul.f32 %v5040_v53, %v4445_v18  ;;  %v2042_v61 = vmul.f32 %v6564_v40, %v6563_v35  ;;  %v2040_v33 = vmul.f32 %v6566_v36, %v6565_v0  ;;  %v6568_v16 = vld [vmem:[#allocation134_spill] sm:$0xff]  ;;  %6569 = vst [vmem:[#allocation73_spill] sm:$0xff] %v5300_v25  ;;  %6570 = vst [vmem:[#allocation133_spill] sm:$0xff] %v5302_v12  ;;  %v6571_v35 = vld [vmem:[#allocation136_spill] sm:$0xff] }
 0x231   :  { %v3553_v39 = vpop.eup %3552  ;;  %v1806_v21 = vadd.f32 1.0, %v3551_v20  ;;  %3564 = verf.f32 %v1557_v58  ;;  %2550 = vmatprep.mubr.bf16.mxu0 %v2163_v8  ;;  %v2165_v57 = vpack.c.bf16 %v2045_v31, %v2041_v63  ;;  %v2044_v5 = vmul.f32 %v6568_v16, %v6567_v1  ;;  %v6572_v0 = vld [vmem:[#allocation137_spill] sm:$0xff]  ;;  %v5308_v20 = vpop.f32.mrb[97].mxu0  ;;  %v6575_v1 = vld [vmem:[#allocation138_spill] sm:$0xff]  ;;  %v6589_v12 = vld [vmem:[#allocation143_spill] sm:$0xff] }
 0x232   :  { %v3555_v23 = vpop.eup %3554  ;;  %v1808_v18 = vadd.f32 1.0, %v3553_v39  ;;  %v2162_v53 = vpack.c.bf16 %v2042_v61, %v2038_v24  ;;  %v1089_v40 = vadd.f32 %v6571_v35, %v4403_v2  ;;  %v1282_v36 = vadd.f32 %v6572_v0, %v4405_v9  ;;  %6573 = vst [vmem:[#allocation72_spill] sm:$0xff] %v5308_v20  ;;  %v5310_v58 = vpop.f32.mrb[97].mxu1 }
 0x233   :  { %6574 = vst [vmem:[#allocation70_spill] sm:$0xff] %v5310_v58  ;;  %v5313_v63 = vmul.f32 %v1806_v21, %v5211_v54  ;;  %v1807_v8 = vadd.f32 1.0, %v3555_v23  ;;  %2711 = vmatprep.mubr.bf16.mxu1 %v2165_v57  ;;  %v2164_v31 = vpack.c.bf16 %v2044_v5, %v2040_v33  ;;  %v1091_v39 = vadd.f32 %v6575_v1, %v4419_v11  ;;  %v5317_v24 = vpop.f32.mrb[98].mxu0  ;;  %v5319_v61 = vpop.f32.mrb[98].mxu1 }
 0x234   :  { %6576 = vst [vmem:[#allocation74_spill] sm:$0xff] %v5317_v24  ;;  %6577 = vst [vmem:[#allocation134_spill] sm:$0xff] %v5319_v61  ;;  %v5322_v16 = vmul.f32 %v1808_v18, %v5220_v59  ;;  %2551 = vmatmul.mubr.bf16.gmra.mrb[132].mxu0 %v2162_v53  ;;  %v5324_v35 = vmul.f32 0.5, %v1089_v40  ;;  %v1558_v0 = vmul.f32 0.70710677, %v1089_v40  ;;  %v5326_v58 = vmul.f32 0.5, %v1282_v36 }
 0x235   :  { %v5328_v54 = vpop.f32.mrb[99].mxu0  ;;  %v5330_v21 = vpop.f32.mrb[99].mxu1  ;;  %v5333_v57 = vmul.f32 %v1807_v8, %v5228_v52  ;;  %2712 = vmatmul.mubr.bf16.gmra.mrb[132].mxu1 %v2164_v31  ;;  %v1560_v5 = vmul.f32 0.70710677, %v1282_v36  ;;  %v5335_v23 = vmul.f32 0.5, %v1091_v39  ;;  %v6580_v40 = vld [vmem:[#allocation139_spill] sm:$0xff]  ;;  %v1286_v52 = vadd.f32 %v5154_v46, %v4405_v9 }
 0x236   :  { %6578 = vst [vmem:[#allocation136_spill] sm:$0xff] %v5328_v54  ;;  %6579 = vst [vmem:[#allocation137_spill] sm:$0xff] %v5330_v21  ;;  %v3557_v33 = vpop.eup %3556  ;;  %v1559_v59 = vmul.f32 0.70710677, %v1091_v39  ;;  %3566 = verf.f32 %v1558_v0  ;;  %v1284_v1 = vadd.f32 %v6580_v40, %v4421_v7  ;;  %v6581_v61 = vld [vmem:[#allocation140_spill] sm:$0xff]  ;;  %v6582_v36 = vld [vmem:[#allocation142_spill] sm:$0xff] }
 0x237   :  { %v3559_v18 = vpop.eup %3558  ;;  %v1809_v53 = vadd.f32 1.0, %v3557_v33  ;;  %v1093_v54 = vadd.f32 %v6581_v61, %v4403_v2  ;;  %3568 = verf.f32 %v1560_v5  ;;  %v1095_v8 = vadd.f32 %v6582_v36, %v4419_v11 }
 0x238   :  { %v3561_v24 = vpop.eup %3560  ;;  %v1810_v21 = vadd.f32 1.0, %v3559_v18  ;;  %3570 = verf.f32 %v1559_v59  ;;  %v5348_v0 = vmul.f32 0.5, %v1284_v1  ;;  %v1561_v61 = vmul.f32 0.70710677, %v1284_v1  ;;  %v5355_v18 = vpop.f32.mrb[100].mxu0 }
 0x239   :  { %v5346_v31 = vmul.f32 %v1809_v53, %v5242_v62  ;;  %v1812_v39 = vadd.f32 1.0, %v3561_v24  ;;  %v5353_v40 = vmul.f32 0.5, %v1093_v54  ;;  %v1562_v5 = vmul.f32 0.70710677, %v1093_v54  ;;  %6583 = vst [vmem:[#allocation138_spill] sm:$0xff] %v5355_v18  ;;  %v5364_v59 = vpop.f32.mrb[100].mxu1 }
 0x23a   :  { %v5351_v33 = vmul.f32 %v1810_v21, %v5251_v28  ;;  %v3563_v46 = vpop.eup %3562  ;;  %v5360_v36 = vmul.f32 0.5, %v1286_v52  ;;  %v1564_v62 = vmul.f32 0.70710677, %v1286_v52  ;;  %v5362_v24 = vmul.f32 0.5, %v1095_v8  ;;  %6585 = vst [vmem:[#allocation140_spill] sm:$0xff] %v5364_v59  ;;  %v5366_v53 = vpop.f32.mrb[101].mxu0 }
 0x23b   :  { %v5358_v20 = vmul.f32 %v1812_v39, %v5260_v32  ;;  %6586 = vst [vmem:[#allocation142_spill] sm:$0xff] %v5366_v53  ;;  %v3565_v28 = vpop.eup %3564  ;;  %v1811_v21 = vadd.f32 1.0, %v3563_v46  ;;  %3572 = verf.f32 %v1561_v61  ;;  %v1563_v1 = vmul.f32 0.70710677, %v1095_v8  ;;  %v5370_v18 = vpop.f32.mrb[101].mxu1  ;;  %v6588_v52 = vld [vmem:[#allocation77_spill] sm:$0xff] }
 0x23c   :  { %v1288_v54 = vadd.f32 %v5163_v42, %v4421_v7  ;;  %v5372_v32 = vpop.f32.mrb[102].mxu0  ;;  %v1813_v39 = vadd.f32 1.0, %v3565_v28  ;;  %3574 = verf.f32 %v1562_v5  ;;  %v2047_v25 = vmul.f32 %v6589_v12, %v6588_v52  ;;  %v5378_v53 = vpop.f32.mrb[102].mxu1  ;;  %v6594_v28 = vld [vmem:[#allocation78_spill] sm:$0xff] }
 0x23d   :  { %6584 = vst [vmem:[#allocation139_spill] sm:$0xff] %v5358_v20  ;;  %6587 = vst [vmem:[#allocation146_spill] sm:$0xff] %v5372_v32  ;;  %v6590_v20 = vld [vmem:[#allocation81_spill] sm:$0xff]  ;;  %v5380_v46 = vpop.f32.mrb[103].mxu0  ;;  %v5383_v8 = vmul.f32 %v1811_v21, %v5284_v45  ;;  %3576 = verf.f32 %v1564_v62  ;;  %v5387_v32 = vpop.f32.mrb[103].mxu1  ;;  %v6596_v45 = vld [vmem:[#allocation75_spill] sm:$0xff] }
 0x23e   :  { %v2051_v59 = vmul.f32 %v5197_v26, %v6590_v20  ;;  %6591 = vst [vmem:[#allocation77_spill] sm:$0xff] %v5378_v53  ;;  %6592 = vst [vmem:[#allocation143_spill] sm:$0xff] %v5380_v46  ;;  %v5385_v42 = vmul.f32 0.5, %v1288_v54  ;;  %v1565_v61 = vmul.f32 0.70710677, %v1288_v54  ;;  %v5390_v5 = vmul.f32 %v1813_v39, %v5288_v30  ;;  %v6595_v20 = vld [vmem:[#allocation82_spill] sm:$0xff] }
 0x23f   :  { %6593 = vst [vmem:[#allocation81_spill] sm:$0xff] %v5387_v32  ;;  %3578 = verf.f32 %v1563_v1  ;;  %v2049_v26 = vmul.f32 %v5172_v47, %v6594_v28  ;;  %v2053_v52 = vmul.f32 %v5209_v17, %v6595_v20  ;;  %v6597_v21 = vld [vmem:[#allocation135_spill] sm:$0xff]  ;;  %v6599_v32 = vld [vmem:[#allocation76_spill] sm:$0xff]  ;;  %v6600_v30 = vld [vmem:[#allocation141_spill] sm:$0xff]  ;;  %v1099_v47 = vadd.f32 %v5181_v43, %v4403_v2 }
 0x240   :  { %v2167_v12 = vpack.c.bf16 %v2051_v59, %v2047_v25  ;;  %3580 = verf.f32 %v1565_v61  ;;  %v2046_v62 = vmul.f32 %v6597_v21, %v6596_v45  ;;  %v6598_v46 = vld [vmem:[#allocation79_spill] sm:$0xff]  ;;  %v3567_v53 = vpop.eup %3566  ;;  %v2048_v39 = vmul.f32 %v6600_v30, %v6599_v32  ;;  %v6601_v1 = vld [vmem:[#allocation80_spill] sm:$0xff] }
 0x241   :  { %v2050_v54 = vmul.f32 %v5177_v4, %v6598_v46  ;;  %v2052_v25 = vmul.f32 %v5186_v41, %v6601_v1  ;;  %v1292_v17 = vadd.f32 %v5183_v13, %v4405_v9  ;;  %v3569_v59 = vpop.eup %3568  ;;  %v1814_v61 = vadd.f32 1.0, %v3567_v53  ;;  %v5410_v46 = vpop.f32.mrb[104].mxu0 }
 0x242   :  { %2558 = vmatprep.mubr.bf16.mxu0 %v2167_v12  ;;  %v2169_v28 = vpack.c.bf16 %v2053_v52, %v2049_v26  ;;  %v1101_v4 = vadd.f32 %v5192_v60, %v4419_v11  ;;  %v5412_v12 = vpop.f32.mrb[104].mxu1  ;;  %v3571_v32 = vpop.eup %3570  ;;  %v1816_v45 = vadd.f32 1.0, %v3569_v59  ;;  %v5414_v21 = vmul.f32 0.5, %v1099_v47 }
 0x243   :  { %v2166_v20 = vpack.c.bf16 %v2050_v54, %v2046_v62  ;;  %v2168_v41 = vpack.c.bf16 %v2052_v25, %v2048_v39  ;;  %v1566_v43 = vmul.f32 0.70710677, %v1099_v47  ;;  %v5416_v30 = vpop.f32.mrb[105].mxu0  ;;  %v5418_v13 = vpop.f32.mrb[105].mxu1  ;;  %v5421_v53 = vmul.f32 %v1814_v61, %v5324_v35 }
 0x244   :  { %v1815_v26 = vadd.f32 1.0, %v3571_v32  ;;  %2719 = vmatprep.mubr.bf16.mxu1 %v2169_v28  ;;  %v5423_v60 = vmul.f32 0.5, %v1292_v17  ;;  %v1568_v52 = vmul.f32 0.70710677, %v1292_v17  ;;  %v5425_v62 = vpop.f32.mrb[106].mxu0  ;;  %v5427_v54 = vpop.f32.mrb[106].mxu1  ;;  %v5430_v39 = vmul.f32 %v1816_v45, %v5326_v58 }
 0x245   :  { %2559 = vmatmul.mubr.bf16.gmra.mrb[136].mxu0 %v2166_v20  ;;  %6602 = vst [vmem:[#allocation78_spill] sm:$0xff] %v5427_v54  ;;  %2720 = vmatmul.mubr.bf16.gmra.mrb[136].mxu1 %v2168_v41  ;;  %3582 = verf.f32 %v1566_v43  ;;  %v5432_v1 = vmul.f32 0.5, %v1101_v4  ;;  %v1567_v25 = vmul.f32 0.70710677, %v1101_v4  ;;  %v5434_v35 = vpop.f32.mrb[107].mxu0  ;;  %v5436_v47 = vpop.f32.mrb[107].mxu1  ;;  %v1294_v17 = vadd.f32 %v5194_v49, %v4421_v7 }
 0x246   :  { %6603 = vst [vmem:[#allocation82_spill] sm:$0xff] %v5434_v35  ;;  %6604 = vst [vmem:[#allocation75_spill] sm:$0xff] %v5436_v47  ;;  %v3573_v59 = vpop.eup %3572  ;;  %v5439_v61 = vmul.f32 %v1815_v26, %v5335_v23  ;;  %3584 = verf.f32 %v1568_v52  ;;  %v1103_v58 = vadd.f32 %v5204_v29, %v4403_v2  ;;  %v1296_v4 = vadd.f32 %v5206_v34, %v4405_v9  ;;  %v5461_v35 = vpop.f32.mrb[108].mxu0 }
 0x247   :  { %v3575_v28 = vpop.eup %3574  ;;  %v1817_v20 = vadd.f32 1.0, %v3573_v59  ;;  %3586 = verf.f32 %v1567_v25  ;;  %v1105_v32 = vadd.f32 %v5213_v15, %v4419_v11  ;;  %v5449_v23 = vmul.f32 0.5, %v1294_v17  ;;  %6605 = vst [vmem:[#allocation135_spill] sm:$0xff] %v5461_v35 }
 0x248   :  { %v3577_v45 = vpop.eup %3576  ;;  %v1818_v41 = vadd.f32 1.0, %v3575_v28  ;;  %v1569_v43 = vmul.f32 0.70710677, %v1294_v17  ;;  %v5451_v26 = vmul.f32 0.5, %v1103_v58  ;;  %v1570_v59 = vmul.f32 0.70710677, %v1103_v58 }
 0x249   :  { %v3579_v49 = vpop.eup %3578  ;;  %v5454_v52 = vmul.f32 %v1817_v20, %v5348_v0  ;;  %v1820_v29 = vadd.f32 1.0, %v3577_v45  ;;  %v5456_v25 = vmul.f32 0.5, %v1296_v4  ;;  %v1572_v28 = vmul.f32 0.70710677, %v1296_v4  ;;  %v5463_v17 = vpop.f32.mrb[108].mxu1 }
 0x24a   :  { %v3581_v47 = vpop.eup %3580  ;;  %v5459_v34 = vmul.f32 %v1818_v41, %v5353_v40  ;;  %v1819_v15 = vadd.f32 1.0, %v3579_v49  ;;  %3588 = verf.f32 %v1569_v43  ;;  %6606 = vst [vmem:[#allocation79_spill] sm:$0xff] %v5463_v17  ;;  %v5468_v20 = vmul.f32 0.5, %v1105_v32  ;;  %v5470_v58 = vpop.f32.mrb[109].mxu0  ;;  %v6611_v49 = vld [vmem:[#allocation85_spill] sm:$0xff]  ;;  %v6620_v17 = vld [vmem:[#allocation88_spill] sm:$0xff] }
 0x24b   :  { %v5466_v54 = vmul.f32 %v1820_v29, %v5360_v36  ;;  %v1821_v0 = vadd.f32 1.0, %v3581_v47  ;;  %3590 = verf.f32 %v1570_v59  ;;  %6607 = vst [vmem:[#allocation76_spill] sm:$0xff] %v5470_v58  ;;  %v5472_v45 = vpop.f32.mrb[109].mxu1  ;;  %v1571_v4 = vmul.f32 0.70710677, %v1105_v32  ;;  %v5479_v43 = vpop.f32.mrb[110].mxu0 }
 0x24c   :  { %6608 = vst [vmem:[#allocation141_spill] sm:$0xff] %v5472_v45  ;;  %v5475_v40 = vmul.f32 %v1819_v15, %v5362_v24  ;;  %3592 = verf.f32 %v1572_v28  ;;  %v1298_v41 = vadd.f32 %v5215_v56, %v4421_v7  ;;  %6609 = vst [vmem:[#allocation80_spill] sm:$0xff] %v5479_v43  ;;  %v5481_v36 = vpop.f32.mrb[110].mxu1  ;;  %v2055_v29 = vmul.f32 %v5231_v51, %v6611_v49  ;;  %v6612_v59 = vld [vmem:[#allocation89_spill] sm:$0xff]  ;;  %v6613_v24 = vld [vmem:[#allocation86_spill] sm:$0xff]  ;;  %v5492_v32 = vpop.f32.mrb[111].mxu0 }
 0x24d   :  { %6610 = vst [vmem:[#allocation147_spill] sm:$0xff] %v5481_v36  ;;  %v5484_v47 = vmul.f32 %v1821_v0, %v5385_v42  ;;  %v2059_v45 = vmul.f32 %v5267_v22, %v6612_v59  ;;  %v2057_v15 = vmul.f32 %v5240_v38, %v6613_v24  ;;  %6614 = vst [vmem:[#allocation85_spill] sm:$0xff] %v5492_v32  ;;  %v5494_v28 = vpop.f32.mrb[111].mxu1  ;;  %3594 = verf.f32 %v1571_v4  ;;  %v6616_v43 = vld [vmem:[#allocation90_spill] sm:$0xff]  ;;  %v6617_v51 = vld [vmem:[#allocation83_spill] sm:$0xff] }
 0x24e   :  { %6615 = vst [vmem:[#allocation89_spill] sm:$0xff] %v5494_v28  ;;  %v5496_v56 = vmul.f32 0.5, %v1298_v41  ;;  %v1573_v36 = vmul.f32 0.70710677, %v1298_v41  ;;  %v2061_v42 = vmul.f32 %v5282_v6, %v6616_v43  ;;  %v2054_v49 = vmul.f32 %v5218_v3, %v6617_v51  ;;  %v6618_v22 = vld [vmem:[#allocation87_spill] sm:$0xff]  ;;  %v6619_v38 = vld [vmem:[#allocation84_spill] sm:$0xff] }
 0x24f   :  { %v3583_v0 = vpop.eup %3582  ;;  %v2171_v58 = vpack.c.bf16 %v2059_v45, %v2055_v29  ;;  %v2058_v59 = vmul.f32 %v5249_v19, %v6618_v22  ;;  %v2056_v24 = vmul.f32 %v5223_v37, %v6619_v38  ;;  %v2060_v41 = vmul.f32 %v5258_v50, %v6620_v17  ;;  %v5517_v50 = vpop.f32.mrb[112].mxu0 }
 0x250   :  { %v3585_v32 = vpop.eup %3584  ;;  %v1822_v28 = vadd.f32 1.0, %v3583_v0  ;;  %3596 = verf.f32 %v1573_v36  ;;  %v2173_v4 = vpack.c.bf16 %v2061_v42, %v2057_v15  ;;  %v1109_v3 = vadd.f32 %v5244_v14, %v4403_v2  ;;  %v5519_v17 = vpop.f32.mrb[112].mxu1 }
 0x251   :  { %v3587_v35 = vpop.eup %3586  ;;  %v1824_v6 = vadd.f32 1.0, %v3585_v32  ;;  %2566 = vmatprep.mubr.bf16.mxu0 %v2171_v58  ;;  %v2170_v45 = vpack.c.bf16 %v2058_v59, %v2054_v49  ;;  %v1302_v19 = vadd.f32 %v5246_v48, %v4405_v9  ;;  %v2172_v36 = vpack.c.bf16 %v2060_v41, %v2056_v24 }
 0x252   :  { %v5513_v43 = vmul.f32 %v1822_v28, %v5414_v21  ;;  %v1823_v37 = vadd.f32 1.0, %v3587_v35  ;;  %2727 = vmatprep.mubr.bf16.mxu1 %v2173_v4  ;;  %v1111_v29 = vadd.f32 %v5253_v27, %v4419_v11  ;;  %v5524_v14 = vmul.f32 0.5, %v1109_v3  ;;  %v5528_v21 = vpop.f32.mrb[113].mxu0  ;;  %v5530_v35 = vpop.f32.mrb[113].mxu1 }
 0x253   :  { %v5522_v58 = vmul.f32 %v1824_v6, %v5423_v60  ;;  %2567 = vmatmul.mubr.bf16.gmra.mrb[140].mxu0 %v2170_v45  ;;  %v1574_v48 = vmul.f32 0.70710677, %v1109_v3  ;;  %v5526_v15 = vmul.f32 0.5, %v1302_v19  ;;  %2728 = vmatmul.mubr.bf16.gmra.mrb[140].mxu1 %v2172_v36  ;;  %v1576_v28 = vmul.f32 0.70710677, %v1302_v19  ;;  %v5537_v0 = vpop.f32.mrb[114].mxu0 }
 0x254   :  { %v3589_v32 = vpop.eup %3588  ;;  %v5533_v27 = vmul.f32 %v1823_v37, %v5432_v1  ;;  %v5535_v42 = vmul.f32 0.5, %v1111_v29  ;;  %v1575_v60 = vmul.f32 0.70710677, %v1111_v29  ;;  %v1304_v22 = vadd.f32 %v5255_v44, %v4421_v7  ;;  %v5543_v38 = vpop.f32.mrb[114].mxu1  ;;  %v6622_v6 = vld [vmem:[#allocation144_spill] sm:$0xff] }
 0x255   :  { %v3591_v51 = vpop.eup %3590  ;;  %v1825_v49 = vadd.f32 1.0, %v3589_v32  ;;  %3598 = verf.f32 %v1574_v48  ;;  %v1113_v59 = vadd.f32 %v5262_v10, %v4403_v2  ;;  %v5545_v1 = vpop.f32.mrb[115].mxu0  ;;  %v1306_v41 = vadd.f32 %v5264_v55, %v4405_v9 }
 0x256   :  { %6621 = vst [vmem:[#allocation86_spill] sm:$0xff] %v5545_v1  ;;  %v3593_v24 = vpop.eup %3592  ;;  %v1826_v4 = vadd.f32 1.0, %v3591_v51  ;;  %3600 = verf.f32 %v1576_v28  ;;  %v1115_v45 = vadd.f32 %v6622_v6, %v4419_v11  ;;  %v5551_v3 = vpop.f32.mrb[115].mxu1  ;;  %v5556_v10 = vmul.f32 0.5, %v1304_v22  ;;  %v6624_v6 = vld [vmem:[#allocation145_spill] sm:$0xff] }
 0x257   :  { %6623 = vst [vmem:[#allocation90_spill] sm:$0xff] %v5551_v3  ;;  %v5554_v44 = vmul.f32 %v1825_v49, %v5449_v23  ;;  %v1828_v19 = vadd.f32 1.0, %v3593_v24  ;;  %3602 = verf.f32 %v1575_v60  ;;  %v3595_v37 = vpop.eup %3594  ;;  %v1577_v29 = vmul.f32 0.70710677, %v1304_v22  ;;  %v5574_v22 = vpop.f32.mrb[116].mxu1  ;;  %v6630_v3 = vld [vmem:[#allocation97_spill] sm:$0xff] }
 0x258   :  { %v5559_v36 = vmul.f32 %v1826_v4, %v5451_v26  ;;  %v5561_v48 = vmul.f32 0.5, %v1113_v59  ;;  %v1578_v55 = vmul.f32 0.70710677, %v1113_v59  ;;  %v1827_v28 = vadd.f32 1.0, %v3595_v37  ;;  %v5572_v4 = vpop.f32.mrb[116].mxu0  ;;  %6626 = vst [vmem:[#allocation87_spill] sm:$0xff] %v5574_v22 }
 0x259   :  { %v5564_v32 = vmul.f32 %v1828_v19, %v5456_v25  ;;  %v5566_v51 = vmul.f32 0.5, %v1306_v41  ;;  %v1580_v23 = vmul.f32 0.70710677, %v1306_v41  ;;  %3604 = verf.f32 %v1577_v29  ;;  %6625 = vst [vmem:[#allocation83_spill] sm:$0xff] %v5572_v4  ;;  %v6627_v19 = vld [vmem:[#allocation93_spill] sm:$0xff]  ;;  %v5581_v37 = vpop.f32.mrb[117].mxu0 }
 0x25a   :  { %v3597_v49 = vpop.eup %3596  ;;  %v5568_v60 = vmul.f32 0.5, %v1115_v45  ;;  %v1579_v24 = vmul.f32 0.70710677, %v1115_v45  ;;  %v1308_v26 = vadd.f32 %v6624_v6, %v4421_v7  ;;  %v5577_v59 = vmul.f32 %v1827_v28, %v5468_v20  ;;  %6628 = vst [vmem:[#allocation84_spill] sm:$0xff] %v5581_v37  ;;  %v5583_v29 = vpop.f32.mrb[117].mxu1  ;;  %v6641_v37 = vld [vmem:[#allocation139_spill] sm:$0xff] }
 0x25b   :  { %v1829_v25 = vadd.f32 1.0, %v3597_v49  ;;  %3606 = verf.f32 %v1578_v55  ;;  %v2063_v41 = vmul.f32 %v5333_v57, %v6627_v19  ;;  %6629 = vst [vmem:[#allocation88_spill] sm:$0xff] %v5583_v29  ;;  %v2067_v4 = vmul.f32 %v5383_v8, %v6630_v3  ;;  %v5589_v22 = vpop.f32.mrb[118].mxu0  ;;  %v5591_v20 = vpop.f32.mrb[118].mxu1  ;;  %v6633_v57 = vld [vmem:[#allocation94_spill] sm:$0xff]  ;;  %v6637_v3 = vld [vmem:[#allocation91_spill] sm:$0xff] }
 0x25c   :  { %3608 = verf.f32 %v1580_v23  ;;  %v5585_v45 = vmul.f32 0.5, %v1308_v26  ;;  %v1581_v6 = vmul.f32 0.70710677, %v1308_v26  ;;  %6631 = vst [vmem:[#allocation144_spill] sm:$0xff] %v5589_v22  ;;  %6632 = vst [vmem:[#allocation145_spill] sm:$0xff] %v5591_v20  ;;  %v2065_v28 = vmul.f32 %v5346_v31, %v6633_v57  ;;  %v6634_v49 = vld [vmem:[#allocation98_spill] sm:$0xff] }
 0x25d   :  { %v5594_v55 = vmul.f32 %v1829_v25, %v5496_v56  ;;  %3610 = verf.f32 %v1579_v24  ;;  %v2069_v23 = vmul.f32 %v5390_v5, %v6634_v49  ;;  %v5600_v19 = vpop.f32.mrb[119].mxu0  ;;  %v5602_v26 = vpop.f32.mrb[119].mxu1  ;;  %v2175_v8 = vpack.c.bf16 %v2067_v4, %v2063_v41  ;;  %v6638_v20 = vld [vmem:[#allocation95_spill] sm:$0xff]  ;;  %v6639_v29 = vld [vmem:[#allocation92_spill] sm:$0xff]  ;;  %v6642_v49 = vld [vmem:[#allocation73_spill] sm:$0xff] }
 0x25e   :  { %6635 = vst [vmem:[#allocation93_spill] sm:$0xff] %v5600_v19  ;;  %6636 = vst [vmem:[#allocation97_spill] sm:$0xff] %v5602_v26  ;;  %3612 = verf.f32 %v1581_v6  ;;  %v2062_v22 = vmul.f32 %v5313_v63, %v6637_v3  ;;  %v2066_v56 = vmul.f32 %v5351_v33, %v6638_v20  ;;  %v2064_v31 = vmul.f32 %v5322_v16, %v6639_v29  ;;  %v6640_v57 = vld [vmem:[#allocation96_spill] sm:$0xff]  ;;  %v6643_v63 = vld [vmem:[#allocation133_spill] sm:$0xff] }
 0x25f   :  { %v3599_v25 = vpop.eup %3598  ;;  %v2177_v24 = vpack.c.bf16 %v2069_v23, %v2065_v28  ;;  %v2068_v5 = vmul.f32 %v6641_v37, %v6640_v57  ;;  %v1119_v19 = vadd.f32 %v6642_v49, %v4403_v2  ;;  %2574 = vmatprep.mubr.bf16.mxu0 %v2175_v8  ;;  %v1312_v41 = vadd.f32 %v6643_v63, %v4405_v9  ;;  %v6644_v33 = vld [vmem:[#allocation72_spill] sm:$0xff] }
 0x260   :  { %v3601_v26 = vpop.eup %3600  ;;  %v1830_v6 = vadd.f32 1.0, %v3599_v25  ;;  %v2174_v4 = vpack.c.bf16 %v2066_v56, %v2062_v22  ;;  %v1121_v20 = vadd.f32 %v6644_v33, %v4419_v11  ;;  %v5625_v56 = vpop.f32.mrb[120].mxu0 }
 0x261   :  { %v3603_v28 = vpop.eup %3602  ;;  %v1832_v23 = vadd.f32 1.0, %v3601_v26  ;;  %2735 = vmatprep.mubr.bf16.mxu1 %v2177_v24  ;;  %v2176_v16 = vpack.c.bf16 %v2068_v5, %v2064_v31  ;;  %v5618_v29 = vmul.f32 0.5, %v1119_v19  ;;  %v1582_v37 = vmul.f32 0.70710677, %v1119_v19  ;;  %6645 = vst [vmem:[#allocation94_spill] sm:$0xff] %v5625_v56  ;;  %v5627_v25 = vpop.f32.mrb[120].mxu1 }
 0x262   :  { %v5621_v3 = vmul.f32 %v1830_v6, %v5524_v14  ;;  %v1831_v57 = vadd.f32 1.0, %v3603_v28  ;;  %2575 = vmatmul.mubr.bf16.gmra.mrb[144].mxu0 %v2174_v4  ;;  %v5623_v8 = vmul.f32 0.5, %v1312_v41  ;;  %v1584_v22 = vmul.f32 0.70710677, %v1312_v41  ;;  %6646 = vst [vmem:[#allocation98_spill] sm:$0xff] %v5627_v25  ;;  %v5634_v24 = vpop.f32.mrb[121].mxu0 }
 0x263   :  { %v5630_v49 = vmul.f32 %v1832_v23, %v5526_v15  ;;  %2736 = vmatmul.mubr.bf16.gmra.mrb[144].mxu1 %v2176_v16  ;;  %3614 = verf.f32 %v1582_v37  ;;  %v5632_v26 = vmul.f32 0.5, %v1121_v20  ;;  %v1583_v19 = vmul.f32 0.70710677, %v1121_v20  ;;  %6647 = vst [vmem:[#allocation91_spill] sm:$0xff] %v5634_v24  ;;  %v5636_v14 = vpop.f32.mrb[121].mxu1  ;;  %v3605_v31 = vpop.eup %3604  ;;  %v6649_v6 = vld [vmem:[#allocation70_spill] sm:$0xff] }
 0x264   :  { %6648 = vst [vmem:[#allocation95_spill] sm:$0xff] %v5636_v14  ;;  %v5639_v5 = vmul.f32 %v1831_v57, %v5535_v42  ;;  %3616 = verf.f32 %v1584_v22  ;;  %v1314_v4 = vadd.f32 %v6649_v6, %v4421_v7  ;;  %v6650_v15 = vld [vmem:[#allocation74_spill] sm:$0xff]  ;;  %v5645_v41 = vpop.f32.mrb[122].mxu0  ;;  %v5647_v33 = vpop.f32.mrb[122].mxu1  ;;  %v1833_v28 = vadd.f32 1.0, %v3605_v31  ;;  %v6654_v42 = vld [vmem:[#allocation136_spill] sm:$0xff] }
 0x265   :  { %v1123_v63 = vadd.f32 %v6650_v15, %v4403_v2  ;;  %6651 = vst [vmem:[#allocation92_spill] sm:$0xff] %v5645_v41  ;;  %6652 = vst [vmem:[#allocation96_spill] sm:$0xff] %v5647_v33  ;;  %v3607_v20 = vpop.eup %3606  ;;  %3618 = verf.f32 %v1583_v19  ;;  %v6653_v23 = vld [vmem:[#allocation134_spill] sm:$0xff]  ;;  %v1125_v37 = vadd.f32 %v6654_v42, %v4419_v11  ;;  %v5653_v57 = vpop.f32.mrb[123].mxu0 }
 0x266   :  { %v1316_v16 = vadd.f32 %v6653_v23, %v4405_v9  ;;  %6655 = vst [vmem:[#allocation139_spill] sm:$0xff] %v5653_v57  ;;  %v5655_v22 = vpop.f32.mrb[123].mxu1  ;;  %v3609_v6 = vpop.eup %3608  ;;  %v1834_v14 = vadd.f32 1.0, %v3607_v20  ;;  %v5657_v15 = vmul.f32 0.5, %v1314_v4  ;;  %v1585_v41 = vmul.f32 0.70710677, %v1314_v4 }
 0x267   :  { %6656 = vst [vmem:[#allocation73_spill] sm:$0xff] %v5655_v22  ;;  %v5659_v24 = vmul.f32 0.5, %v1123_v63  ;;  %v3611_v33 = vpop.eup %3610  ;;  %v5662_v19 = vmul.f32 %v1833_v28, %v5556_v10  ;;  %v1836_v31 = vadd.f32 1.0, %v3609_v6  ;;  %v1586_v23 = vmul.f32 0.70710677, %v1123_v63  ;;  %v6657_v28 = vld [vmem:[#allocation137_spill] sm:$0xff] }
 0x268   :  { %v5664_v25 = vmul.f32 0.5, %v1316_v16  ;;  %v3613_v42 = vpop.eup %3612  ;;  %v5667_v57 = vmul.f32 %v1834_v14, %v5561_v48  ;;  %v1835_v22 = vadd.f32 1.0, %v3611_v33  ;;  %3620 = verf.f32 %v1585_v41  ;;  %v5679_v48 = vpop.f32.mrb[124].mxu0 }
 0x269   :  { %v1588_v20 = vmul.f32 0.70710677, %v1316_v16  ;;  %v5670_v56 = vmul.f32 %v1836_v31, %v5566_v51  ;;  %v1837_v4 = vadd.f32 1.0, %v3613_v42  ;;  %3622 = verf.f32 %v1586_v23  ;;  %6658 = vst [vmem:[#allocation133_spill] sm:$0xff] %v5679_v48  ;;  %v5681_v14 = vpop.f32.mrb[124].mxu1  ;;  %v6660_v51 = vld [vmem:[#allocation101_spill] sm:$0xff] }
 0x26a   :  { %v5672_v1 = vmul.f32 0.5, %v1125_v37  ;;  %v5675_v10 = vmul.f32 %v1835_v22, %v5568_v60  ;;  %v1587_v63 = vmul.f32 0.70710677, %v1125_v37  ;;  %v1318_v6 = vadd.f32 %v6657_v28, %v4421_v7  ;;  %6659 = vst [vmem:[#allocation72_spill] sm:$0xff] %v5681_v14  ;;  %v6661_v16 = vld [vmem:[#allocation17_spill] sm:$0xff]  ;;  %v6662_v60 = vld [vmem:[#allocation102_spill] sm:$0xff] }
 0x26b   :  { %3624 = verf.f32 %v1588_v20  ;;  %v5684_v41 = vmul.f32 %v1837_v4, %v5585_v45  ;;  %v2071_v33 = vmul.f32 %v5439_v61, %v6660_v51  ;;  %v2075_v31 = vmul.f32 %v5475_v40, %v6661_v16  ;;  %v5692_v37 = vpop.f32.mrb[125].mxu0  ;;  %v5694_v23 = vpop.f32.mrb[125].mxu1  ;;  %v6665_v28 = vld [vmem:[#allocation18_spill] sm:$0xff]  ;;  %v6668_v16 = vld [vmem:[#allocation99_spill] sm:$0xff] }
 0x26c   :  { %v2073_v22 = vmul.f32 %v5454_v52, %v6662_v60  ;;  %6663 = vst [vmem:[#allocation70_spill] sm:$0xff] %v5692_v37  ;;  %6664 = vst [vmem:[#allocation74_spill] sm:$0xff] %v5694_v23  ;;  %3626 = verf.f32 %v1587_v63  ;;  %v5696_v42 = vmul.f32 0.5, %v1318_v6  ;;  %v1589_v20 = vmul.f32 0.70710677, %v1318_v6  ;;  %v5700_v4 = vpop.f32.mrb[126].mxu0 }
 0x26d   :  { %v2077_v45 = vmul.f32 %v5484_v47, %v6665_v28  ;;  %6666 = vst [vmem:[#allocation134_spill] sm:$0xff] %v5700_v4  ;;  %v5702_v61 = vpop.f32.mrb[126].mxu1  ;;  %v3615_v51 = vpop.eup %3614  ;;  %v2179_v40 = vpack.c.bf16 %v2075_v31, %v2071_v33  ;;  %v2070_v52 = vmul.f32 %v5421_v53, %v6668_v16  ;;  %v6669_v60 = vld [vmem:[#allocation103_spill] sm:$0xff]  ;;  %v6670_v23 = vld [vmem:[#allocation100_spill] sm:$0xff] }
 0x26e   :  { %6667 = vst [vmem:[#allocation136_spill] sm:$0xff] %v5702_v61  ;;  %v2074_v37 = vmul.f32 %v5459_v34, %v6669_v60  ;;  %v2072_v63 = vmul.f32 %v5430_v39, %v6670_v23  ;;  %v5710_v14 = vpop.f32.mrb[127].mxu0  ;;  %v5712_v6 = vpop.f32.mrb[127].mxu1  ;;  %v1838_v28 = vadd.f32 1.0, %v3615_v51  ;;  %3628 = verf.f32 %v1589_v20  ;;  %v6672_v61 = vld [vmem:[#allocation104_spill] sm:$0xff]  ;;  %v6673_v34 = vld [vmem:[#allocation138_spill] sm:$0xff] }
 0x26f   :  { %6671 = vst [vmem:[#allocation137_spill] sm:$0xff] %v5712_v6  ;;  %v3617_v47 = vpop.eup %3616  ;;  %v2181_v4 = vpack.c.bf16 %v2077_v45, %v2073_v22  ;;  %v2076_v33 = vmul.f32 %v5466_v54, %v6672_v61  ;;  %2582 = vmatprep.mubr.bf16.mxu0 %v2179_v40  ;;  %v1129_v16 = vadd.f32 %v6673_v34, %v4403_v2  ;;  %v6674_v39 = vld [vmem:[#allocation140_spill] sm:$0xff]  ;;  %v6675_v22 = vld [vmem:[#allocation142_spill] sm:$0xff]  ;;  %v6678_v34 = vld [vmem:[#allocation143_spill] sm:$0xff] }
 0x270   :  { %v3619_v31 = vpop.eup %3618  ;;  %v1840_v48 = vadd.f32 1.0, %v3617_v47  ;;  %v2178_v53 = vpack.c.bf16 %v2074_v37, %v2070_v52  ;;  %v1322_v23 = vadd.f32 %v6674_v39, %v4405_v9  ;;  %v5721_v60 = vmul.f32 %v1838_v28, %v5618_v29 }
 0x271   :  { %v1839_v6 = vadd.f32 1.0, %v3619_v31  ;;  %2743 = vmatprep.mubr.bf16.mxu1 %v2181_v4  ;;  %v2180_v20 = vpack.c.bf16 %v2076_v33, %v2072_v63  ;;  %v1131_v45 = vadd.f32 %v6675_v22, %v4419_v11  ;;  %v5728_v37 = vmul.f32 0.5, %v1129_v16 }
 0x272   :  { %v5726_v54 = vmul.f32 %v1840_v48, %v5623_v8  ;;  %2583 = vmatmul.mubr.bf16.gmra.mrb[148].mxu0 %v2178_v53  ;;  %v1590_v61 = vmul.f32 0.70710677, %v1129_v16  ;;  %v5730_v51 = vmul.f32 0.5, %v1322_v23  ;;  %v3621_v40 = vpop.eup %3620  ;;  %v1592_v29 = vmul.f32 0.70710677, %v1322_v23  ;;  %v6676_v48 = vld [vmem:[#allocation146_spill] sm:$0xff] }
 0x273   :  { %v5733_v52 = vmul.f32 %v1839_v6, %v5632_v26  ;;  %2744 = vmatmul.mubr.bf16.gmra.mrb[148].mxu1 %v2180_v20  ;;  %v5735_v4 = vmul.f32 0.5, %v1131_v45  ;;  %v1591_v63 = vmul.f32 0.70710677, %v1131_v45  ;;  %v3623_v47 = vpop.eup %3622  ;;  %v1841_v28 = vadd.f32 1.0, %v3621_v40  ;;  %v6677_v26 = vld [vmem:[#allocation77_spill] sm:$0xff] }
 0x274   :  { %3630 = verf.f32 %v1590_v61  ;;  %v1324_v8 = vadd.f32 %v5370_v18, %v4421_v7  ;;  %v1133_v33 = vadd.f32 %v6676_v48, %v4403_v2  ;;  %v1842_v53 = vadd.f32 1.0, %v3623_v47 }
 0x275   :  { %v3625_v31 = vpop.eup %3624  ;;  %3632 = verf.f32 %v1592_v29  ;;  %v1326_v6 = vadd.f32 %v6677_v26, %v4405_v9  ;;  %v1135_v16 = vadd.f32 %v6678_v34, %v4419_v11  ;;  %v5746_v39 = vmul.f32 %v1841_v28, %v5657_v15  ;;  %v6679_v26 = vld [vmem:[#allocation81_spill] sm:$0xff] }
 0x276   :  { %v1844_v23 = vadd.f32 1.0, %v3625_v31  ;;  %3634 = verf.f32 %v1591_v63  ;;  %v5748_v20 = vmul.f32 0.5, %v1324_v8  ;;  %v3627_v18 = vpop.eup %3626  ;;  %v5751_v22 = vmul.f32 %v1842_v53, %v5659_v24 }
 0x277   :  { %v1593_v45 = vmul.f32 0.70710677, %v1324_v8  ;;  %v5753_v61 = vmul.f32 0.5, %v1133_v33  ;;  %v1594_v40 = vmul.f32 0.70710677, %v1133_v33  ;;  %v1843_v47 = vadd.f32 1.0, %v3627_v18 }
 0x278   :  { %v5756_v29 = vmul.f32 %v1844_v23, %v5664_v25  ;;  %v5758_v48 = vmul.f32 0.5, %v1326_v6  ;;  %v1596_v15 = vmul.f32 0.70710677, %v1326_v6  ;;  %v3629_v28 = vpop.eup %3628  ;;  %v5760_v63 = vmul.f32 0.5, %v1135_v16  ;;  %v6680_v33 = vld [vmem:[#allocation21_spill] sm:$0xff] }
 0x279   :  { %3636 = verf.f32 %v1593_v45  ;;  %v1595_v31 = vmul.f32 0.70710677, %v1135_v16  ;;  %v1328_v24 = vadd.f32 %v6679_v26, %v4421_v7  ;;  %v5765_v8 = vmul.f32 %v1843_v47, %v5672_v1  ;;  %v6681_v23 = vld [vmem:[#allocation25_spill] sm:$0xff]  ;;  %v6682_v45 = vld [vmem:[#allocation22_spill] sm:$0xff]  ;;  %v6685_v26 = vld [vmem:[#allocation23_spill] sm:$0xff] }
 0x27a   :  { %v1845_v53 = vadd.f32 1.0, %v3629_v28  ;;  %3638 = verf.f32 %v1594_v40  ;;  %v2079_v25 = vmul.f32 %v5533_v27, %v6680_v33  ;;  %v2083_v18 = vmul.f32 %v5577_v59, %v6681_v23  ;;  %v6683_v47 = vld [vmem:[#allocation26_spill] sm:$0xff]  ;;  %v6684_v27 = vld [vmem:[#allocation19_spill] sm:$0xff]  ;;  %v6686_v23 = vld [vmem:[#allocation20_spill] sm:$0xff] }
 0x27b   :  { %3640 = verf.f32 %v1596_v15  ;;  %v5769_v34 = vmul.f32 0.5, %v1328_v24  ;;  %v1597_v6 = vmul.f32 0.70710677, %v1328_v24  ;;  %v2081_v1 = vmul.f32 %v5554_v44, %v6682_v45 }
 0x27c   :  { %v5774_v16 = vmul.f32 %v1845_v53, %v5696_v42  ;;  %3642 = verf.f32 %v1595_v31  ;;  %v2085_v40 = vmul.f32 %v5594_v55, %v6683_v47  ;;  %v2183_v28 = vpack.c.bf16 %v2083_v18, %v2079_v25  ;;  %v6687_v31 = vld [vmem:[#allocation24_spill] sm:$0xff] }
 0x27d   :  { %3644 = verf.f32 %v1597_v6  ;;  %v2078_v15 = vmul.f32 %v5513_v43, %v6684_v27  ;;  %v2082_v24 = vmul.f32 %v5559_v36, %v6685_v26  ;;  %v2080_v42 = vmul.f32 %v5522_v58, %v6686_v23 }
 0x27e   :  { %v3631_v33 = vpop.eup %3630  ;;  %v2185_v59 = vpack.c.bf16 %v2085_v40, %v2081_v1  ;;  %v2084_v53 = vmul.f32 %v5564_v32, %v6687_v31  ;;  %v1139_v44 = vadd.f32 %v5410_v46, %v4403_v2  ;;  %2590 = vmatprep.mubr.bf16.mxu0 %v2183_v28  ;;  %v1332_v43 = vadd.f32 %v5412_v12, %v4405_v9 }
 0x27f   :  { %v3633_v55 = vpop.eup %3632  ;;  %v1846_v6 = vadd.f32 1.0, %v3631_v33  ;;  %v2182_v25 = vpack.c.bf16 %v2082_v24, %v2078_v15  ;;  %v1141_v36 = vadd.f32 %v5416_v30, %v4419_v11  ;;  %v1143_v24 = vadd.f32 %v5425_v62, %v4403_v2 }
 0x280   :  { %v3635_v18 = vpop.eup %3634  ;;  %v1848_v45 = vadd.f32 1.0, %v3633_v55  ;;  %2751 = vmatprep.mubr.bf16.mxu1 %v2185_v59  ;;  %v2184_v58 = vpack.c.bf16 %v2084_v53, %v2080_v42  ;;  %v5794_v1 = vmul.f32 0.5, %v1139_v44  ;;  %v1598_v32 = vmul.f32 0.70710677, %v1139_v44  ;;  %v6689_v42 = vld [vmem:[#allocation82_spill] sm:$0xff] }
 0x281   :  { %v5797_v47 = vmul.f32 %v1846_v6, %v5728_v37  ;;  %v1847_v46 = vadd.f32 1.0, %v3635_v18  ;;  %2591 = vmatmul.mubr.bf16.gmra.mrb[152].mxu0 %v2182_v25  ;;  %v5799_v40 = vmul.f32 0.5, %v1332_v43  ;;  %v1600_v28 = vmul.f32 0.70710677, %v1332_v43 }
 0x282   :  { %v5802_v12 = vmul.f32 %v1848_v45, %v5730_v51  ;;  %2752 = vmatmul.mubr.bf16.gmra.mrb[152].mxu1 %v2184_v58  ;;  %3646 = verf.f32 %v1598_v32  ;;  %v5804_v30 = vmul.f32 0.5, %v1141_v36  ;;  %v1599_v27 = vmul.f32 0.70710677, %v1141_v36  ;;  %v6688_v51 = vld [vmem:[#allocation78_spill] sm:$0xff] }
 0x283   :  { %v3637_v15 = vpop.eup %3636  ;;  %v5807_v26 = vmul.f32 %v1847_v46, %v5735_v4  ;;  %3648 = verf.f32 %v1600_v28  ;;  %v1334_v37 = vadd.f32 %v5418_v13, %v4421_v7  ;;  %v1336_v23 = vadd.f32 %v6688_v51, %v4405_v9 }
 0x284   :  { %v3639_v33 = vpop.eup %3638  ;;  %v1849_v59 = vadd.f32 1.0, %v3637_v15  ;;  %3650 = verf.f32 %v1599_v27  ;;  %v1145_v31 = vadd.f32 %v6689_v42, %v4419_v11  ;;  %v5819_v6 = vmul.f32 0.5, %v1143_v24 }
 0x285   :  { %v3641_v53 = vpop.eup %3640  ;;  %v1850_v44 = vadd.f32 1.0, %v3639_v33  ;;  %v5817_v4 = vmul.f32 0.5, %v1334_v37  ;;  %v1601_v55 = vmul.f32 0.70710677, %v1334_v37  ;;  %v1602_v43 = vmul.f32 0.70710677, %v1143_v24 }
 0x286   :  { %v3643_v13 = vpop.eup %3642  ;;  %v5822_v25 = vmul.f32 %v1849_v59, %v5748_v20  ;;  %v1852_v62 = vadd.f32 1.0, %v3641_v53  ;;  %v5824_v36 = vmul.f32 0.5, %v1336_v23  ;;  %v1604_v32 = vmul.f32 0.70710677, %v1336_v23  ;;  %v6690_v37 = vld [vmem:[#allocation75_spill] sm:$0xff]  ;;  %v6691_v33 = vld [vmem:[#allocation29_spill] sm:$0xff] }
 0x287   :  { %v3645_v18 = vpop.eup %3644  ;;  %v5827_v45 = vmul.f32 %v1850_v44, %v5753_v61  ;;  %v1851_v58 = vadd.f32 1.0, %v3643_v13  ;;  %3652 = verf.f32 %v1601_v55  ;;  %v5832_v27 = vmul.f32 0.5, %v1145_v31  ;;  %v6693_v23 = vld [vmem:[#allocation30_spill] sm:$0xff] }
 0x288   :  { %v5830_v46 = vmul.f32 %v1852_v62, %v5758_v48  ;;  %v1853_v28 = vadd.f32 1.0, %v3645_v18  ;;  %3654 = verf.f32 %v1602_v43  ;;  %v1603_v15 = vmul.f32 0.70710677, %v1145_v31  ;;  %v6692_v48 = vld [vmem:[#allocation33_spill] sm:$0xff]  ;;  %v6694_v31 = vld [vmem:[#allocation34_spill] sm:$0xff]  ;;  %v6696_v43 = vld [vmem:[#allocation31_spill] sm:$0xff] }
 0x289   :  { %v5835_v20 = vmul.f32 %v1851_v58, %v5760_v63  ;;  %3656 = verf.f32 %v1604_v32  ;;  %v1338_v24 = vadd.f32 %v6690_v37, %v4421_v7  ;;  %v2087_v59 = vmul.f32 %v5639_v5, %v6691_v33  ;;  %v6697_v18 = vld [vmem:[#allocation28_spill] sm:$0xff]  ;;  %v6699_v33 = vld [vmem:[#allocation135_spill] sm:$0xff] }
 0x28a   :  { %v5840_v61 = vmul.f32 %v1853_v28, %v5769_v34  ;;  %v2091_v51 = vmul.f32 %v5675_v10, %v6692_v48  ;;  %v2089_v42 = vmul.f32 %v5662_v19, %v6693_v23  ;;  %3658 = verf.f32 %v1603_v15  ;;  %v6695_v34 = vld [vmem:[#allocation27_spill] sm:$0xff]  ;;  %v6698_v28 = vld [vmem:[#allocation32_spill] sm:$0xff] }
 0x28b   :  { %v5848_v63 = vmul.f32 0.5, %v1338_v24  ;;  %v1605_v53 = vmul.f32 0.70710677, %v1338_v24  ;;  %v2093_v44 = vmul.f32 %v5684_v41, %v6694_v31  ;;  %v2086_v62 = vmul.f32 %v5621_v3, %v6695_v34  ;;  %v6701_v23 = vld [vmem:[#allocation76_spill] sm:$0xff] }
 0x28c   :  { %v3647_v55 = vpop.eup %3646  ;;  %v2187_v13 = vpack.c.bf16 %v2091_v51, %v2087_v59  ;;  %v2090_v5 = vmul.f32 %v5667_v57, %v6696_v43  ;;  %v2088_v10 = vmul.f32 %v5630_v49, %v6697_v18  ;;  %v2092_v15 = vmul.f32 %v5670_v56, %v6698_v28  ;;  %v6700_v59 = vld [vmem:[#allocation79_spill] sm:$0xff] }
 0x28d   :  { %v3649_v58 = vpop.eup %3648  ;;  %v1854_v19 = vadd.f32 1.0, %v3647_v55  ;;  %3660 = verf.f32 %v1605_v53  ;;  %v2189_v32 = vpack.c.bf16 %v2093_v44, %v2089_v42  ;;  %v1149_v3 = vadd.f32 %v6699_v33, %v4403_v2 }
 0x28e   :  { %v3651_v37 = vpop.eup %3650  ;;  %v1856_v41 = vadd.f32 1.0, %v3649_v58  ;;  %2598 = vmatprep.mubr.bf16.mxu0 %v2187_v13  ;;  %v2186_v24 = vpack.c.bf16 %v2090_v5, %v2086_v62  ;;  %v1342_v57 = vadd.f32 %v6700_v59, %v4405_v9  ;;  %v2188_v51 = vpack.c.bf16 %v2092_v15, %v2088_v10  ;;  %v6703_v10 = vld [vmem:[#allocation80_spill] sm:$0xff]  ;;  %v6705_v15 = vld [vmem:[#allocation85_spill] sm:$0xff] }
 0x28f   :  { %v5865_v48 = vmul.f32 %v1854_v19, %v5794_v1  ;;  %v1855_v49 = vadd.f32 1.0, %v3651_v37  ;;  %2759 = vmatprep.mubr.bf16.mxu1 %v2189_v32  ;;  %v1151_v42 = vadd.f32 %v6701_v23, %v4419_v11  ;;  %v5872_v53 = vmul.f32 0.5, %v1149_v3 }
 0x290   :  { %v5870_v56 = vmul.f32 %v1856_v41, %v5799_v40  ;;  %2599 = vmatmul.mubr.bf16.gmra.mrb[156].mxu0 %v2186_v24  ;;  %v1606_v31 = vmul.f32 0.70710677, %v1149_v3  ;;  %v5874_v44 = vmul.f32 0.5, %v1342_v57  ;;  %2760 = vmatmul.mubr.bf16.gmra.mrb[156].mxu1 %v2188_v51  ;;  %v1608_v1 = vmul.f32 0.70710677, %v1342_v57  ;;  %v6702_v40 = vld [vmem:[#allocation141_spill] sm:$0xff] }
 0x291   :  { %v3653_v55 = vpop.eup %3652  ;;  %v5877_v13 = vmul.f32 %v1855_v49, %v5804_v30  ;;  %v5879_v34 = vmul.f32 0.5, %v1151_v42  ;;  %v1607_v62 = vmul.f32 0.70710677, %v1151_v42  ;;  %v1344_v18 = vadd.f32 %v6702_v40, %v4421_v7  ;;  %v6704_v30 = vld [vmem:[#allocation147_spill] sm:$0xff] }
 0x292   :  { %v3655_v43 = vpop.eup %3654  ;;  %v1857_v5 = vadd.f32 1.0, %v3653_v55  ;;  %3662 = verf.f32 %v1606_v31  ;;  %v1153_v58 = vadd.f32 %v6703_v10, %v4403_v2  ;;  %v1346_v28 = vadd.f32 %v6704_v30, %v4405_v9 }
 0x293   :  { %v3657_v19 = vpop.eup %3656  ;;  %v1858_v32 = vadd.f32 1.0, %v3655_v43  ;;  %3664 = verf.f32 %v1608_v1  ;;  %v1155_v37 = vadd.f32 %v6705_v15, %v4419_v11  ;;  %v5892_v33 = vmul.f32 0.5, %v1344_v18  ;;  %v6706_v43 = vld [vmem:[#allocation89_spill] sm:$0xff]  ;;  %v6710_v15 = vld [vmem:[#allocation42_spill] sm:$0xff] }
 0x294   :  { %v5890_v41 = vmul.f32 %v1857_v5, %v5817_v4  ;;  %v1860_v24 = vadd.f32 1.0, %v3657_v19  ;;  %3666 = verf.f32 %v1607_v62  ;;  %v3659_v3 = vpop.eup %3658  ;;  %v1609_v57 = vmul.f32 0.70710677, %v1344_v18  ;;  %v6707_v18 = vld [vmem:[#allocation37_spill] sm:$0xff] }
 0x295   :  { %v5895_v59 = vmul.f32 %v1858_v32, %v5819_v6  ;;  %v5897_v49 = vmul.f32 0.5, %v1153_v58  ;;  %v1610_v51 = vmul.f32 0.70710677, %v1153_v58  ;;  %v1859_v42 = vadd.f32 1.0, %v3659_v3  ;;  %v6708_v19 = vld [vmem:[#allocation41_spill] sm:$0xff] }
 0x296   :  { %v5900_v23 = vmul.f32 %v1860_v24, %v5824_v36  ;;  %v5902_v31 = vmul.f32 0.5, %v1346_v28  ;;  %v1612_v4 = vmul.f32 0.70710677, %v1346_v28  ;;  %3668 = verf.f32 %v1609_v57  ;;  %v6709_v28 = vld [vmem:[#allocation38_spill] sm:$0xff]  ;;  %v6712_v57 = vld [vmem:[#allocation39_spill] sm:$0xff] }
 0x297   :  { %v3661_v55 = vpop.eup %3660  ;;  %v5904_v1 = vmul.f32 0.5, %v1155_v37  ;;  %v1611_v62 = vmul.f32 0.70710677, %v1155_v37  ;;  %v1348_v6 = vadd.f32 %v6706_v43, %v4421_v7  ;;  %v5909_v5 = vmul.f32 %v1859_v42, %v5832_v27 }
 0x298   :  { %v1861_v40 = vadd.f32 1.0, %v3661_v55  ;;  %3670 = verf.f32 %v1610_v51  ;;  %v2095_v36 = vmul.f32 %v5733_v52, %v6707_v18  ;;  %v2099_v32 = vmul.f32 %v5765_v8, %v6708_v19  ;;  %v6711_v52 = vld [vmem:[#allocation35_spill] sm:$0xff]  ;;  %v6714_v55 = vld [vmem:[#allocation40_spill] sm:$0xff] }
 0x299   :  { %3672 = verf.f32 %v1612_v4  ;;  %v5913_v10 = vmul.f32 0.5, %v1348_v6  ;;  %v1613_v58 = vmul.f32 0.70710677, %v1348_v6  ;;  %v2097_v27 = vmul.f32 %v5746_v39, %v6709_v28  ;;  %v6713_v4 = vld [vmem:[#allocation36_spill] sm:$0xff] }
 0x29a   :  { %v5918_v30 = vmul.f32 %v1861_v40, %v5848_v63  ;;  %3674 = verf.f32 %v1611_v62  ;;  %v2101_v37 = vmul.f32 %v5774_v16, %v6710_v15  ;;  %v2191_v24 = vpack.c.bf16 %v2099_v32, %v2095_v36 }
 0x29b   :  { %3676 = verf.f32 %v1613_v58  ;;  %v2094_v3 = vmul.f32 %v5721_v60, %v6711_v52  ;;  %v2098_v51 = vmul.f32 %v5751_v22, %v6712_v57  ;;  %v2096_v63 = vmul.f32 %v5726_v54, %v6713_v4 }
 0x29c   :  { %v3663_v42 = vpop.eup %3662  ;;  %v2193_v8 = vpack.c.bf16 %v2101_v37, %v2097_v27  ;;  %v2100_v62 = vmul.f32 %v5756_v29, %v6714_v55  ;;  %v1159_v39 = vadd.f32 %v5517_v50, %v4403_v2  ;;  %2606 = vmatprep.mubr.bf16.mxu0 %v2191_v24  ;;  %v1352_v60 = vadd.f32 %v5519_v17, %v4405_v9 }
 0x29d   :  { %v3665_v16 = vpop.eup %3664  ;;  %v1862_v43 = vadd.f32 1.0, %v3663_v42  ;;  %v2190_v6 = vpack.c.bf16 %v2098_v51, %v2094_v3  ;;  %v1161_v22 = vadd.f32 %v5528_v21, %v4419_v11  ;;  %v1163_v37 = vadd.f32 %v5537_v0, %v4403_v2  ;;  %v6715_v3 = vld [vmem:[#allocation86_spill] sm:$0xff] }
 0x29e   :  { %v3667_v40 = vpop.eup %3666  ;;  %v1864_v18 = vadd.f32 1.0, %v3665_v16  ;;  %2767 = vmatprep.mubr.bf16.mxu1 %v2193_v8  ;;  %v2192_v54 = vpack.c.bf16 %v2100_v62, %v2096_v63  ;;  %v5938_v36 = vmul.f32 0.5, %v1159_v39  ;;  %v1614_v29 = vmul.f32 0.70710677, %v1159_v39 }
 0x29f   :  { %v5941_v58 = vmul.f32 %v1862_v43, %v5872_v53  ;;  %v1863_v50 = vadd.f32 1.0, %v3667_v40  ;;  %2607 = vmatmul.mubr.bf16.gmra.mrb[160].mxu0 %v2190_v6  ;;  %v5943_v19 = vmul.f32 0.5, %v1352_v60  ;;  %v1616_v32 = vmul.f32 0.70710677, %v1352_v60 }
 0x2a0   :  { %v5946_v17 = vmul.f32 %v1864_v18, %v5874_v44  ;;  %2768 = vmatmul.mubr.bf16.gmra.mrb[160].mxu1 %v2192_v54  ;;  %3678 = verf.f32 %v1614_v29  ;;  %v5948_v21 = vmul.f32 0.5, %v1161_v22  ;;  %v1615_v28 = vmul.f32 0.70710677, %v1161_v22  ;;  %v3669_v27 = vpop.eup %3668  ;;  %v6716_v18 = vld [vmem:[#allocation90_spill] sm:$0xff]  ;;  %v6717_v29 = vld [vmem:[#allocation45_spill] sm:$0xff] }
 0x2a1   :  { %v5951_v15 = vmul.f32 %v1863_v50, %v5879_v34  ;;  %3680 = verf.f32 %v1616_v32  ;;  %v1354_v53 = vadd.f32 %v5530_v35, %v4421_v7  ;;  %v1865_v52 = vadd.f32 1.0, %v3669_v27 }
 0x2a2   :  { %v3671_v24 = vpop.eup %3670  ;;  %3682 = verf.f32 %v1615_v28  ;;  %v1356_v44 = vadd.f32 %v5543_v38, %v4405_v9  ;;  %v1165_v57 = vadd.f32 %v6715_v3, %v4419_v11  ;;  %v5963_v4 = vmul.f32 0.5, %v1163_v37  ;;  %v6719_v28 = vld [vmem:[#allocation46_spill] sm:$0xff] }
 0x2a3   :  { %v3673_v51 = vpop.eup %3672  ;;  %v1866_v42 = vadd.f32 1.0, %v3671_v24  ;;  %v5961_v34 = vmul.f32 0.5, %v1354_v53  ;;  %v1617_v8 = vmul.f32 0.70710677, %v1354_v53  ;;  %v5966_v63 = vmul.f32 %v1865_v52, %v5892_v33 }
 0x2a4   :  { %v3675_v35 = vpop.eup %3674  ;;  %v1868_v0 = vadd.f32 1.0, %v3673_v51  ;;  %v1618_v55 = vmul.f32 0.70710677, %v1163_v37  ;;  %v5968_v62 = vmul.f32 0.5, %v1356_v44  ;;  %v1620_v43 = vmul.f32 0.70710677, %v1356_v44 }
 0x2a5   :  { %v3677_v39 = vpop.eup %3676  ;;  %v5971_v38 = vmul.f32 %v1866_v42, %v5897_v49  ;;  %v1867_v16 = vadd.f32 1.0, %v3675_v35  ;;  %3684 = verf.f32 %v1617_v8  ;;  %v5976_v22 = vmul.f32 0.5, %v1165_v57  ;;  %v6720_v37 = vld [vmem:[#allocation50_spill] sm:$0xff]  ;;  %v6723_v51 = vld [vmem:[#allocation44_spill] sm:$0xff] }
 0x2a6   :  { %v5974_v6 = vmul.f32 %v1868_v0, %v5902_v31  ;;  %v1869_v60 = vadd.f32 1.0, %v3677_v39  ;;  %3686 = verf.f32 %v1618_v55  ;;  %v1619_v40 = vmul.f32 0.70710677, %v1165_v57  ;;  %v6718_v31 = vld [vmem:[#allocation49_spill] sm:$0xff]  ;;  %v6722_v57 = vld [vmem:[#allocation47_spill] sm:$0xff]  ;;  %v6724_v35 = vld [vmem:[#allocation48_spill] sm:$0xff] }
 0x2a7   :  { %v5979_v33 = vmul.f32 %v1867_v16, %v5904_v1  ;;  %3688 = verf.f32 %v1620_v43  ;;  %v1358_v54 = vadd.f32 %v6716_v18, %v4421_v7  ;;  %v2103_v50 = vmul.f32 %v5807_v26, %v6717_v29  ;;  %v6725_v16 = vld [vmem:[#allocation83_spill] sm:$0xff]  ;;  %v6727_v18 = vld [vmem:[#allocation84_spill] sm:$0xff] }
 0x2a8   :  { %v5984_v49 = vmul.f32 %v1869_v60, %v5913_v10  ;;  %v2107_v32 = vmul.f32 %v5835_v20, %v6718_v31  ;;  %v2105_v27 = vmul.f32 %v5822_v25, %v6719_v28  ;;  %3690 = verf.f32 %v1619_v40  ;;  %v6721_v10 = vld [vmem:[#allocation43_spill] sm:$0xff] }
 0x2a9   :  { %v5992_v1 = vmul.f32 0.5, %v1358_v54  ;;  %v1621_v53 = vmul.f32 0.70710677, %v1358_v54  ;;  %v2109_v24 = vmul.f32 %v5840_v61, %v6720_v37  ;;  %v2102_v3 = vmul.f32 %v5797_v47, %v6721_v10  ;;  %v6726_v43 = vld [vmem:[#allocation87_spill] sm:$0xff] }
 0x2aa   :  { %v3679_v52 = vpop.eup %3678  ;;  %v2195_v44 = vpack.c.bf16 %v2107_v32, %v2103_v50  ;;  %v2106_v26 = vmul.f32 %v5827_v45, %v6722_v57  ;;  %v2104_v20 = vmul.f32 %v5802_v12, %v6723_v51  ;;  %v2108_v0 = vmul.f32 %v5830_v46, %v6724_v35  ;;  %v6731_v51 = vld [vmem:[#allocation93_spill] sm:$0xff] }
 0x2ab   :  { %v3681_v42 = vpop.eup %3680  ;;  %v1870_v25 = vadd.f32 1.0, %v3679_v52  ;;  %3692 = verf.f32 %v1621_v53  ;;  %v2197_v8 = vpack.c.bf16 %v2109_v24, %v2105_v27  ;;  %v1169_v47 = vadd.f32 %v6725_v16, %v4403_v2 }
 0x2ac   :  { %v3683_v55 = vpop.eup %3682  ;;  %v1872_v61 = vadd.f32 1.0, %v3681_v42  ;;  %2614 = vmatprep.mubr.bf16.mxu0 %v2195_v44  ;;  %v2194_v39 = vpack.c.bf16 %v2106_v26, %v2102_v3  ;;  %v1362_v45 = vadd.f32 %v6726_v43, %v4405_v9  ;;  %v2196_v40 = vpack.c.bf16 %v2108_v0, %v2104_v20  ;;  %v6729_v44 = vld [vmem:[#allocation144_spill] sm:$0xff] }
 0x2ad   :  { %v6009_v60 = vmul.f32 %v1870_v25, %v5938_v36  ;;  %v1871_v12 = vadd.f32 1.0, %v3683_v55  ;;  %2775 = vmatprep.mubr.bf16.mxu1 %v2197_v8  ;;  %v1171_v54 = vadd.f32 %v6727_v18, %v4419_v11  ;;  %v6016_v29 = vmul.f32 0.5, %v1169_v47  ;;  %v6732_v18 = vld [vmem:[#allocation97_spill] sm:$0xff] }
 0x2ae   :  { %v6014_v46 = vmul.f32 %v1872_v61, %v5943_v19  ;;  %2615 = vmatmul.mubr.bf16.gmra.mrb[164].mxu0 %v2194_v39  ;;  %v1622_v50 = vmul.f32 0.70710677, %v1169_v47  ;;  %v6018_v31 = vmul.f32 0.5, %v1362_v45  ;;  %2776 = vmatmul.mubr.bf16.gmra.mrb[164].mxu1 %v2196_v40  ;;  %v1624_v36 = vmul.f32 0.70710677, %v1362_v45  ;;  %v6728_v19 = vld [vmem:[#allocation88_spill] sm:$0xff] }
 0x2af   :  { %v3685_v32 = vpop.eup %3684  ;;  %v6021_v28 = vmul.f32 %v1871_v12, %v5948_v21  ;;  %v6023_v27 = vmul.f32 0.5, %v1171_v54  ;;  %v1623_v53 = vmul.f32 0.70710677, %v1171_v54  ;;  %v1364_v52 = vadd.f32 %v6728_v19, %v4421_v7  ;;  %v6730_v21 = vld [vmem:[#allocation145_spill] sm:$0xff] }
 0x2b0   :  { %v3687_v37 = vpop.eup %3686  ;;  %v1873_v24 = vadd.f32 1.0, %v3685_v32  ;;  %3694 = verf.f32 %v1622_v50  ;;  %v1173_v10 = vadd.f32 %v6729_v44, %v4403_v2  ;;  %v1366_v26 = vadd.f32 %v6730_v21, %v4405_v9  ;;  %v6733_v32 = vld [vmem:[#allocation53_spill] sm:$0xff]  ;;  %v6736_v44 = vld [vmem:[#allocation58_spill] sm:$0xff]  ;;  %v6738_v21 = vld [vmem:[#allocation55_spill] sm:$0xff] }
 0x2b1   :  { %v3689_v3 = vpop.eup %3688  ;;  %v1874_v57 = vadd.f32 1.0, %v3687_v37  ;;  %3696 = verf.f32 %v1624_v36  ;;  %v1175_v20 = vadd.f32 %v6731_v51, %v4419_v11  ;;  %v6036_v8 = vmul.f32 0.5, %v1364_v52  ;;  %v6734_v37 = vld [vmem:[#allocation57_spill] sm:$0xff] }
 0x2b2   :  { %v6034_v42 = vmul.f32 %v1873_v24, %v5961_v34  ;;  %v1876_v25 = vadd.f32 1.0, %v3689_v3  ;;  %3698 = verf.f32 %v1623_v53  ;;  %v3691_v35 = vpop.eup %3690  ;;  %v1625_v55 = vmul.f32 0.70710677, %v1364_v52  ;;  %v6735_v52 = vld [vmem:[#allocation54_spill] sm:$0xff] }
 0x2b3   :  { %v6039_v0 = vmul.f32 %v1874_v57, %v5963_v4  ;;  %v6041_v61 = vmul.f32 0.5, %v1173_v10  ;;  %v1626_v39 = vmul.f32 0.70710677, %v1173_v10  ;;  %v1875_v47 = vadd.f32 1.0, %v3691_v35 }
 0x2b4   :  { %v6044_v16 = vmul.f32 %v1876_v25, %v5968_v62  ;;  %v6046_v43 = vmul.f32 0.5, %v1366_v26  ;;  %v1628_v34 = vmul.f32 0.70710677, %v1366_v26  ;;  %3700 = verf.f32 %v1625_v55  ;;  %v6740_v25 = vld [vmem:[#allocation56_spill] sm:$0xff] }
 0x2b5   :  { %v3693_v45 = vpop.eup %3692  ;;  %v6048_v12 = vmul.f32 0.5, %v1175_v20  ;;  %v1627_v40 = vmul.f32 0.70710677, %v1175_v20  ;;  %v1368_v4 = vadd.f32 %v6732_v18, %v4421_v7  ;;  %v6053_v54 = vmul.f32 %v1875_v47, %v5976_v22  ;;  %v6739_v20 = vld [vmem:[#allocation52_spill] sm:$0xff] }
 0x2b6   :  { %v1877_v50 = vadd.f32 1.0, %v3693_v45  ;;  %3702 = verf.f32 %v1626_v39  ;;  %v2111_v62 = vmul.f32 %v5877_v13, %v6733_v32  ;;  %v2115_v24 = vmul.f32 %v5909_v5, %v6734_v37  ;;  %v6737_v13 = vld [vmem:[#allocation51_spill] sm:$0xff] }
 0x2b7   :  { %3704 = verf.f32 %v1628_v34  ;;  %v6057_v36 = vmul.f32 0.5, %v1368_v4  ;;  %v1629_v53 = vmul.f32 0.70710677, %v1368_v4  ;;  %v2113_v22 = vmul.f32 %v5890_v41, %v6735_v52  ;;  %v6741_v41 = vld [vmem:[#allocation94_spill] sm:$0xff] }
 0x2b8   :  { %v6062_v19 = vmul.f32 %v1877_v50, %v5992_v1  ;;  %3706 = verf.f32 %v1627_v40  ;;  %v2117_v10 = vmul.f32 %v5918_v30, %v6736_v44  ;;  %v2199_v3 = vpack.c.bf16 %v2115_v24, %v2111_v62 }
 0x2b9   :  { %3708 = verf.f32 %v1629_v53  ;;  %v2110_v57 = vmul.f32 %v5865_v48, %v6737_v13  ;;  %v2114_v26 = vmul.f32 %v5895_v59, %v6738_v21  ;;  %v2112_v1 = vmul.f32 %v5870_v56, %v6739_v20  ;;  %v6742_v48 = vld [vmem:[#allocation98_spill] sm:$0xff]  ;;  %v6743_v59 = vld [vmem:[#allocation91_spill] sm:$0xff] }
 0x2ba   :  { %v3695_v51 = vpop.eup %3694  ;;  %v2201_v5 = vpack.c.bf16 %v2117_v10, %v2113_v22  ;;  %v2116_v35 = vmul.f32 %v5900_v23, %v6740_v25  ;;  %v1179_v55 = vadd.f32 %v6741_v41, %v4403_v2  ;;  %2622 = vmatprep.mubr.bf16.mxu0 %v2199_v3  ;;  %v1372_v34 = vadd.f32 %v6742_v48, %v4405_v9  ;;  %v6745_v3 = vld [vmem:[#allocation92_spill] sm:$0xff] }
 0x2bb   :  { %v3697_v30 = vpop.eup %3696  ;;  %v1878_v39 = vadd.f32 1.0, %v3695_v51  ;;  %v2198_v47 = vpack.c.bf16 %v2114_v26, %v2110_v57  ;;  %v1181_v45 = vadd.f32 %v6743_v59, %v4419_v11  ;;  %v1183_v13 = vadd.f32 %v6745_v3, %v4403_v2  ;;  %v6747_v51 = vld [vmem:[#allocation139_spill] sm:$0xff] }
 0x2bc   :  { %v3699_v40 = vpop.eup %3698  ;;  %v1880_v18 = vadd.f32 1.0, %v3697_v30  ;;  %2783 = vmatprep.mubr.bf16.mxu1 %v2201_v5  ;;  %v2200_v56 = vpack.c.bf16 %v2116_v35, %v2112_v1  ;;  %v6082_v4 = vmul.f32 0.5, %v1179_v55  ;;  %v1630_v23 = vmul.f32 0.70710677, %v1179_v55 }
 0x2bd   :  { %v6085_v50 = vmul.f32 %v1878_v39, %v6016_v29  ;;  %v1879_v32 = vadd.f32 1.0, %v3699_v40  ;;  %2623 = vmatmul.mubr.bf16.gmra.mrb[168].mxu0 %v2198_v47  ;;  %v6087_v62 = vmul.f32 0.5, %v1372_v34  ;;  %v1632_v53 = vmul.f32 0.70710677, %v1372_v34  ;;  %v6744_v29 = vld [vmem:[#allocation95_spill] sm:$0xff] }
 0x2be   :  { %v6090_v37 = vmul.f32 %v1880_v18, %v6018_v31  ;;  %2784 = vmatmul.mubr.bf16.gmra.mrb[168].mxu1 %v2200_v56  ;;  %3710 = verf.f32 %v1630_v23  ;;  %v6092_v24 = vmul.f32 0.5, %v1181_v45  ;;  %v1631_v52 = vmul.f32 0.70710677, %v1181_v45  ;;  %v3701_v22 = vpop.eup %3700  ;;  %v6746_v31 = vld [vmem:[#allocation96_spill] sm:$0xff] }
 0x2bf   :  { %v6095_v44 = vmul.f32 %v1879_v32, %v6023_v27  ;;  %3712 = verf.f32 %v1632_v53  ;;  %v1374_v10 = vadd.f32 %v6744_v29, %v4421_v7  ;;  %v1881_v21 = vadd.f32 1.0, %v3701_v22  ;;  %v6748_v32 = vld [vmem:[#allocation73_spill] sm:$0xff] }
 0x2c0   :  { %v3703_v57 = vpop.eup %3702  ;;  %3714 = verf.f32 %v1631_v52  ;;  %v1376_v26 = vadd.f32 %v6746_v31, %v4405_v9  ;;  %v1185_v5 = vadd.f32 %v6747_v51, %v4419_v11  ;;  %v6107_v35 = vmul.f32 0.5, %v1183_v13  ;;  %v6749_v52 = vld [vmem:[#allocation61_spill] sm:$0xff] }
 0x2c1   :  { %v3705_v20 = vpop.eup %3704  ;;  %v1882_v1 = vadd.f32 1.0, %v3703_v57  ;;  %v6105_v27 = vmul.f32 0.5, %v1374_v10  ;;  %v1633_v25 = vmul.f32 0.70710677, %v1374_v10  ;;  %v6110_v55 = vmul.f32 %v1881_v21, %v6036_v8  ;;  %v6751_v10 = vld [vmem:[#allocation62_spill] sm:$0xff] }
 0x2c2   :  { %v3707_v41 = vpop.eup %3706  ;;  %v1884_v30 = vadd.f32 1.0, %v3705_v20  ;;  %v1634_v39 = vmul.f32 0.70710677, %v1183_v13  ;;  %v6112_v47 = vmul.f32 0.5, %v1376_v26  ;;  %v1636_v45 = vmul.f32 0.70710677, %v1376_v26 }
 0x2c3   :  { %v3709_v48 = vpop.eup %3708  ;;  %v6115_v34 = vmul.f32 %v1882_v1, %v6041_v61  ;;  %v1883_v59 = vadd.f32 1.0, %v3707_v41  ;;  %3716 = verf.f32 %v1633_v25  ;;  %v6120_v56 = vmul.f32 0.5, %v1185_v5  ;;  %v6752_v57 = vld [vmem:[#allocation66_spill] sm:$0xff]  ;;  %v6755_v20 = vld [vmem:[#allocation60_spill] sm:$0xff] }
 0x2c4   :  { %v6118_v40 = vmul.f32 %v1884_v30, %v6046_v43  ;;  %v1885_v18 = vadd.f32 1.0, %v3709_v48  ;;  %3718 = verf.f32 %v1634_v39  ;;  %v1635_v23 = vmul.f32 0.70710677, %v1185_v5  ;;  %v6750_v43 = vld [vmem:[#allocation65_spill] sm:$0xff]  ;;  %v6754_v5 = vld [vmem:[#allocation63_spill] sm:$0xff]  ;;  %v6756_v41 = vld [vmem:[#allocation64_spill] sm:$0xff] }
 0x2c5   :  { %v6123_v8 = vmul.f32 %v1883_v59, %v6048_v12  ;;  %3720 = verf.f32 %v1636_v45  ;;  %v1378_v53 = vadd.f32 %v6748_v32, %v4421_v7  ;;  %v2119_v22 = vmul.f32 %v5951_v15, %v6749_v52  ;;  %v6757_v59 = vld [vmem:[#allocation133_spill] sm:$0xff]  ;;  %v6758_v45 = vld [vmem:[#allocation72_spill] sm:$0xff]  ;;  %v6759_v32 = vld [vmem:[#allocation70_spill] sm:$0xff] }
 0x2c6   :  { %v6128_v61 = vmul.f32 %v1885_v18, %v6057_v36  ;;  %v2123_v29 = vmul.f32 %v5979_v33, %v6750_v43  ;;  %v2121_v3 = vmul.f32 %v5966_v63, %v6751_v10  ;;  %3722 = verf.f32 %v1635_v23  ;;  %v6753_v36 = vld [vmem:[#allocation59_spill] sm:$0xff] }
 0x2c7   :  { %v6136_v12 = vmul.f32 0.5, %v1378_v53  ;;  %v1637_v13 = vmul.f32 0.70710677, %v1378_v53  ;;  %v2125_v21 = vmul.f32 %v5984_v49, %v6752_v57  ;;  %v2118_v51 = vmul.f32 %v5941_v58, %v6753_v36 }
 0x2c8   :  { %v3711_v31 = vpop.eup %3710  ;;  %v2203_v26 = vpack.c.bf16 %v2123_v29, %v2119_v22  ;;  %v2122_v15 = vmul.f32 %v5971_v38, %v6754_v5  ;;  %v2120_v33 = vmul.f32 %v5946_v17, %v6755_v20  ;;  %v2124_v30 = vmul.f32 %v5974_v6, %v6756_v41 }
 0x2c9   :  { %v3713_v1 = vpop.eup %3712  ;;  %v1886_v63 = vadd.f32 1.0, %v3711_v31  ;;  %3724 = verf.f32 %v1637_v13  ;;  %v2205_v25 = vpack.c.bf16 %v2125_v21, %v2121_v3  ;;  %v1189_v58 = vadd.f32 %v6757_v59, %v4403_v2 }
 0x2ca   :  { %v3715_v39 = vpop.eup %3714  ;;  %v1888_v49 = vadd.f32 1.0, %v3713_v1  ;;  %2630 = vmatprep.mubr.bf16.mxu0 %v2203_v26  ;;  %v2202_v48 = vpack.c.bf16 %v2122_v15, %v2118_v51  ;;  %v1382_v38 = vadd.f32 %v6758_v45, %v4405_v9  ;;  %v2204_v23 = vpack.c.bf16 %v2124_v30, %v2120_v33  ;;  %v6761_v26 = vld [vmem:[#allocation134_spill] sm:$0xff] }
 0x2cb   :  { %v6153_v18 = vmul.f32 %v1886_v63, %v6082_v4  ;;  %v1887_v17 = vadd.f32 1.0, %v3715_v39  ;;  %2791 = vmatprep.mubr.bf16.mxu1 %v2205_v25  ;;  %v1191_v53 = vadd.f32 %v6759_v32, %v4419_v11  ;;  %v6160_v52 = vmul.f32 0.5, %v1189_v58 }
 0x2cc   :  { %v6158_v6 = vmul.f32 %v1888_v49, %v6087_v62  ;;  %2631 = vmatmul.mubr.bf16.gmra.mrb[172].mxu0 %v2202_v48  ;;  %v1638_v22 = vmul.f32 0.70710677, %v1189_v58  ;;  %v6162_v43 = vmul.f32 0.5, %v1382_v38  ;;  %2792 = vmatmul.mubr.bf16.gmra.mrb[172].mxu1 %v2204_v23  ;;  %v1640_v4 = vmul.f32 0.70710677, %v1382_v38  ;;  %v6760_v62 = vld [vmem:[#allocation74_spill] sm:$0xff] }
 0x2cd   :  { %v3717_v29 = vpop.eup %3716  ;;  %v6165_v10 = vmul.f32 %v1887_v17, %v6092_v24  ;;  %v6167_v3 = vmul.f32 0.5, %v1191_v53  ;;  %v1639_v13 = vmul.f32 0.70710677, %v1191_v53  ;;  %v1384_v31 = vadd.f32 %v6760_v62, %v4421_v7  ;;  %v6762_v24 = vld [vmem:[#allocation136_spill] sm:$0xff]  ;;  %v6763_v58 = vld [vmem:[#allocation137_spill] sm:$0xff]  ;;  %v6765_v53 = vld [vmem:[#allocation107_spill] sm:$0xff] }
 0x2ce   :  { %v3719_v57 = vpop.eup %3718  ;;  %v1889_v21 = vadd.f32 1.0, %v3717_v29  ;;  %3726 = verf.f32 %v1638_v22  ;;  %v1193_v36 = vadd.f32 %v6761_v26, %v4403_v2  ;;  %v1386_v15 = vadd.f32 %v6762_v24, %v4405_v9  ;;  %v6764_v17 = vld [vmem:[#allocation68_spill] sm:$0xff]  ;;  %v6769_v62 = vld [vmem:[#allocation71_spill] sm:$0xff] }
 0x2cf   :  { %v3721_v51 = vpop.eup %3720  ;;  %v1890_v5 = vadd.f32 1.0, %v3719_v57  ;;  %3728 = verf.f32 %v1640_v4  ;;  %v1195_v20 = vadd.f32 %v5710_v14, %v4419_v11  ;;  %v6180_v63 = vmul.f32 0.5, %v1384_v31  ;;  %v6766_v4 = vld [vmem:[#allocation69_spill] sm:$0xff] }
 0x2d0   :  { %v6178_v33 = vmul.f32 %v1889_v21, %v6105_v27  ;;  %v1892_v1 = vadd.f32 1.0, %v3721_v51  ;;  %3730 = verf.f32 %v1639_v13  ;;  %v3723_v25 = vpop.eup %3722  ;;  %v1641_v2 = vmul.f32 0.70710677, %v1384_v31  ;;  %v6767_v13 = vld [vmem:[#allocation108_spill] sm:$0xff]  ;;  %v6768_v21 = vld [vmem:[#allocation67_spill] sm:$0xff]  ;;  %v6771_v51 = vld [vmem:[#allocation106_spill] sm:$0xff] }
 0x2d1   :  { %v6183_v41 = vmul.f32 %v1890_v5, %v6107_v35  ;;  %v6185_v30 = vmul.f32 0.5, %v1193_v36  ;;  %v1642_v39 = vmul.f32 0.70710677, %v1193_v36  ;;  %v1891_v49 = vadd.f32 1.0, %v3723_v25  ;;  %v6774_v25 = vld [vmem:[#allocation112_spill] sm:$0xff] }
 0x2d2   :  { %v6188_v9 = vmul.f32 %v1892_v1, %v6112_v47  ;;  %v6190_v11 = vmul.f32 0.5, %v1386_v15  ;;  %v1644_v14 = vmul.f32 0.70710677, %v1386_v15  ;;  %3732 = verf.f32 %v1641_v2  ;;  %v6773_v1 = vld [vmem:[#allocation115_spill] sm:$0xff] }
 0x2d3   :  { %v3725_v27 = vpop.eup %3724  ;;  %v6192_v48 = vmul.f32 0.5, %v1195_v20  ;;  %v1643_v59 = vmul.f32 0.70710677, %v1195_v20  ;;  %v1388_v35 = vadd.f32 %v6763_v58, %v4421_v7  ;;  %v2019_v45 = vmul.f32 %v1891_v49, %v6120_v56  ;;  %v6775_v49 = vld [vmem:[#allocation116_spill] sm:$0xff] }
 0x2d4   :  { %v1893_v38 = vadd.f32 1.0, %v3725_v27  ;;  %3734 = verf.f32 %v1642_v39  ;;  %v2127_v47 = vmul.f32 %v6021_v28, %v6764_v17  ;;  %v2131_v22 = vmul.f32 %v6053_v54, %v6765_v53  ;;  %v6770_v54 = vld [vmem:[#allocation105_spill] sm:$0xff]  ;;  %v6778_v17 = vld [vmem:[#allocation110_spill] sm:$0xff] }
 0x2d5   :  { %3736 = verf.f32 %v1644_v14  ;;  %v6199_v23 = vmul.f32 0.5, %v1388_v35  ;;  %v1645_v32 = vmul.f32 0.70710677, %v1388_v35  ;;  %v2129_v7 = vmul.f32 %v6034_v42, %v6766_v4  ;;  %v6772_v42 = vld [vmem:[#allocation111_spill] sm:$0xff]  ;;  %v6776_v14 = vld [vmem:[#allocation109_spill] sm:$0xff] }
 0x2d6   :  { %v2021_v29 = vmul.f32 %v1893_v38, %v6136_v12  ;;  %3738 = verf.f32 %v1643_v59  ;;  %v2133_v56 = vmul.f32 %v6062_v19, %v6767_v13  ;;  %v2207_v57 = vpack.c.bf16 %v2131_v22, %v2127_v47  ;;  %v6777_v35 = vld [vmem:[#allocation113_spill] sm:$0xff]  ;;  %v6780_v22 = vld [vmem:[#allocation119_spill] sm:$0xff] }
 0x2d7   :  { %3740 = verf.f32 %v1645_v32  ;;  %v2126_v28 = vmul.f32 %v6009_v60, %v6768_v21  ;;  %v2130_v31 = vmul.f32 %v6039_v0, %v6769_v62  ;;  %v2128_v12 = vmul.f32 %v6014_v46, %v6770_v54  ;;  %v6779_v32 = vld [vmem:[#allocation114_spill] sm:$0xff]  ;;  %v6783_v21 = vld [vmem:[#allocation124_spill] sm:$0xff] }
 0x2d8   :  { %v3727_v26 = vpop.eup %3726  ;;  %v2209_v36 = vpack.c.bf16 %v2133_v56, %v2129_v7  ;;  %v2132_v5 = vmul.f32 %v6044_v16, %v6771_v51  ;;  %v2135_v24 = vmul.f32 %v6095_v44, %v6772_v42  ;;  %2638 = vmatprep.mubr.bf16.mxu0 %v2207_v57  ;;  %v2139_v60 = vmul.f32 %v6123_v8, %v6773_v1  ;;  %v6781_v7 = vld [vmem:[#allocation123_spill] sm:$0xff]  ;;  %v6782_v57 = vld [vmem:[#allocation120_spill] sm:$0xff] }
 0x2d9   :  { %v3729_v19 = vpop.eup %3728  ;;  %v1894_v15 = vadd.f32 1.0, %v3727_v26  ;;  %v2206_v20 = vpack.c.bf16 %v2130_v31, %v2126_v28  ;;  %v2137_v0 = vmul.f32 %v6110_v55, %v6774_v25  ;;  %v2141_v16 = vmul.f32 %v6128_v61, %v6775_v49  ;;  %v6789_v25 = vld [vmem:[#allocation128_spill] sm:$0xff] }
 0x2da   :  { %v3731_v2 = vpop.eup %3730  ;;  %v1896_v39 = vadd.f32 1.0, %v3729_v19  ;;  %2799 = vmatprep.mubr.bf16.mxu1 %v2209_v36  ;;  %v2208_v46 = vpack.c.bf16 %v2132_v5, %v2128_v12  ;;  %v2134_v44 = vmul.f32 %v6085_v50, %v6776_v14  ;;  %v2211_v58 = vpack.c.bf16 %v2139_v60, %v2135_v24  ;;  %v6785_v36 = vld [vmem:[#allocation121_spill] sm:$0xff]  ;;  %v6786_v5 = vld [vmem:[#allocation118_spill] sm:$0xff] }
 0x2db   :  { %v2022_v27 = vmul.f32 %v1894_v15, %v6160_v52  ;;  %v1895_v59 = vadd.f32 1.0, %v3731_v2  ;;  %2639 = vmatmul.mubr.bf16.gmra.mrb[176].mxu0 %v2206_v20  ;;  %v2138_v8 = vmul.f32 %v6115_v34, %v6777_v35  ;;  %v2213_v38 = vpack.c.bf16 %v2141_v16, %v2137_v0  ;;  %v6787_v15 = vld [vmem:[#allocation122_spill] sm:$0xff]  ;;  %v6795_v35 = vld [vmem:[#allocation132_spill] sm:$0xff] }
 0x2dc   :  { %v2024_v55 = vmul.f32 %v1896_v39, %v6162_v43  ;;  %2800 = vmatmul.mubr.bf16.gmra.mrb[176].mxu1 %v2208_v46  ;;  %v2136_v47 = vmul.f32 %v6090_v37, %v6778_v17  ;;  %v2140_v61 = vmul.f32 %v6118_v40, %v6779_v32  ;;  %v3733_v53 = vpop.eup %3732  ;;  %2646 = vmatprep.mubr.bf16.mxu0 %v2211_v58  ;;  %v6791_v46 = vld [vmem:[#allocation129_spill] sm:$0xff] }
 0x2dd   :  { %v2023_v50 = vmul.f32 %v1895_v59, %v6167_v3  ;;  %v2210_v52 = vpack.c.bf16 %v2138_v8, %v2134_v44  ;;  %v2143_v4 = vmul.f32 %v6165_v10, %v6780_v22  ;;  %v2147_v34 = vmul.f32 %v2019_v45, %v6781_v7  ;;  %2807 = vmatprep.mubr.bf16.mxu1 %v2213_v38  ;;  %v6784_v3 = vld [vmem:[#allocation117_spill] sm:$0xff]  ;;  %v6794_v44 = vld [vmem:[#allocation131_spill] sm:$0xff] }
 0x2de   :  { %v3735_v13 = vpop.eup %3734  ;;  %v1897_v43 = vadd.f32 1.0, %v3733_v53  ;;  %v2212_v56 = vpack.c.bf16 %v2140_v61, %v2136_v47  ;;  %v2145_v37 = vmul.f32 %v6178_v33, %v6782_v57  ;;  %v2149_v28 = vmul.f32 %v2021_v29, %v6783_v21 }
 0x2df   :  { %v3737_v40 = vpop.eup %3736  ;;  %v1898_v62 = vadd.f32 1.0, %v3735_v13  ;;  %v2215_v31 = vpack.c.bf16 %v2147_v34, %v2143_v4  ;;  %v2142_v26 = vmul.f32 %v6153_v18, %v6784_v3  ;;  %v2146_v10 = vmul.f32 %v6183_v41, %v6785_v36  ;;  %v6788_v41 = vld [vmem:[#allocation127_spill] sm:$0xff]  ;;  %v6265_v4 = vld [vmem:[%s6320_s6] ss:$0 sm:$0xff]  ;;  %s3901_s6 = smov [#allocation12]  }
 0x2e0   :  { %v3739_v54 = vpop.eup %3738  ;;  %v2025_v45 = vmul.f32 %v1897_v43, %v6180_v63  ;;  %v1900_v12 = vadd.f32 1.0, %v3737_v40  ;;  %v2217_v51 = vpack.c.bf16 %v2149_v28, %v2145_v37  ;;  %v2144_v42 = vmul.f32 %v6158_v6, %v6786_v5  ;;  %v6790_v6 = vld [vmem:[#allocation125_spill] sm:$0xff]  ;;  %s3007_s29 = sshll.u32 %s3901_s6, 4  ;;  %s3008_s29 = int_to_ptr.vmem [resolvable:$true] %s3007_s29 }
 0x2e1   :  { %v3741_v33 = vpop.eup %3740  ;;  %v2026_v29 = vmul.f32 %v1898_v62, %v6185_v30  ;;  %v1899_v24 = vadd.f32 1.0, %v3739_v54  ;;  %v2214_v19 = vpack.c.bf16 %v2146_v10, %v2142_v26  ;;  %v2148_v20 = vmul.f32 %v6188_v9, %v6787_v15  ;;  %v6792_v9 = vld [vmem:[#allocation126_spill] sm:$0xff]  ;;  %s3858_s30 = scalar_lea.vmem %s3008_s29, 4096  ;;  %p3863_p9 = scmp.lt.s32.totalorder %s3008_s29, %s3008_s29 }
 0x2e2   :  { %v2028_v18 = vmul.f32 %v1900_v12, %v6190_v11  ;;  %v1901_v1 = vadd.f32 1.0, %v3741_v33  ;;  %v2151_v60 = vmul.f32 %v2023_v50, %v6788_v41  ;;  %v2153_v63 = vmul.f32 %v2025_v45, %v6789_v25  ;;  %v6793_v11 = vld [vmem:[#allocation130_spill] sm:$0xff]  ;;  %p3859_p8 = scmp.ne.s32.totalorder %s3008_s29, %s3858_s30  ;;  %p3864_p10 = scmp.lt.s32.totalorder %s3858_s30, %s3858_s30 }
 0x2e3   :  { %v2027_v0 = vmul.f32 %v1899_v24, %v6192_v48  ;;  %2647 = vmatmul.mubr.bf16.gmra.mrb[180].mxu0 %v2210_v52  ;;  %v2216_v2 = vpack.c.bf16 %v2148_v20, %v2144_v42  ;;  %v2150_v39 = vmul.f32 %v2022_v27, %v6790_v6  ;;  %v2154_v30 = vmul.f32 %v2026_v29, %v6791_v46 }
 0x2e4   :  { %v2029_v49 = vmul.f32 %v1901_v1, %v6199_v23  ;;  %2808 = vmatmul.mubr.bf16.gmra.mrb[180].mxu1 %v2212_v56  ;;  %2654 = vmatprep.mubr.bf16.mxu0 %v2215_v31  ;;  %v2152_v16 = vmul.f32 %v2024_v55, %v6792_v9  ;;  %v2156_v14 = vmul.f32 %v2028_v18, %v6793_v11  ;;  %p3865_p11 = por %p3864_p10, %p3863_p9 }
 0x2e5   :  { %2815 = vmatprep.mubr.bf16.mxu1 %v2217_v51  ;;  %v2155_v59 = vmul.f32 %v2027_v0, %v6794_v44  ;;  %v2218_v58 = vpack.c.bf16 %v2154_v30, %v2150_v39 }
 0x2e6   :  { %v2157_v48 = vmul.f32 %v2029_v49, %v6795_v35  ;;  %v2220_v8 = vpack.c.bf16 %v2156_v14, %v2152_v16  ;;  %p3866_p12 = pnand %p3865_p11, %p3859_p8 }
 0x2e7   :  { %v2219_v38 = vpack.c.bf16 %v2155_v59, %v2151_v60 }
 0x2e8   :  { %v2221_v17 = vpack.c.bf16 %v2157_v48, %v2153_v63 }
 0x2eb   :  { %2655 = vmatmul.mubr.bf16.gmra.mrb[184].mxu0 %v2214_v19 }
 0x2ec   :  { %2816 = vmatmul.mubr.bf16.gmra.mrb[184].mxu1 %v2216_v2  ;;  %2662 = vmatprep.mubr.bf16.mxu0 %v2219_v38 }
 0x2ed   :  { %2823 = vmatprep.mubr.bf16.mxu1 %v2221_v17 }
 0x2f3   :  { %2663 = vmatmul.mubr.bf16.gmra.mrb[188].mxu0 %v2218_v58 }
 0x2f4   :  { %2824 = vmatmul.mubr.bf16.gmra.mrb[188].mxu1 %v2220_v8 }
 0x2f7   :  { %v3136_v23 = vpop.f32.mrb[128].mxu0 }
 0x2f8   :  { %v3137_v27 = vpop.f32.mrb[129].mxu0 }
 0x2f9   :  { %v3138_v55 = vadd.f32 %v3137_v27, %v3136_v23  ;;  %v3139_v47 = vpop.f32.mrb[130].mxu0 }
 0x2fa   :  { %v3248_v32 = vpop.f32.mrb[128].mxu1  ;;  %v3140_v61 = vpop.f32.mrb[131].mxu0 }
 0x2fb   :  { %v3249_v53 = vpop.f32.mrb[129].mxu1  ;;  %v3141_v50 = vadd.f32 %v3140_v61, %v3139_v47 }
 0x2fc   :  { %v3250_v52 = vadd.f32 %v3249_v53, %v3248_v32  ;;  %v3251_v22 = vpop.f32.mrb[130].mxu1 }
 0x2fd   :  { %v3252_v7 = vpop.f32.mrb[131].mxu1 }
 0x2fe   :  { %v2706_v34 = vadd.f32 %v3250_v52, %v3138_v55  ;;  %v3253_v13 = vadd.f32 %v3252_v7, %v3251_v22 }
 0x300   :  { %v2938_v43 = vadd.f32 %v6265_v4, %v2706_v34  ;;  %v2709_v56 = vadd.f32 %v3253_v13, %v3141_v50 }
 0x302   :  { %2970 = vst [vmem:[#allocation12] sm:$0xff] %v2938_v43  ;;  %v2939_v57 = vadd.f32 %v6265_v4, %v2709_v56 }
 0x304   :  { %2971 = vst [vmem:[#allocation12 + $0x8] sm:$0xff] %v2939_v57 }
 0x307   :  { %v3142_v37 = vpop.f32.mrb[132].mxu0 }
 0x308   :  { %v3254_v21 = vpop.f32.mrb[132].mxu1  ;;  %v3143_v28 = vpop.f32.mrb[133].mxu0 }
 0x309   :  { %v3144_v40 = vadd.f32 %v3143_v28, %v3142_v37  ;;  %v3255_v62 = vpop.f32.mrb[133].mxu1  ;;  %v3145_v31 = vpop.f32.mrb[134].mxu0 }
 0x30a   :  { %v3256_v3 = vadd.f32 %v3255_v62, %v3254_v21  ;;  %v3257_v26 = vpop.f32.mrb[134].mxu1  ;;  %v3146_v36 = vpop.f32.mrb[135].mxu0 }
 0x30b   :  { %v3147_v10 = vadd.f32 %v3146_v36, %v3145_v31  ;;  %v3258_v54 = vpop.f32.mrb[135].mxu1 }
 0x30c   :  { %v2714_v45 = vadd.f32 %v3256_v3, %v3144_v40  ;;  %v3259_v12 = vadd.f32 %v3258_v54, %v3257_v26 }
 0x30e   :  { %v2940_v51 = vadd.f32 %v6265_v4, %v2714_v45  ;;  %v2717_v5 = vadd.f32 %v3259_v12, %v3147_v10 }
 0x310   :  { %2972 = vst [vmem:[#allocation12 + $0x10] sm:$0xff] %v2940_v51  ;;  %v2941_v42 = vadd.f32 %v6265_v4, %v2717_v5 }
 0x312   :  { %2973 = vst [vmem:[#allocation12 + $0x18] sm:$0xff] %v2941_v42 }
 0x318   :  { %v3148_v33 = vpop.f32.mrb[136].mxu0  ;;  %v3260_v29 = vpop.f32.mrb[136].mxu1 }
 0x319   :  { %v3149_v24 = vpop.f32.mrb[137].mxu0  ;;  %v3261_v15 = vpop.f32.mrb[137].mxu1 }
 0x31a   :  { %v3150_v19 = vadd.f32 %v3149_v24, %v3148_v33  ;;  %v3151_v20 = vpop.f32.mrb[138].mxu0  ;;  %v3262_v18 = vadd.f32 %v3261_v15, %v3260_v29  ;;  %v3263_v1 = vpop.f32.mrb[138].mxu1 }
 0x31b   :  { %v3152_v41 = vpop.f32.mrb[139].mxu0  ;;  %v3264_v25 = vpop.f32.mrb[139].mxu1 }
 0x31c   :  { %v3153_v60 = vadd.f32 %v3152_v41, %v3151_v20  ;;  %v2722_v63 = vadd.f32 %v3262_v18, %v3150_v19  ;;  %v3265_v0 = vadd.f32 %v3264_v25, %v3263_v1 }
 0x31e   :  { %v2942_v2 = vadd.f32 %v6265_v4, %v2722_v63  ;;  %v2725_v6 = vadd.f32 %v3265_v0, %v3153_v60 }
 0x320   :  { %2974 = vst [vmem:[#allocation12 + $0x20] sm:$0xff] %v2942_v2  ;;  %v2943_v39 = vadd.f32 %v6265_v4, %v2725_v6 }
 0x322   :  { %2975 = vst [vmem:[#allocation12 + $0x28] sm:$0xff] %v2943_v39 }
 0x326   :  { %v3154_v46 = vpop.f32.mrb[140].mxu0  ;;  %v3266_v30 = vpop.f32.mrb[140].mxu1 }
 0x327   :  { %v3155_v49 = vpop.f32.mrb[141].mxu0  ;;  %v3267_v16 = vpop.f32.mrb[141].mxu1 }
 0x328   :  { %v3156_v9 = vadd.f32 %v3155_v49, %v3154_v46  ;;  %v3157_v11 = vpop.f32.mrb[142].mxu0  ;;  %v3268_v14 = vadd.f32 %v3267_v16, %v3266_v30  ;;  %v3269_v44 = vpop.f32.mrb[142].mxu1 }
 0x329   :  { %v3158_v59 = vpop.f32.mrb[143].mxu0  ;;  %v3270_v35 = vpop.f32.mrb[143].mxu1 }
 0x32a   :  { %v3159_v58 = vadd.f32 %v3158_v59, %v3157_v11  ;;  %v2730_v48 = vadd.f32 %v3268_v14, %v3156_v9  ;;  %v3271_v8 = vadd.f32 %v3270_v35, %v3269_v44 }
 0x32c   :  { %v2944_v38 = vadd.f32 %v6265_v4, %v2730_v48  ;;  %v2733_v17 = vadd.f32 %v3271_v8, %v3159_v58 }
 0x32e   :  { %2976 = vst [vmem:[#allocation12 + $0x30] sm:$0xff] %v2944_v38  ;;  %v2945_v23 = vadd.f32 %v6265_v4, %v2733_v17 }
 0x330   :  { %2977 = vst [vmem:[#allocation12 + $0x38] sm:$0xff] %v2945_v23 }
 0x335   :  { %v3160_v27 = vpop.f32.mrb[144].mxu0 }
 0x336   :  { %v3272_v55 = vpop.f32.mrb[144].mxu1  ;;  %v3161_v47 = vpop.f32.mrb[145].mxu0 }
 0x337   :  { %v3162_v32 = vadd.f32 %v3161_v47, %v3160_v27  ;;  %v3273_v61 = vpop.f32.mrb[145].mxu1  ;;  %v3163_v53 = vpop.f32.mrb[146].mxu0 }
 0x338   :  { %v3274_v50 = vadd.f32 %v3273_v61, %v3272_v55  ;;  %v3275_v52 = vpop.f32.mrb[146].mxu1  ;;  %v3164_v22 = vpop.f32.mrb[147].mxu0 }
 0x339   :  { %v3165_v7 = vadd.f32 %v3164_v22, %v3163_v53  ;;  %v3276_v34 = vpop.f32.mrb[147].mxu1 }
 0x33a   :  { %v2738_v13 = vadd.f32 %v3274_v50, %v3162_v32  ;;  %v3277_v43 = vadd.f32 %v3276_v34, %v3275_v52 }
 0x33c   :  { %v2946_v56 = vadd.f32 %v6265_v4, %v2738_v13  ;;  %v2741_v57 = vadd.f32 %v3277_v43, %v3165_v7 }
 0x33e   :  { %2978 = vst [vmem:[#allocation12 + $0x40] sm:$0xff] %v2946_v56  ;;  %v2947_v37 = vadd.f32 %v6265_v4, %v2741_v57 }
 0x340   :  { %2979 = vst [vmem:[#allocation12 + $0x48] sm:$0xff] %v2947_v37 }
 0x345   :  { %v3166_v21 = vpop.f32.mrb[148].mxu0 }
 0x346   :  { %v3278_v28 = vpop.f32.mrb[148].mxu1  ;;  %v3167_v40 = vpop.f32.mrb[149].mxu0 }
 0x347   :  { %v3168_v62 = vadd.f32 %v3167_v40, %v3166_v21  ;;  %v3279_v31 = vpop.f32.mrb[149].mxu1  ;;  %v3169_v3 = vpop.f32.mrb[150].mxu0 }
 0x348   :  { %v3280_v26 = vadd.f32 %v3279_v31, %v3278_v28  ;;  %v3281_v36 = vpop.f32.mrb[150].mxu1  ;;  %v3170_v10 = vpop.f32.mrb[151].mxu0 }
 0x349   :  { %v3171_v54 = vadd.f32 %v3170_v10, %v3169_v3  ;;  %v3282_v45 = vpop.f32.mrb[151].mxu1 }
 0x34a   :  { %v2746_v12 = vadd.f32 %v3280_v26, %v3168_v62  ;;  %v3283_v51 = vadd.f32 %v3282_v45, %v3281_v36 }
 0x34c   :  { %v2948_v5 = vadd.f32 %v6265_v4, %v2746_v12  ;;  %v2749_v42 = vadd.f32 %v3283_v51, %v3171_v54 }
 0x34e   :  { %2980 = vst [vmem:[#allocation12 + $0x50] sm:$0xff] %v2948_v5  ;;  %v2949_v33 = vadd.f32 %v6265_v4, %v2749_v42 }
 0x350   :  { %2981 = vst [vmem:[#allocation12 + $0x58] sm:$0xff] %v2949_v33 }
 0x354   :  { %v3172_v29 = vpop.f32.mrb[152].mxu0 }
 0x355   :  { %v3284_v24 = vpop.f32.mrb[152].mxu1  ;;  %v3173_v19 = vpop.f32.mrb[153].mxu0 }
 0x356   :  { %v3174_v15 = vadd.f32 %v3173_v19, %v3172_v29  ;;  %v3285_v20 = vpop.f32.mrb[153].mxu1  ;;  %v3175_v18 = vpop.f32.mrb[154].mxu0 }
 0x357   :  { %v3286_v1 = vadd.f32 %v3285_v20, %v3284_v24  ;;  %v3287_v41 = vpop.f32.mrb[154].mxu1  ;;  %v3176_v60 = vpop.f32.mrb[155].mxu0 }
 0x358   :  { %v3177_v25 = vadd.f32 %v3176_v60, %v3175_v18  ;;  %v3288_v63 = vpop.f32.mrb[155].mxu1 }
 0x359   :  { %v2754_v0 = vadd.f32 %v3286_v1, %v3174_v15  ;;  %v3289_v2 = vadd.f32 %v3288_v63, %v3287_v41 }
 0x35b   :  { %v2950_v6 = vadd.f32 %v6265_v4, %v2754_v0  ;;  %v2757_v39 = vadd.f32 %v3289_v2, %v3177_v25 }
 0x35d   :  { %2982 = vst [vmem:[#allocation12 + $0x60] sm:$0xff] %v2950_v6  ;;  %v2951_v46 = vadd.f32 %v6265_v4, %v2757_v39 }
 0x35f   :  { %2983 = vst [vmem:[#allocation12 + $0x68] sm:$0xff] %v2951_v46 }
 0x363   :  { %v3178_v30 = vpop.f32.mrb[156].mxu0  ;;  %v3290_v49 = vpop.f32.mrb[156].mxu1 }
 0x364   :  { %v3179_v9 = vpop.f32.mrb[157].mxu0  ;;  %v3291_v11 = vpop.f32.mrb[157].mxu1 }
 0x365   :  { %v3180_v16 = vadd.f32 %v3179_v9, %v3178_v30  ;;  %v3181_v14 = vpop.f32.mrb[158].mxu0  ;;  %v3292_v44 = vadd.f32 %v3291_v11, %v3290_v49  ;;  %v3293_v59 = vpop.f32.mrb[158].mxu1 }
 0x366   :  { %v3182_v58 = vpop.f32.mrb[159].mxu0  ;;  %v3294_v48 = vpop.f32.mrb[159].mxu1 }
 0x367   :  { %v3183_v35 = vadd.f32 %v3182_v58, %v3181_v14  ;;  %v2762_v8 = vadd.f32 %v3292_v44, %v3180_v16  ;;  %v3295_v38 = vadd.f32 %v3294_v48, %v3293_v59 }
 0x369   :  { %v2952_v17 = vadd.f32 %v6265_v4, %v2762_v8  ;;  %v2765_v23 = vadd.f32 %v3295_v38, %v3183_v35 }
 0x36b   :  { %2984 = vst [vmem:[#allocation12 + $0x70] sm:$0xff] %v2952_v17  ;;  %v2953_v27 = vadd.f32 %v6265_v4, %v2765_v23 }
 0x36d   :  { %2985 = vst [vmem:[#allocation12 + $0x78] sm:$0xff] %v2953_v27 }
 0x372   :  { %v3184_v55 = vpop.f32.mrb[160].mxu0 }
 0x373   :  { %v3296_v47 = vpop.f32.mrb[160].mxu1  ;;  %v3185_v32 = vpop.f32.mrb[161].mxu0 }
 0x374   :  { %v3186_v61 = vadd.f32 %v3185_v32, %v3184_v55  ;;  %v3297_v53 = vpop.f32.mrb[161].mxu1  ;;  %v3187_v50 = vpop.f32.mrb[162].mxu0 }
 0x375   :  { %v3298_v52 = vadd.f32 %v3297_v53, %v3296_v47  ;;  %v3299_v22 = vpop.f32.mrb[162].mxu1  ;;  %v3188_v7 = vpop.f32.mrb[163].mxu0 }
 0x376   :  { %v3189_v34 = vadd.f32 %v3188_v7, %v3187_v50  ;;  %v3300_v13 = vpop.f32.mrb[163].mxu1 }
 0x377   :  { %v2770_v43 = vadd.f32 %v3298_v52, %v3186_v61  ;;  %v3301_v56 = vadd.f32 %v3300_v13, %v3299_v22 }
 0x379   :  { %v2954_v57 = vadd.f32 %v6265_v4, %v2770_v43  ;;  %v2773_v37 = vadd.f32 %v3301_v56, %v3189_v34 }
 0x37b   :  { %2986 = vst [vmem:[#allocation12 + $0x80] sm:$0xff] %v2954_v57  ;;  %v2955_v21 = vadd.f32 %v6265_v4, %v2773_v37 }
 0x37d   :  { %2987 = vst [vmem:[#allocation12 + $0x88] sm:$0xff] %v2955_v21 }
 0x381   :  { %v3190_v28 = vpop.f32.mrb[164].mxu0  ;;  %v3302_v40 = vpop.f32.mrb[164].mxu1 }
 0x382   :  { %v3191_v62 = vpop.f32.mrb[165].mxu0  ;;  %v3303_v3 = vpop.f32.mrb[165].mxu1 }
 0x383   :  { %v3192_v31 = vadd.f32 %v3191_v62, %v3190_v28  ;;  %v3193_v26 = vpop.f32.mrb[166].mxu0  ;;  %v3304_v36 = vadd.f32 %v3303_v3, %v3302_v40  ;;  %v3305_v10 = vpop.f32.mrb[166].mxu1 }
 0x384   :  { %v3194_v54 = vpop.f32.mrb[167].mxu0  ;;  %v3306_v12 = vpop.f32.mrb[167].mxu1 }
 0x385   :  { %v3195_v45 = vadd.f32 %v3194_v54, %v3193_v26  ;;  %v2778_v51 = vadd.f32 %v3304_v36, %v3192_v31  ;;  %v3307_v5 = vadd.f32 %v3306_v12, %v3305_v10 }
 0x387   :  { %v2956_v42 = vadd.f32 %v6265_v4, %v2778_v51  ;;  %v2781_v33 = vadd.f32 %v3307_v5, %v3195_v45 }
 0x389   :  { %2988 = vst [vmem:[#allocation12 + $0x90] sm:$0xff] %v2956_v42  ;;  %v2957_v29 = vadd.f32 %v6265_v4, %v2781_v33 }
 0x38b   :  { %2989 = vst [vmem:[#allocation12 + $0x98] sm:$0xff] %v2957_v29 }
 0x390   :  { %v3196_v24 = vpop.f32.mrb[168].mxu0 }
 0x391   :  { %v3308_v19 = vpop.f32.mrb[168].mxu1  ;;  %v3197_v15 = vpop.f32.mrb[169].mxu0 }
 0x392   :  { %v3198_v20 = vadd.f32 %v3197_v15, %v3196_v24  ;;  %v3309_v18 = vpop.f32.mrb[169].mxu1  ;;  %v3199_v1 = vpop.f32.mrb[170].mxu0 }
 0x393   :  { %v3310_v41 = vadd.f32 %v3309_v18, %v3308_v19  ;;  %v3311_v60 = vpop.f32.mrb[170].mxu1  ;;  %v3200_v25 = vpop.f32.mrb[171].mxu0 }
 0x394   :  { %v3201_v63 = vadd.f32 %v3200_v25, %v3199_v1  ;;  %v3312_v0 = vpop.f32.mrb[171].mxu1 }
 0x395   :  { %v2786_v2 = vadd.f32 %v3310_v41, %v3198_v20  ;;  %v3313_v6 = vadd.f32 %v3312_v0, %v3311_v60 }
 0x397   :  { %v2958_v39 = vadd.f32 %v6265_v4, %v2786_v2  ;;  %v2789_v46 = vadd.f32 %v3313_v6, %v3201_v63 }
 0x399   :  { %2990 = vst [vmem:[#allocation12 + $0xa0] sm:$0xff] %v2958_v39  ;;  %v2959_v30 = vadd.f32 %v6265_v4, %v2789_v46 }
 0x39b   :  { %2991 = vst [vmem:[#allocation12 + $0xa8] sm:$0xff] %v2959_v30 }
 0x39f   :  { %v3202_v49 = vpop.f32.mrb[172].mxu0  ;;  %v3314_v9 = vpop.f32.mrb[172].mxu1 }
 0x3a0   :  { %v3203_v16 = vpop.f32.mrb[173].mxu0  ;;  %v3315_v14 = vpop.f32.mrb[173].mxu1 }
 0x3a1   :  { %v3204_v11 = vadd.f32 %v3203_v16, %v3202_v49  ;;  %v3205_v44 = vpop.f32.mrb[174].mxu0  ;;  %v3316_v59 = vadd.f32 %v3315_v14, %v3314_v9  ;;  %v3317_v58 = vpop.f32.mrb[174].mxu1 }
 0x3a2   :  { %v3206_v35 = vpop.f32.mrb[175].mxu0  ;;  %v3318_v8 = vpop.f32.mrb[175].mxu1 }
 0x3a3   :  { %v3207_v48 = vadd.f32 %v3206_v35, %v3205_v44  ;;  %v2794_v38 = vadd.f32 %v3316_v59, %v3204_v11  ;;  %v3319_v17 = vadd.f32 %v3318_v8, %v3317_v58 }
 0x3a5   :  { %v2960_v23 = vadd.f32 %v6265_v4, %v2794_v38  ;;  %v2797_v27 = vadd.f32 %v3319_v17, %v3207_v48 }
 0x3a7   :  { %2992 = vst [vmem:[#allocation12 + $0xb0] sm:$0xff] %v2960_v23  ;;  %v2961_v55 = vadd.f32 %v6265_v4, %v2797_v27 }
 0x3a9   :  { %2993 = vst [vmem:[#allocation12 + $0xb8] sm:$0xff] %v2961_v55 }
 0x3ae   :  { %v3208_v47 = vpop.f32.mrb[176].mxu0 }
 0x3af   :  { %v3320_v32 = vpop.f32.mrb[176].mxu1  ;;  %v3209_v61 = vpop.f32.mrb[177].mxu0 }
 0x3b0   :  { %v3210_v53 = vadd.f32 %v3209_v61, %v3208_v47  ;;  %v3321_v50 = vpop.f32.mrb[177].mxu1  ;;  %v3211_v52 = vpop.f32.mrb[178].mxu0 }
 0x3b1   :  { %v3322_v22 = vadd.f32 %v3321_v50, %v3320_v32  ;;  %v3323_v7 = vpop.f32.mrb[178].mxu1  ;;  %v3212_v34 = vpop.f32.mrb[179].mxu0 }
 0x3b2   :  { %v3213_v13 = vadd.f32 %v3212_v34, %v3211_v52  ;;  %v3324_v43 = vpop.f32.mrb[179].mxu1 }
 0x3b3   :  { %v2802_v56 = vadd.f32 %v3322_v22, %v3210_v53  ;;  %v3325_v57 = vadd.f32 %v3324_v43, %v3323_v7 }
 0x3b5   :  { %v2962_v37 = vadd.f32 %v6265_v4, %v2802_v56  ;;  %v2805_v21 = vadd.f32 %v3325_v57, %v3213_v13 }
 0x3b6   :  { %v3214_v28 = vpop.f32.mrb[180].mxu0 }
 0x3b7   :  { %2994 = vst [vmem:[#allocation12 + $0xc0] sm:$0xff] %v2962_v37  ;;  %v2963_v40 = vadd.f32 %v6265_v4, %v2805_v21  ;;  %v3326_v62 = vpop.f32.mrb[180].mxu1  ;;  %v3215_v31 = vpop.f32.mrb[181].mxu0 }
 0x3b8   :  { %v3216_v3 = vadd.f32 %v3215_v31, %v3214_v28  ;;  %v3327_v26 = vpop.f32.mrb[181].mxu1  ;;  %v3217_v36 = vpop.f32.mrb[182].mxu0 }
 0x3b9   :  { %2995 = vst [vmem:[#allocation12 + $0xc8] sm:$0xff] %v2963_v40  ;;  %v3328_v10 = vadd.f32 %v3327_v26, %v3326_v62  ;;  %v3329_v54 = vpop.f32.mrb[182].mxu1  ;;  %v3218_v45 = vpop.f32.mrb[183].mxu0 }
 0x3ba   :  { %v3219_v12 = vadd.f32 %v3218_v45, %v3217_v36  ;;  %v3330_v51 = vpop.f32.mrb[183].mxu1 }
 0x3bb   :  { %v2810_v5 = vadd.f32 %v3328_v10, %v3216_v3  ;;  %v3331_v42 = vadd.f32 %v3330_v51, %v3329_v54 }
 0x3bd   :  { %v2964_v33 = vadd.f32 %v6265_v4, %v2810_v5  ;;  %v2813_v29 = vadd.f32 %v3331_v42, %v3219_v12 }
 0x3be   :  { %v3220_v24 = vpop.f32.mrb[184].mxu0 }
 0x3bf   :  { %2996 = vst [vmem:[#allocation12 + $0xd0] sm:$0xff] %v2964_v33  ;;  %v2965_v19 = vadd.f32 %v6265_v4, %v2813_v29  ;;  %v3332_v15 = vpop.f32.mrb[184].mxu1  ;;  %v3221_v20 = vpop.f32.mrb[185].mxu0 }
 0x3c0   :  { %v3222_v18 = vadd.f32 %v3221_v20, %v3220_v24  ;;  %v3333_v1 = vpop.f32.mrb[185].mxu1  ;;  %v3223_v41 = vpop.f32.mrb[186].mxu0 }
 0x3c1   :  { %2997 = vst [vmem:[#allocation12 + $0xd8] sm:$0xff] %v2965_v19  ;;  %v3334_v60 = vadd.f32 %v3333_v1, %v3332_v15  ;;  %v3335_v25 = vpop.f32.mrb[186].mxu1  ;;  %v3224_v63 = vpop.f32.mrb[187].mxu0 }
 0x3c2   :  { %v3225_v0 = vadd.f32 %v3224_v63, %v3223_v41  ;;  %v3336_v2 = vpop.f32.mrb[187].mxu1 }
 0x3c3   :  { %v2818_v6 = vadd.f32 %v3334_v60, %v3222_v18  ;;  %v3337_v39 = vadd.f32 %v3336_v2, %v3335_v25 }
 0x3c5   :  { %v2966_v46 = vadd.f32 %v6265_v4, %v2818_v6  ;;  %v2821_v30 = vadd.f32 %v3337_v39, %v3225_v0 }
 0x3c6   :  { %v3226_v49 = vpop.f32.mrb[188].mxu0 }
 0x3c7   :  { %2998 = vst [vmem:[#allocation12 + $0xe0] sm:$0xff] %v2966_v46  ;;  %v2967_v9 = vadd.f32 %v6265_v4, %v2821_v30  ;;  %v3338_v16 = vpop.f32.mrb[188].mxu1  ;;  %v3227_v11 = vpop.f32.mrb[189].mxu0 }
 0x3c8   :  { %v3228_v14 = vadd.f32 %v3227_v11, %v3226_v49  ;;  %v3339_v44 = vpop.f32.mrb[189].mxu1  ;;  %v3229_v59 = vpop.f32.mrb[190].mxu0 }
 0x3c9   :  { %2999 = vst [vmem:[#allocation12 + $0xe8] sm:$0xff] %v2967_v9  ;;  %v3340_v58 = vadd.f32 %v3339_v44, %v3338_v16  ;;  %v3341_v35 = vpop.f32.mrb[190].mxu1  ;;  %v3230_v48 = vpop.f32.mrb[191].mxu0 }
 0x3ca   :  { %v3231_v8 = vadd.f32 %v3230_v48, %v3229_v59  ;;  %v3342_v38 = vpop.f32.mrb[191].mxu1 }
 0x3cb   :  { %v2826_v17 = vadd.f32 %v3340_v58, %v3228_v14  ;;  %v3343_v23 = vadd.f32 %v3342_v38, %v3341_v35 }
 0x3cd   :  { %v2968_v27 = vadd.f32 %v6265_v4, %v2826_v17  ;;  %v2829_v55 = vadd.f32 %v3343_v23, %v3231_v8 }
 0x3cf   :  { %3000 = vst [vmem:[#allocation12 + $0xf0] sm:$0xff] %v2968_v27  ;;  %v2969_v47 = vadd.f32 %v6265_v4, %v2829_v55 }
 0x3d1   :  { %3001 = vst [vmem:[#allocation12 + $0xf8] sm:$0xff] %v2969_v47 }
 0x3d2   :  { %3869 = shalt.err (!%p3866_p12)
}
 0x3d3   :  { %s3870_s25 = scalar_lea.hbm %s6321_s7, 4096 }
 0x3d4   :  { %p3871_p13 = scmp.ne.s32.totalorder %s6321_s7, %s3870_s25  ;;  %p3874_p0 = scmp.lt.u32.totalorder %s3870_s25, %s6321_s7 }
 0x3d6   :  { %p3876_p1 = pnand %p3874_p0, %p3871_p13 }
 0x3d8   :  { %3879 = shalt.err (!%p3876_p1)
}
 0x3d9   :  { %3013 = dma.vmem_to_hbm [thread:$0]  %s3008_s29, 4096, %s6321_s7, [#allocation5], %s3894_s21, %s3894_s21, %s3895_s22  }
 0x3da   :  { %3886 = dma.done.wait [#allocation5], 4096  }
 0x3db   :  { %3887 = vsyncadd [#allocation5], 4294963200 }
 0x3dc   :  { %3017 = vsyncpa [#allocation4], 1 }
 0x3dd   :  { %3018 = vsyncpa [#allocation7], 1 }
 0x3de   :  { %3019 = vsyncpa [#allocation10], 1 }
 0x3df   :  { %3020 = vsyncpa [#allocation5], 1 }

</bundles_post_ra>
